<compile_context>
chip_gen: v6e
topology: v6e:2x2x1
jax: 0.10.0
libtpu: 0.0.40
codegen_flags: <defaults>
</compile_context>

<pallas_src>
import math
import functools

import jax
import jax.numpy as jnp
from jax.experimental import pallas as pl
from jax.experimental.pallas import tpu as pltpu


def _layer_norm(x, gamma, beta, eps=1e-5):
    mean = jnp.mean(x, axis=-1, keepdims=True)
    var = jnp.mean(jnp.square(x - mean), axis=-1, keepdims=True)
    return (x - mean) * jax.lax.rsqrt(var + eps) * gamma + beta


def _softmax(x):
    m = jnp.max(x, axis=-1, keepdims=True)
    e = jnp.exp(x - m)
    return e * pl.reciprocal(jnp.sum(e, axis=-1, keepdims=True), approx=True)


def decoder_layer_kernel(num_heads,
                         x_ref, enc_ref, tbias_ref, mbias_ref,
                         wqkv_s_ref, bqkv_s_ref,
                         wq_c_ref, bq_c_ref, wkv_c_ref, bkv_c_ref,
                         wo_ref, bo_ref,
                         w1_ref, b1_ref, w2_ref, b2_ref,
                         ln_g_ref, ln_b_ref,
                         out_ref):
    _, E = x_ref.shape             # x: (block_b*T, E);  enc: (block_b*S, E)
    H = num_heads
    d = E // H
    bf16 = jnp.bfloat16

    x = x_ref[...]                 # f32
    enc = enc_ref[...]             # f32

    def attention(q_act, kv_act, q0, k0, v0, bias, which):
        # q_act/kv_act: bf16 projected activations (bias already added, 1/sqrt(d) folded into Wq).
        # Heads are sliced from bf16 data (half the relayout bytes) and batched only over H; the
        # block_b batch elements stay folded in the row dim, cross-batch score entries are
        # removed by the block-diagonal additive bias.
        qh = jnp.stack([q_act[:, q0 + h * d:q0 + (h + 1) * d] for h in range(H)], axis=0)
        kh = jnp.stack([kv_act[:, k0 + h * d:k0 + (h + 1) * d] for h in range(H)], axis=0)
        vh = jnp.stack([kv_act[:, v0 + h * d:v0 + (h + 1) * d] for h in range(H)], axis=0)
        # TODO(synk): if a bundle dump shows per-head vxpose feeding this contraction, build kh
        #             pre-transposed as (H, d, rows_kv) instead.
        s = jnp.einsum('hmd,hnd->hmn', qh, kh,
                       preferred_element_type=jnp.float32)           # (H, rows_q, rows_kv) f32
        p = _softmax(s + bias[None, :, :])                            # f32
        ctx = jnp.einsum('hmn,hnd->hmd', p.astype(bf16), vh,
                         preferred_element_type=jnp.float32).astype(bf16)
        heads_cat = jnp.concatenate([ctx[h] for h in range(H)], axis=-1)   # (rows_q, E) bf16
        return jnp.dot(heads_cat, wo_ref[which],
                       preferred_element_type=jnp.float32) + bo_ref[which]

    # --- self-attention (single fused (E, 3E) QKV projection) + residual + norm1 ---
    qkv_s = (jnp.dot(x.astype(bf16), wqkv_s_ref[...],
                     preferred_element_type=jnp.float32) + bqkv_s_ref[...]).astype(bf16)
    sa = attention(qkv_s, qkv_s, 0, E, 2 * E, tbias_ref[...], 0)
    x1 = _layer_norm(x + sa, ln_g_ref[0], ln_b_ref[0])

    # --- encoder-decoder attention + residual + norm2 ---
    q_c = (jnp.dot(x1.astype(bf16), wq_c_ref[...],
                   preferred_element_type=jnp.float32) + bq_c_ref[...]).astype(bf16)
    kv_c = (jnp.dot(enc.astype(bf16), wkv_c_ref[...],
                    preferred_element_type=jnp.float32) + bkv_c_ref[...]).astype(bf16)
    ca = attention(q_c, kv_c, 0, 0, E, mbias_ref[...], 1)
    x2 = _layer_norm(x1 + ca, ln_g_ref[1], ln_b_ref[1])

    # --- feed-forward (Linear -> ReLU -> Linear) + residual + norm3 ---
    hidden = jnp.maximum(
        jnp.dot(x2.astype(bf16), w1_ref[...],
                preferred_element_type=jnp.float32) + b1_ref[...], 0.0)
    ffn = jnp.dot(hidden.astype(bf16), w2_ref[...],
                  preferred_element_type=jnp.float32) + b2_ref[...]
    x3 = _layer_norm(x2 + ffn, ln_g_ref[2], ln_b_ref[2])

    out_ref[...] = x3.astype(out_ref.dtype)


def _mask_to_bias(mask, q_len, kv_len):
    # masked_fill(mask == 0, -1e9) semantics, as an additive f32 bias.
    if mask is None:
        return jnp.zeros((q_len, kv_len), jnp.float32)
    return jnp.where(mask == 0, -1e9, 0.0).astype(jnp.float32)


def _block_diag_bias(bias_pair, nb):
    # (q, k) additive bias -> (nb*q, nb*k) with -1e9 on every cross-batch block, so batch can
    # stay folded in the row dim of the attention matmuls.
    q_len, kv_len = bias_pair.shape
    eye = jnp.eye(nb, dtype=jnp.float32)
    same = jnp.kron(eye, jnp.ones((q_len, kv_len), jnp.float32))
    return jnp.where(same > 0, jnp.kron(eye, bias_pair), -1e9).astype(jnp.float32)


def _pick_block_b(B):
    # grid=1 on single-TC v5e/v6e (nothing to pipeline against, larger matmul M, one step of
    # fixed pipeline overhead); keep grid>=2 on dual-TC v7x so both cores get work.
    try:
        kind = jax.devices()[0].device_kind.lower()
    except Exception:
        kind = ""
    if "v7" in kind and B % 2 == 0:
        return B // 2
    return B


def transformer_decoder_layer(x, enc, tgt_mask, mem_mask, params, num_heads, block_b=None):
    B, T, E = x.shape
    S = enc.shape[1]
    F = params["ffn_w1"].shape[1]
    assert E % num_heads == 0
    if block_b is None:
        block_b = _pick_block_b(B)
    assert B % block_b == 0
    d = E // num_heads
    scale = 1.0 / math.sqrt(d)
    bf16 = jnp.bfloat16

    # Masks -> additive biases -> block-diagonal over the block_b batch elements.
    tbias = _block_diag_bias(_mask_to_bias(tgt_mask, T, T), block_b)
    mbias = _block_diag_bias(_mask_to_bias(mem_mask, T, S), block_b)

    # Fold batch*seq into rows: lane-dense 2D slabs for the MXU and the output store.
    x2d = x.reshape(B * T, E)
    enc2d = enc.reshape(B * S, E)

    # Wrapper-side weight prep (done once):
    #  * self-attn Q|K|V fused into one (E, 3E) matmul (q_in == kv_in),
    #  * 1/sqrt(d) folded into Wq / bq,
    #  * weight matrices cast to bf16 (biases / LayerNorm params stay f32).
    wq, bq = params["attn_wq"], params["attn_bq"]
    wkv, bkv = params["attn_wkv"], params["attn_bkv"]
    wqkv_s = jnp.concatenate([wq[0] * scale, wkv[0]], axis=-1).astype(bf16)    # (E, 3E)
    bqkv_s = jnp.concatenate([bq[0] * scale, bkv[0]], axis=-1)                 # (1, 3E) f32
    wq_c = (wq[1] * scale).astype(bf16)                                        # (E, E)
    bq_c = bq[1] * scale                                                       # (1, E)
    wkv_c = wkv[1].astype(bf16)                                                # (E, 2E)
    bkv_c = bkv[1]                                                             # (1, 2E)
    wo = params["attn_wo"].astype(bf16)                                        # (2, E, E)
    bo = params["attn_bo"]                                                     # (2, 1, E)
    w1 = params["ffn_w1"].astype(bf16)
    w2 = params["ffn_w2"].astype(bf16)

    rows_q = block_b * T
    rows_kv = block_b * S
    kernel = functools.partial(decoder_layer_kernel, num_heads)
    inv = lambda b: (0, 0)            # grid-invariant operands
    inv3 = lambda b: (0, 0, 0)

    out2d = pl.pallas_call(
        kernel,
        out_shape=jax.ShapeDtypeStruct((B * T, E), x.dtype),
        grid=(B // block_b,),
        in_specs=[
            pl.BlockSpec((rows_q, E), lambda b: (b, 0)),        # x rows per block
            pl.BlockSpec((rows_kv, E), lambda b: (b, 0)),       # enc rows per block
            pl.BlockSpec((rows_q, rows_q), inv),                # block-diag self-attn bias
            pl.BlockSpec((rows_q, rows_kv), inv),               # block-diag cross-attn bias
            pl.BlockSpec((E, 3 * E), inv),                      # self-attn fused Wqkv (bf16)
            pl.BlockSpec((1, 3 * E), inv),                      # fused bqkv
            pl.BlockSpec((E, E), inv),                          # cross-attn Wq (bf16, scaled)
            pl.BlockSpec((1, E), inv),                          # cross-attn bq (scaled)
            pl.BlockSpec((E, 2 * E), inv),                      # cross-attn Wkv (bf16)
            pl.BlockSpec((1, 2 * E), inv),                      # cross-attn bkv
            pl.BlockSpec((2, E, E), inv3),                      # Wo [self, cross] (bf16)
            pl.BlockSpec((2, 1, E), inv3),                      # bo
            pl.BlockSpec((E, F), inv),                          # ffn W1 (bf16)
            pl.BlockSpec((1, F), inv),                          # ffn b1
            pl.BlockSpec((F, E), inv),                          # ffn W2 (bf16)
            pl.BlockSpec((1, E), inv),                          # ffn b2
            pl.BlockSpec((3, 1, E), inv3),                      # LN gammas
            pl.BlockSpec((3, 1, E), inv3),                      # LN betas
        ],
        out_specs=pl.BlockSpec((rows_q, E), lambda b: (b, 0)),
        # TODO(synk): on dual-TC v7x try dimension_semantics=(pltpu.CORE_PARALLEL,).
        compiler_params=pltpu.CompilerParams(
            dimension_semantics=("parallel",),
            vmem_limit_bytes=32 * 1024 * 1024),
    )(x2d, enc2d, tbias, mbias,
      wqkv_s, bqkv_s, wq_c, bq_c, wkv_c, bkv_c, wo, bo,
      w1, params["ffn_b1"], w2, params["ffn_b2"],
      params["ln_g"], params["ln_b"])
    return out2d.reshape(B, T, E)


def _reference(x, enc, tgt_mask, mem_mask, params, num_heads):
    # Pure-JAX f32 reference (PyTorch eval-mode semantics).
    B, T, E = x.shape
    H = num_heads
    d = E // H
    scale = 1.0 / math.sqrt(d)

    def mha(which, q_in, kv_in, mask):
        q = q_in @ params["attn_wq"][which] + params["attn_bq"][which]
        kv = kv_in @ params["attn_wkv"][which] + params["attn_bkv"][which]
        k, v = kv[..., :E], kv[..., E:]
        split = lambda t: t.reshape(B, -1, H, d).transpose(0, 2, 1, 3)
        qh, kh, vh = split(q), split(k), split(v)
        s = jnp.einsum('bhtd,bhsd->bhts', qh, kh) * scale
        if mask is not None:
            s = jnp.where(mask[None, None] == 0, -1e9, s)
        p = jax.nn.softmax(s, axis=-1)
        ctx = jnp.einsum('bhts,bhsd->bhtd', p, vh)
        ctx = ctx.transpose(0, 2, 1, 3).reshape(B, -1, E)
        return ctx @ params["attn_wo"][which] + params["attn_bo"][which]

    def ln(y, g, b):
        m = y.mean(-1, keepdims=True)
        v = jnp.mean((y - m) ** 2, axis=-1, keepdims=True)
        return (y - m) / jnp.sqrt(v + 1e-5) * g + b

    x1 = ln(x + mha(0, x, x, tgt_mask), params["ln_g"][0], params["ln_b"][0])
    x2 = ln(x1 + mha(1, x1, enc, mem_mask), params["ln_g"][1], params["ln_b"][1])
    h = jax.nn.relu(x2 @ params["ffn_w1"] + params["ffn_b1"])
    f = h @ params["ffn_w2"] + params["ffn_b2"]
    return ln(x2 + f, params["ln_g"][2], params["ln_b"][2])


if __name__ == "__main__":
    # E chosen as a multiple of 128 (lane-dense).
    B, T, S, E, H, F = 4, 16, 16, 128, 4, 256
    key = jax.random.PRNGKey(0)
    k = jax.random.split(key, 12)
    init = 0.02

    x = jax.random.normal(k[0], (B, T, E), jnp.float32)
    enc = jax.random.normal(k[1], (B, S, E), jnp.float32)
    tgt_mask = jnp.tril(jnp.ones((T, T), jnp.float32))     # causal self-attn mask
    mem_mask = jnp.ones((T, S), jnp.float32)               # no masking on memory

    params = {
        # [self_attn, enc_dec_attn] stacked on the leading axis; K/V projections pre-fused.
        "attn_wq": init * jax.random.normal(k[2], (2, E, E), jnp.float32),
        "attn_bq": init * jax.random.normal(k[3], (2, 1, E), jnp.float32),
        "attn_wkv": init * jax.random.normal(k[4], (2, E, 2 * E), jnp.float32),
        "attn_bkv": init * jax.random.normal(k[5], (2, 1, 2 * E), jnp.float32),
        "attn_wo": init * jax.random.normal(k[6], (2, E, E), jnp.float32),
        "attn_bo": init * jax.random.normal(k[7], (2, 1, E), jnp.float32),
        "ffn_w1": init * jax.random.normal(k[8], (E, F), jnp.float32),
        "ffn_b1": init * jax.random.normal(k[9], (1, F), jnp.float32),
        "ffn_w2": init * jax.random.normal(k[10], (F, E), jnp.float32),
        "ffn_b2": init * jax.random.normal(k[11], (1, E), jnp.float32),
        # stacked [norm1, norm2, norm3]
        "ln_g": jnp.ones((3, 1, E), jnp.float32),
        "ln_b": jnp.zeros((3, 1, E), jnp.float32),
    }

    out = transformer_decoder_layer(x, enc, tgt_mask, mem_mask, params, H)
    out = jax.block_until_ready(out)
    assert out.shape == (B, T, E)
    assert bool(jnp.all(jnp.isfinite(out)))

    # Loose check vs. the f32 reference (bf16 MXU inputs + approx reciprocal => ~1e-2 noise).
    ref = _reference(x, enc, tgt_mask, mem_mask, params, H)
    assert float(jnp.max(jnp.abs(out - ref))) < 0.2

    print("KERNEL_OK")
</pallas_src>

<mosaic_0001>
module attributes {stable_mosaic.version = 11 : i64} {
  func.func @decoder_layer_kernel(%arg0: i32, %arg1: memref<64x128xf32, #tpu.memory_space<vmem>>, %arg2: memref<64x128xf32, #tpu.memory_space<vmem>>, %arg3: memref<64x64xf32, #tpu.memory_space<vmem>>, %arg4: memref<64x64xf32, #tpu.memory_space<vmem>>, %arg5: memref<128x384xbf16, #tpu.memory_space<vmem>>, %arg6: memref<1x384xf32, #tpu.memory_space<vmem>>, %arg7: memref<128x128xbf16, #tpu.memory_space<vmem>>, %arg8: memref<1x128xf32, #tpu.memory_space<vmem>>, %arg9: memref<128x256xbf16, #tpu.memory_space<vmem>>, %arg10: memref<1x256xf32, #tpu.memory_space<vmem>>, %arg11: memref<2x128x128xbf16, #tpu.memory_space<vmem>>, %arg12: memref<2x1x128xf32, #tpu.memory_space<vmem>>, %arg13: memref<128x256xbf16, #tpu.memory_space<vmem>>, %arg14: memref<1x256xf32, #tpu.memory_space<vmem>>, %arg15: memref<256x128xbf16, #tpu.memory_space<vmem>>, %arg16: memref<1x128xf32, #tpu.memory_space<vmem>>, %arg17: memref<3x1x128xf32, #tpu.memory_space<vmem>>, %arg18: memref<3x1x128xf32, #tpu.memory_space<vmem>>, %arg19: memref<64x128xf32, #tpu.memory_space<vmem>>) attributes {dimension_semantics = [#tpu.dimension_semantics<parallel>], iteration_bounds = array<i64: 1>, scalar_prefetch = 0 : i64, scratch_operands = 0 : i64, tpu.core_type = #tpu.core_type<tc>, window_params = [{transform_indices = @transform_0, window_bounds = array<i64: 64, 128>}, {transform_indices = @transform_1, window_bounds = array<i64: 64, 128>}, {pipeline_mode = #tpu.pipeline_mode<synchronous>, transform_indices = @transform_2, window_bounds = array<i64: 64, 64>}, {pipeline_mode = #tpu.pipeline_mode<synchronous>, transform_indices = @transform_3, window_bounds = array<i64: 64, 64>}, {pipeline_mode = #tpu.pipeline_mode<synchronous>, transform_indices = @transform_4, window_bounds = array<i64: 128, 384>}, {pipeline_mode = #tpu.pipeline_mode<synchronous>, transform_indices = @transform_5, window_bounds = array<i64: 1, 384>}, {pipeline_mode = #tpu.pipeline_mode<synchronous>, transform_indices = @transform_6, window_bounds = array<i64: 128, 128>}, {pipeline_mode = #tpu.pipeline_mode<synchronous>, transform_indices = @transform_7, window_bounds = array<i64: 1, 128>}, {pipeline_mode = #tpu.pipeline_mode<synchronous>, transform_indices = @transform_8, window_bounds = array<i64: 128, 256>}, {pipeline_mode = #tpu.pipeline_mode<synchronous>, transform_indices = @transform_9, window_bounds = array<i64: 1, 256>}, {pipeline_mode = #tpu.pipeline_mode<synchronous>, transform_indices = @transform_10, window_bounds = array<i64: 2, 128, 128>}, {pipeline_mode = #tpu.pipeline_mode<synchronous>, transform_indices = @transform_11, window_bounds = array<i64: 2, 1, 128>}, {pipeline_mode = #tpu.pipeline_mode<synchronous>, transform_indices = @transform_12, window_bounds = array<i64: 128, 256>}, {pipeline_mode = #tpu.pipeline_mode<synchronous>, transform_indices = @transform_13, window_bounds = array<i64: 1, 256>}, {pipeline_mode = #tpu.pipeline_mode<synchronous>, transform_indices = @transform_14, window_bounds = array<i64: 256, 128>}, {pipeline_mode = #tpu.pipeline_mode<synchronous>, transform_indices = @transform_15, window_bounds = array<i64: 1, 128>}, {pipeline_mode = #tpu.pipeline_mode<synchronous>, transform_indices = @transform_16, window_bounds = array<i64: 3, 1, 128>}, {pipeline_mode = #tpu.pipeline_mode<synchronous>, transform_indices = @transform_17, window_bounds = array<i64: 3, 1, 128>}, {transform_indices = @transform_18, window_bounds = array<i64: 64, 128>}]} {
    %c0 = arith.constant 0 : index
    %c0_0 = arith.constant 0 : index
    %0 = vector.load %arg1[%c0, %c0_0] : memref<64x128xf32, #tpu.memory_space<vmem>>, vector<64x128xf32>
    %c0_1 = arith.constant 0 : index
    %c0_2 = arith.constant 0 : index
    %1 = vector.load %arg2[%c0_1, %c0_2] : memref<64x128xf32, #tpu.memory_space<vmem>>, vector<64x128xf32>
    %2 = arith.truncf %0 : vector<64x128xf32> to vector<64x128xbf16>
    %c0_3 = arith.constant 0 : index
    %c0_4 = arith.constant 0 : index
    %3 = vector.load %arg5[%c0_3, %c0_4] : memref<128x384xbf16, #tpu.memory_space<vmem>>, vector<128x384xbf16>
    %cst = arith.constant dense<0.000000e+00> : vector<64x384xf32>
    %4 = tpu.matmul %2, %3, %cst {dimension_numbers = #tpu.dot_dimension_numbers<[1], [0], [0], [1], [0, 0, 1, 1], [], []>} : vector<64x128xbf16>, vector<128x384xbf16>, vector<64x384xf32> -> vector<64x384xf32>
    %c0_5 = arith.constant 0 : index
    %c0_6 = arith.constant 0 : index
    %5 = vector.load %arg6[%c0_5, %c0_6] : memref<1x384xf32, #tpu.memory_space<vmem>>, vector<1x384xf32>
    %6 = vector.broadcast %5 : vector<1x384xf32> to vector<64x384xf32>
    %7 = arith.addf %4, %6 : vector<64x384xf32>
    %8 = arith.truncf %7 : vector<64x384xf32> to vector<64x384xbf16>
    %c0_7 = arith.constant 0 : index
    %c0_8 = arith.constant 0 : index
    %9 = vector.load %arg3[%c0_7, %c0_8] : memref<64x64xf32, #tpu.memory_space<vmem>>, vector<64x64xf32>
    %10 = vector.extract_strided_slice %8 {offsets = [0, 0], sizes = [64, 32], strides = [1, 1]} : vector<64x384xbf16> to vector<64x32xbf16>
    %11 = vector.extract_strided_slice %8 {offsets = [0, 32], sizes = [64, 32], strides = [1, 1]} : vector<64x384xbf16> to vector<64x32xbf16>
    %12 = vector.extract_strided_slice %8 {offsets = [0, 64], sizes = [64, 32], strides = [1, 1]} : vector<64x384xbf16> to vector<64x32xbf16>
    %13 = vector.extract_strided_slice %8 {offsets = [0, 96], sizes = [64, 32], strides = [1, 1]} : vector<64x384xbf16> to vector<64x32xbf16>
    %14 = vector.shape_cast %10 : vector<64x32xbf16> to vector<1x64x32xbf16>
    %15 = vector.shape_cast %11 : vector<64x32xbf16> to vector<1x64x32xbf16>
    %16 = vector.shape_cast %12 : vector<64x32xbf16> to vector<1x64x32xbf16>
    %17 = vector.shape_cast %13 : vector<64x32xbf16> to vector<1x64x32xbf16>
    %18 = tpu.concatenate %14, %15, %16, %17 in 0 : vector<1x64x32xbf16>, vector<1x64x32xbf16>, vector<1x64x32xbf16>, vector<1x64x32xbf16> -> vector<4x64x32xbf16>
    %19 = vector.extract_strided_slice %8 {offsets = [0, 128], sizes = [64, 32], strides = [1, 1]} : vector<64x384xbf16> to vector<64x32xbf16>
    %20 = vector.extract_strided_slice %8 {offsets = [0, 160], sizes = [64, 32], strides = [1, 1]} : vector<64x384xbf16> to vector<64x32xbf16>
    %21 = vector.extract_strided_slice %8 {offsets = [0, 192], sizes = [64, 32], strides = [1, 1]} : vector<64x384xbf16> to vector<64x32xbf16>
    %22 = vector.extract_strided_slice %8 {offsets = [0, 224], sizes = [64, 32], strides = [1, 1]} : vector<64x384xbf16> to vector<64x32xbf16>
    %23 = vector.shape_cast %19 : vector<64x32xbf16> to vector<1x64x32xbf16>
    %24 = vector.shape_cast %20 : vector<64x32xbf16> to vector<1x64x32xbf16>
    %25 = vector.shape_cast %21 : vector<64x32xbf16> to vector<1x64x32xbf16>
    %26 = vector.shape_cast %22 : vector<64x32xbf16> to vector<1x64x32xbf16>
    %27 = tpu.concatenate %23, %24, %25, %26 in 0 : vector<1x64x32xbf16>, vector<1x64x32xbf16>, vector<1x64x32xbf16>, vector<1x64x32xbf16> -> vector<4x64x32xbf16>
    %28 = vector.extract_strided_slice %8 {offsets = [0, 256], sizes = [64, 32], strides = [1, 1]} : vector<64x384xbf16> to vector<64x32xbf16>
    %29 = vector.extract_strided_slice %8 {offsets = [0, 288], sizes = [64, 32], strides = [1, 1]} : vector<64x384xbf16> to vector<64x32xbf16>
    %30 = vector.extract_strided_slice %8 {offsets = [0, 320], sizes = [64, 32], strides = [1, 1]} : vector<64x384xbf16> to vector<64x32xbf16>
    %31 = vector.extract_strided_slice %8 {offsets = [0, 352], sizes = [64, 32], strides = [1, 1]} : vector<64x384xbf16> to vector<64x32xbf16>
    %32 = vector.shape_cast %28 : vector<64x32xbf16> to vector<1x64x32xbf16>
    %33 = vector.shape_cast %29 : vector<64x32xbf16> to vector<1x64x32xbf16>
    %34 = vector.shape_cast %30 : vector<64x32xbf16> to vector<1x64x32xbf16>
    %35 = vector.shape_cast %31 : vector<64x32xbf16> to vector<1x64x32xbf16>
    %36 = tpu.concatenate %32, %33, %34, %35 in 0 : vector<1x64x32xbf16>, vector<1x64x32xbf16>, vector<1x64x32xbf16>, vector<1x64x32xbf16> -> vector<4x64x32xbf16>
    "tpu.trace_start"() <{level = 10 : i32, message = "hmd,hnd->hmn"}> : () -> ()
    %cst_9 = arith.constant dense<0.000000e+00> : vector<4x64x64xf32>
    %37 = tpu.matmul %18, %27, %cst_9 {dimension_numbers = #tpu.dot_dimension_numbers<[2], [2], [1], [1], [0, 0, 0, 1, 1, 1], [0], [0]>} : vector<4x64x32xbf16>, vector<4x64x32xbf16>, vector<4x64x64xf32> -> vector<4x64x64xf32>
    "tpu.trace_stop"() : () -> ()
    %38 = vector.shape_cast %9 : vector<64x64xf32> to vector<1x64x64xf32>
    %39 = vector.broadcast %38 : vector<1x64x64xf32> to vector<4x64x64xf32>
    %40 = arith.addf %37, %39 : vector<4x64x64xf32>
    %cst_10 = arith.constant dense<0xFF800000> : vector<4x64xf32>
    %41 = vector.multi_reduction <maximumf>, %40, %cst_10 [2] : vector<4x64x64xf32> to vector<4x64xf32>
    %42 = vector.shape_cast %41 : vector<4x64xf32> to vector<4x64x1xf32>
    %43 = vector.broadcast %42 : vector<4x64x1xf32> to vector<4x64x64xf32>
    %44 = arith.subf %40, %43 : vector<4x64x64xf32>
    %45 = math.exp %44 : vector<4x64x64xf32>
    %cst_11 = arith.constant dense<0.000000e+00> : vector<4x64xf32>
    %46 = vector.multi_reduction <add>, %45, %cst_11 [2] : vector<4x64x64xf32> to vector<4x64xf32>
    %47 = vector.shape_cast %46 : vector<4x64xf32> to vector<4x64x1xf32>
    %48 = tpu.reciprocal %47 {approx = true} : vector<4x64x1xf32> -> vector<4x64x1xf32>
    %49 = vector.broadcast %48 : vector<4x64x1xf32> to vector<4x64x64xf32>
    %50 = arith.mulf %45, %49 : vector<4x64x64xf32>
    %51 = arith.truncf %50 : vector<4x64x64xf32> to vector<4x64x64xbf16>
    "tpu.trace_start"() <{level = 10 : i32, message = "hmn,hnd->hmd"}> : () -> ()
    %cst_12 = arith.constant dense<0.000000e+00> : vector<4x64x32xf32>
    %52 = tpu.matmul %51, %36, %cst_12 {dimension_numbers = #tpu.dot_dimension_numbers<[2], [1], [1], [2], [0, 0, 0, 1, 1, 2], [0], [0]>} : vector<4x64x64xbf16>, vector<4x64x32xbf16>, vector<4x64x32xf32> -> vector<4x64x32xf32>
    "tpu.trace_stop"() : () -> ()
    %53 = arith.truncf %52 : vector<4x64x32xf32> to vector<4x64x32xbf16>
    %54 = vector.extract_strided_slice %53 {offsets = [0, 0, 0], sizes = [1, 64, 32], strides = [1, 1, 1]} : vector<4x64x32xbf16> to vector<1x64x32xbf16>
    %55 = vector.shape_cast %54 : vector<1x64x32xbf16> to vector<64x32xbf16>
    %56 = vector.extract_strided_slice %53 {offsets = [1, 0, 0], sizes = [1, 64, 32], strides = [1, 1, 1]} : vector<4x64x32xbf16> to vector<1x64x32xbf16>
    %57 = vector.shape_cast %56 : vector<1x64x32xbf16> to vector<64x32xbf16>
    %58 = vector.extract_strided_slice %53 {offsets = [2, 0, 0], sizes = [1, 64, 32], strides = [1, 1, 1]} : vector<4x64x32xbf16> to vector<1x64x32xbf16>
    %59 = vector.shape_cast %58 : vector<1x64x32xbf16> to vector<64x32xbf16>
    %60 = vector.extract_strided_slice %53 {offsets = [3, 0, 0], sizes = [1, 64, 32], strides = [1, 1, 1]} : vector<4x64x32xbf16> to vector<1x64x32xbf16>
    %61 = vector.shape_cast %60 : vector<1x64x32xbf16> to vector<64x32xbf16>
    %62 = tpu.concatenate %55, %57, %59, %61 in 1 : vector<64x32xbf16>, vector<64x32xbf16>, vector<64x32xbf16>, vector<64x32xbf16> -> vector<64x128xbf16>
    %c0_13 = arith.constant 0 : index
    %c0_14 = arith.constant 0 : index
    %c0_15 = arith.constant 0 : index
    %63 = vector.load %arg11[%c0_13, %c0_14, %c0_15] : memref<2x128x128xbf16, #tpu.memory_space<vmem>>, vector<1x128x128xbf16>
    %64 = vector.shape_cast %63 : vector<1x128x128xbf16> to vector<128x128xbf16>
    %cst_16 = arith.constant dense<0.000000e+00> : vector<64x128xf32>
    %65 = tpu.matmul %62, %64, %cst_16 {dimension_numbers = #tpu.dot_dimension_numbers<[1], [0], [0], [1], [0, 0, 1, 1], [], []>} : vector<64x128xbf16>, vector<128x128xbf16>, vector<64x128xf32> -> vector<64x128xf32>
    %c0_17 = arith.constant 0 : index
    %c0_18 = arith.constant 0 : index
    %c0_19 = arith.constant 0 : index
    %66 = vector.load %arg12[%c0_17, %c0_18, %c0_19] : memref<2x1x128xf32, #tpu.memory_space<vmem>>, vector<1x1x128xf32>
    %67 = vector.shape_cast %66 : vector<1x1x128xf32> to vector<1x128xf32>
    %68 = vector.broadcast %67 : vector<1x128xf32> to vector<64x128xf32>
    %69 = arith.addf %65, %68 : vector<64x128xf32>
    %70 = arith.addf %0, %69 : vector<64x128xf32>
    %c0_20 = arith.constant 0 : index
    %c0_21 = arith.constant 0 : index
    %c0_22 = arith.constant 0 : index
    %71 = vector.load %arg17[%c0_20, %c0_21, %c0_22] : memref<3x1x128xf32, #tpu.memory_space<vmem>>, vector<1x1x128xf32>
    %72 = vector.shape_cast %71 : vector<1x1x128xf32> to vector<1x128xf32>
    %c0_23 = arith.constant 0 : index
    %c0_24 = arith.constant 0 : index
    %c0_25 = arith.constant 0 : index
    %73 = vector.load %arg18[%c0_23, %c0_24, %c0_25] : memref<3x1x128xf32, #tpu.memory_space<vmem>>, vector<1x1x128xf32>
    %74 = vector.shape_cast %73 : vector<1x1x128xf32> to vector<1x128xf32>
    %cst_26 = arith.constant dense<0.000000e+00> : vector<64xf32>
    %75 = vector.multi_reduction <add>, %70, %cst_26 [1] : vector<64x128xf32> to vector<64xf32>
    %76 = vector.shape_cast %75 : vector<64xf32> to vector<64x1xf32>
    %cst_27 = arith.constant 1.280000e+02 : f32
    %77 = vector.broadcast %cst_27 : f32 to vector<64x1xf32>
    %78 = arith.divf %76, %77 : vector<64x1xf32>
    %79 = vector.broadcast %78 : vector<64x1xf32> to vector<64x128xf32>
    %80 = arith.subf %70, %79 : vector<64x128xf32>
    %81 = arith.mulf %80, %80 : vector<64x128xf32>
    %cst_28 = arith.constant dense<0.000000e+00> : vector<64xf32>
    %82 = vector.multi_reduction <add>, %81, %cst_28 [1] : vector<64x128xf32> to vector<64xf32>
    %83 = vector.shape_cast %82 : vector<64xf32> to vector<64x1xf32>
    %cst_29 = arith.constant 1.280000e+02 : f32
    %84 = vector.broadcast %cst_29 : f32 to vector<64x1xf32>
    %85 = arith.divf %83, %84 : vector<64x1xf32>
    %86 = vector.broadcast %78 : vector<64x1xf32> to vector<64x128xf32>
    %87 = arith.subf %70, %86 : vector<64x128xf32>
    %cst_30 = arith.constant 9.99999974E-6 : f32
    %88 = vector.broadcast %cst_30 : f32 to vector<64x1xf32>
    %89 = arith.addf %85, %88 : vector<64x1xf32>
    %90 = math.rsqrt %89 : vector<64x1xf32>
    %91 = vector.broadcast %90 : vector<64x1xf32> to vector<64x128xf32>
    %92 = arith.mulf %87, %91 : vector<64x128xf32>
    %93 = vector.broadcast %72 : vector<1x128xf32> to vector<64x128xf32>
    %94 = arith.mulf %92, %93 : vector<64x128xf32>
    %95 = vector.broadcast %74 : vector<1x128xf32> to vector<64x128xf32>
    %96 = arith.addf %94, %95 : vector<64x128xf32>
    %97 = arith.truncf %96 : vector<64x128xf32> to vector<64x128xbf16>
    %c0_31 = arith.constant 0 : index
    %c0_32 = arith.constant 0 : index
    %98 = vector.load %arg7[%c0_31, %c0_32] : memref<128x128xbf16, #tpu.memory_space<vmem>>, vector<128x128xbf16>
    %cst_33 = arith.constant dense<0.000000e+00> : vector<64x128xf32>
    %99 = tpu.matmul %97, %98, %cst_33 {dimension_numbers = #tpu.dot_dimension_numbers<[1], [0], [0], [1], [0, 0, 1, 1], [], []>} : vector<64x128xbf16>, vector<128x128xbf16>, vector<64x128xf32> -> vector<64x128xf32>
    %c0_34 = arith.constant 0 : index
    %c0_35 = arith.constant 0 : index
    %100 = vector.load %arg8[%c0_34, %c0_35] : memref<1x128xf32, #tpu.memory_space<vmem>>, vector<1x128xf32>
    %101 = vector.broadcast %100 : vector<1x128xf32> to vector<64x128xf32>
    %102 = arith.addf %99, %101 : vector<64x128xf32>
    %103 = arith.truncf %102 : vector<64x128xf32> to vector<64x128xbf16>
    %104 = arith.truncf %1 : vector<64x128xf32> to vector<64x128xbf16>
    %c0_36 = arith.constant 0 : index
    %c0_37 = arith.constant 0 : index
    %105 = vector.load %arg9[%c0_36, %c0_37] : memref<128x256xbf16, #tpu.memory_space<vmem>>, vector<128x256xbf16>
    %cst_38 = arith.constant dense<0.000000e+00> : vector<64x256xf32>
    %106 = tpu.matmul %104, %105, %cst_38 {dimension_numbers = #tpu.dot_dimension_numbers<[1], [0], [0], [1], [0, 0, 1, 1], [], []>} : vector<64x128xbf16>, vector<128x256xbf16>, vector<64x256xf32> -> vector<64x256xf32>
    %c0_39 = arith.constant 0 : index
    %c0_40 = arith.constant 0 : index
    %107 = vector.load %arg10[%c0_39, %c0_40] : memref<1x256xf32, #tpu.memory_space<vmem>>, vector<1x256xf32>
    %108 = vector.broadcast %107 : vector<1x256xf32> to vector<64x256xf32>
    %109 = arith.addf %106, %108 : vector<64x256xf32>
    %110 = arith.truncf %109 : vector<64x256xf32> to vector<64x256xbf16>
    %c0_41 = arith.constant 0 : index
    %c0_42 = arith.constant 0 : index
    %111 = vector.load %arg4[%c0_41, %c0_42] : memref<64x64xf32, #tpu.memory_space<vmem>>, vector<64x64xf32>
    %112 = vector.extract_strided_slice %103 {offsets = [0, 0], sizes = [64, 32], strides = [1, 1]} : vector<64x128xbf16> to vector<64x32xbf16>
    %113 = vector.extract_strided_slice %103 {offsets = [0, 32], sizes = [64, 32], strides = [1, 1]} : vector<64x128xbf16> to vector<64x32xbf16>
    %114 = vector.extract_strided_slice %103 {offsets = [0, 64], sizes = [64, 32], strides = [1, 1]} : vector<64x128xbf16> to vector<64x32xbf16>
    %115 = vector.extract_strided_slice %103 {offsets = [0, 96], sizes = [64, 32], strides = [1, 1]} : vector<64x128xbf16> to vector<64x32xbf16>
    %116 = vector.shape_cast %112 : vector<64x32xbf16> to vector<1x64x32xbf16>
    %117 = vector.shape_cast %113 : vector<64x32xbf16> to vector<1x64x32xbf16>
    %118 = vector.shape_cast %114 : vector<64x32xbf16> to vector<1x64x32xbf16>
    %119 = vector.shape_cast %115 : vector<64x32xbf16> to vector<1x64x32xbf16>
    %120 = tpu.concatenate %116, %117, %118, %119 in 0 : vector<1x64x32xbf16>, vector<1x64x32xbf16>, vector<1x64x32xbf16>, vector<1x64x32xbf16> -> vector<4x64x32xbf16>
    %121 = vector.extract_strided_slice %110 {offsets = [0, 0], sizes = [64, 32], strides = [1, 1]} : vector<64x256xbf16> to vector<64x32xbf16>
    %122 = vector.extract_strided_slice %110 {offsets = [0, 32], sizes = [64, 32], strides = [1, 1]} : vector<64x256xbf16> to vector<64x32xbf16>
    %123 = vector.extract_strided_slice %110 {offsets = [0, 64], sizes = [64, 32], strides = [1, 1]} : vector<64x256xbf16> to vector<64x32xbf16>
    %124 = vector.extract_strided_slice %110 {offsets = [0, 96], sizes = [64, 32], strides = [1, 1]} : vector<64x256xbf16> to vector<64x32xbf16>
    %125 = vector.shape_cast %121 : vector<64x32xbf16> to vector<1x64x32xbf16>
    %126 = vector.shape_cast %122 : vector<64x32xbf16> to vector<1x64x32xbf16>
    %127 = vector.shape_cast %123 : vector<64x32xbf16> to vector<1x64x32xbf16>
    %128 = vector.shape_cast %124 : vector<64x32xbf16> to vector<1x64x32xbf16>
    %129 = tpu.concatenate %125, %126, %127, %128 in 0 : vector<1x64x32xbf16>, vector<1x64x32xbf16>, vector<1x64x32xbf16>, vector<1x64x32xbf16> -> vector<4x64x32xbf16>
    %130 = vector.extract_strided_slice %110 {offsets = [0, 128], sizes = [64, 32], strides = [1, 1]} : vector<64x256xbf16> to vector<64x32xbf16>
    %131 = vector.extract_strided_slice %110 {offsets = [0, 160], sizes = [64, 32], strides = [1, 1]} : vector<64x256xbf16> to vector<64x32xbf16>
    %132 = vector.extract_strided_slice %110 {offsets = [0, 192], sizes = [64, 32], strides = [1, 1]} : vector<64x256xbf16> to vector<64x32xbf16>
    %133 = vector.extract_strided_slice %110 {offsets = [0, 224], sizes = [64, 32], strides = [1, 1]} : vector<64x256xbf16> to vector<64x32xbf16>
    %134 = vector.shape_cast %130 : vector<64x32xbf16> to vector<1x64x32xbf16>
    %135 = vector.shape_cast %131 : vector<64x32xbf16> to vector<1x64x32xbf16>
    %136 = vector.shape_cast %132 : vector<64x32xbf16> to vector<1x64x32xbf16>
    %137 = vector.shape_cast %133 : vector<64x32xbf16> to vector<1x64x32xbf16>
    %138 = tpu.concatenate %134, %135, %136, %137 in 0 : vector<1x64x32xbf16>, vector<1x64x32xbf16>, vector<1x64x32xbf16>, vector<1x64x32xbf16> -> vector<4x64x32xbf16>
    "tpu.trace_start"() <{level = 10 : i32, message = "hmd,hnd->hmn"}> : () -> ()
    %cst_43 = arith.constant dense<0.000000e+00> : vector<4x64x64xf32>
    %139 = tpu.matmul %120, %129, %cst_43 {dimension_numbers = #tpu.dot_dimension_numbers<[2], [2], [1], [1], [0, 0, 0, 1, 1, 1], [0], [0]>} : vector<4x64x32xbf16>, vector<4x64x32xbf16>, vector<4x64x64xf32> -> vector<4x64x64xf32>
    "tpu.trace_stop"() : () -> ()
    %140 = vector.shape_cast %111 : vector<64x64xf32> to vector<1x64x64xf32>
    %141 = vector.broadcast %140 : vector<1x64x64xf32> to vector<4x64x64xf32>
    %142 = arith.addf %139, %141 : vector<4x64x64xf32>
    %cst_44 = arith.constant dense<0xFF800000> : vector<4x64xf32>
    %143 = vector.multi_reduction <maximumf>, %142, %cst_44 [2] : vector<4x64x64xf32> to vector<4x64xf32>
    %144 = vector.shape_cast %143 : vector<4x64xf32> to vector<4x64x1xf32>
    %145 = vector.broadcast %144 : vector<4x64x1xf32> to vector<4x64x64xf32>
    %146 = arith.subf %142, %145 : vector<4x64x64xf32>
    %147 = math.exp %146 : vector<4x64x64xf32>
    %cst_45 = arith.constant dense<0.000000e+00> : vector<4x64xf32>
    %148 = vector.multi_reduction <add>, %147, %cst_45 [2] : vector<4x64x64xf32> to vector<4x64xf32>
    %149 = vector.shape_cast %148 : vector<4x64xf32> to vector<4x64x1xf32>
    %150 = tpu.reciprocal %149 {approx = true} : vector<4x64x1xf32> -> vector<4x64x1xf32>
    %151 = vector.broadcast %150 : vector<4x64x1xf32> to vector<4x64x64xf32>
    %152 = arith.mulf %147, %151 : vector<4x64x64xf32>
    %153 = arith.truncf %152 : vector<4x64x64xf32> to vector<4x64x64xbf16>
    "tpu.trace_start"() <{level = 10 : i32, message = "hmn,hnd->hmd"}> : () -> ()
    %cst_46 = arith.constant dense<0.000000e+00> : vector<4x64x32xf32>
    %154 = tpu.matmul %153, %138, %cst_46 {dimension_numbers = #tpu.dot_dimension_numbers<[2], [1], [1], [2], [0, 0, 0, 1, 1, 2], [0], [0]>} : vector<4x64x64xbf16>, vector<4x64x32xbf16>, vector<4x64x32xf32> -> vector<4x64x32xf32>
    "tpu.trace_stop"() : () -> ()
    %155 = arith.truncf %154 : vector<4x64x32xf32> to vector<4x64x32xbf16>
    %156 = vector.extract_strided_slice %155 {offsets = [0, 0, 0], sizes = [1, 64, 32], strides = [1, 1, 1]} : vector<4x64x32xbf16> to vector<1x64x32xbf16>
    %157 = vector.shape_cast %156 : vector<1x64x32xbf16> to vector<64x32xbf16>
    %158 = vector.extract_strided_slice %155 {offsets = [1, 0, 0], sizes = [1, 64, 32], strides = [1, 1, 1]} : vector<4x64x32xbf16> to vector<1x64x32xbf16>
    %159 = vector.shape_cast %158 : vector<1x64x32xbf16> to vector<64x32xbf16>
    %160 = vector.extract_strided_slice %155 {offsets = [2, 0, 0], sizes = [1, 64, 32], strides = [1, 1, 1]} : vector<4x64x32xbf16> to vector<1x64x32xbf16>
    %161 = vector.shape_cast %160 : vector<1x64x32xbf16> to vector<64x32xbf16>
    %162 = vector.extract_strided_slice %155 {offsets = [3, 0, 0], sizes = [1, 64, 32], strides = [1, 1, 1]} : vector<4x64x32xbf16> to vector<1x64x32xbf16>
    %163 = vector.shape_cast %162 : vector<1x64x32xbf16> to vector<64x32xbf16>
    %164 = tpu.concatenate %157, %159, %161, %163 in 1 : vector<64x32xbf16>, vector<64x32xbf16>, vector<64x32xbf16>, vector<64x32xbf16> -> vector<64x128xbf16>
    %c1 = arith.constant 1 : index
    %c0_47 = arith.constant 0 : index
    %c0_48 = arith.constant 0 : index
    %165 = vector.load %arg11[%c1, %c0_47, %c0_48] : memref<2x128x128xbf16, #tpu.memory_space<vmem>>, vector<1x128x128xbf16>
    %166 = vector.shape_cast %165 : vector<1x128x128xbf16> to vector<128x128xbf16>
    %cst_49 = arith.constant dense<0.000000e+00> : vector<64x128xf32>
    %167 = tpu.matmul %164, %166, %cst_49 {dimension_numbers = #tpu.dot_dimension_numbers<[1], [0], [0], [1], [0, 0, 1, 1], [], []>} : vector<64x128xbf16>, vector<128x128xbf16>, vector<64x128xf32> -> vector<64x128xf32>
    %c1_50 = arith.constant 1 : index
    %c0_51 = arith.constant 0 : index
    %c0_52 = arith.constant 0 : index
    %168 = vector.load %arg12[%c1_50, %c0_51, %c0_52] : memref<2x1x128xf32, #tpu.memory_space<vmem>>, vector<1x1x128xf32>
    %169 = vector.shape_cast %168 : vector<1x1x128xf32> to vector<1x128xf32>
    %170 = vector.broadcast %169 : vector<1x128xf32> to vector<64x128xf32>
    %171 = arith.addf %167, %170 : vector<64x128xf32>
    %172 = arith.addf %96, %171 : vector<64x128xf32>
    %c1_53 = arith.constant 1 : index
    %c0_54 = arith.constant 0 : index
    %c0_55 = arith.constant 0 : index
    %173 = vector.load %arg17[%c1_53, %c0_54, %c0_55] : memref<3x1x128xf32, #tpu.memory_space<vmem>>, vector<1x1x128xf32>
    %174 = vector.shape_cast %173 : vector<1x1x128xf32> to vector<1x128xf32>
    %c1_56 = arith.constant 1 : index
    %c0_57 = arith.constant 0 : index
    %c0_58 = arith.constant 0 : index
    %175 = vector.load %arg18[%c1_56, %c0_57, %c0_58] : memref<3x1x128xf32, #tpu.memory_space<vmem>>, vector<1x1x128xf32>
    %176 = vector.shape_cast %175 : vector<1x1x128xf32> to vector<1x128xf32>
    %cst_59 = arith.constant dense<0.000000e+00> : vector<64xf32>
    %177 = vector.multi_reduction <add>, %172, %cst_59 [1] : vector<64x128xf32> to vector<64xf32>
    %178 = vector.shape_cast %177 : vector<64xf32> to vector<64x1xf32>
    %cst_60 = arith.constant 1.280000e+02 : f32
    %179 = vector.broadcast %cst_60 : f32 to vector<64x1xf32>
    %180 = arith.divf %178, %179 : vector<64x1xf32>
    %181 = vector.broadcast %180 : vector<64x1xf32> to vector<64x128xf32>
    %182 = arith.subf %172, %181 : vector<64x128xf32>
    %183 = arith.mulf %182, %182 : vector<64x128xf32>
    %cst_61 = arith.constant dense<0.000000e+00> : vector<64xf32>
    %184 = vector.multi_reduction <add>, %183, %cst_61 [1] : vector<64x128xf32> to vector<64xf32>
    %185 = vector.shape_cast %184 : vector<64xf32> to vector<64x1xf32>
    %cst_62 = arith.constant 1.280000e+02 : f32
    %186 = vector.broadcast %cst_62 : f32 to vector<64x1xf32>
    %187 = arith.divf %185, %186 : vector<64x1xf32>
    %188 = vector.broadcast %180 : vector<64x1xf32> to vector<64x128xf32>
    %189 = arith.subf %172, %188 : vector<64x128xf32>
    %cst_63 = arith.constant 9.99999974E-6 : f32
    %190 = vector.broadcast %cst_63 : f32 to vector<64x1xf32>
    %191 = arith.addf %187, %190 : vector<64x1xf32>
    %192 = math.rsqrt %191 : vector<64x1xf32>
    %193 = vector.broadcast %192 : vector<64x1xf32> to vector<64x128xf32>
    %194 = arith.mulf %189, %193 : vector<64x128xf32>
    %195 = vector.broadcast %174 : vector<1x128xf32> to vector<64x128xf32>
    %196 = arith.mulf %194, %195 : vector<64x128xf32>
    %197 = vector.broadcast %176 : vector<1x128xf32> to vector<64x128xf32>
    %198 = arith.addf %196, %197 : vector<64x128xf32>
    %199 = arith.truncf %198 : vector<64x128xf32> to vector<64x128xbf16>
    %c0_64 = arith.constant 0 : index
    %c0_65 = arith.constant 0 : index
    %200 = vector.load %arg13[%c0_64, %c0_65] : memref<128x256xbf16, #tpu.memory_space<vmem>>, vector<128x256xbf16>
    %cst_66 = arith.constant dense<0.000000e+00> : vector<64x256xf32>
    %201 = tpu.matmul %199, %200, %cst_66 {dimension_numbers = #tpu.dot_dimension_numbers<[1], [0], [0], [1], [0, 0, 1, 1], [], []>} : vector<64x128xbf16>, vector<128x256xbf16>, vector<64x256xf32> -> vector<64x256xf32>
    %c0_67 = arith.constant 0 : index
    %c0_68 = arith.constant 0 : index
    %202 = vector.load %arg14[%c0_67, %c0_68] : memref<1x256xf32, #tpu.memory_space<vmem>>, vector<1x256xf32>
    %203 = vector.broadcast %202 : vector<1x256xf32> to vector<64x256xf32>
    %204 = arith.addf %201, %203 : vector<64x256xf32>
    %cst_69 = arith.constant 0.000000e+00 : f32
    %205 = vector.broadcast %cst_69 : f32 to vector<64x256xf32>
    %206 = arith.maximumf %204, %205 : vector<64x256xf32>
    %207 = arith.truncf %206 : vector<64x256xf32> to vector<64x256xbf16>
    %c0_70 = arith.constant 0 : index
    %c0_71 = arith.constant 0 : index
    %208 = vector.load %arg15[%c0_70, %c0_71] : memref<256x128xbf16, #tpu.memory_space<vmem>>, vector<256x128xbf16>
    %cst_72 = arith.constant dense<0.000000e+00> : vector<64x128xf32>
    %209 = tpu.matmul %207, %208, %cst_72 {dimension_numbers = #tpu.dot_dimension_numbers<[1], [0], [0], [1], [0, 0, 1, 1], [], []>} : vector<64x256xbf16>, vector<256x128xbf16>, vector<64x128xf32> -> vector<64x128xf32>
    %c0_73 = arith.constant 0 : index
    %c0_74 = arith.constant 0 : index
    %210 = vector.load %arg16[%c0_73, %c0_74] : memref<1x128xf32, #tpu.memory_space<vmem>>, vector<1x128xf32>
    %211 = vector.broadcast %210 : vector<1x128xf32> to vector<64x128xf32>
    %212 = arith.addf %209, %211 : vector<64x128xf32>
    %213 = arith.addf %198, %212 : vector<64x128xf32>
    %c2 = arith.constant 2 : index
    %c0_75 = arith.constant 0 : index
    %c0_76 = arith.constant 0 : index
    %214 = vector.load %arg17[%c2, %c0_75, %c0_76] : memref<3x1x128xf32, #tpu.memory_space<vmem>>, vector<1x1x128xf32>
    %215 = vector.shape_cast %214 : vector<1x1x128xf32> to vector<1x128xf32>
    %c2_77 = arith.constant 2 : index
    %c0_78 = arith.constant 0 : index
    %c0_79 = arith.constant 0 : index
    %216 = vector.load %arg18[%c2_77, %c0_78, %c0_79] : memref<3x1x128xf32, #tpu.memory_space<vmem>>, vector<1x1x128xf32>
    %217 = vector.shape_cast %216 : vector<1x1x128xf32> to vector<1x128xf32>
    %cst_80 = arith.constant dense<0.000000e+00> : vector<64xf32>
    %218 = vector.multi_reduction <add>, %213, %cst_80 [1] : vector<64x128xf32> to vector<64xf32>
    %219 = vector.shape_cast %218 : vector<64xf32> to vector<64x1xf32>
    %cst_81 = arith.constant 1.280000e+02 : f32
    %220 = vector.broadcast %cst_81 : f32 to vector<64x1xf32>
    %221 = arith.divf %219, %220 : vector<64x1xf32>
    %222 = vector.broadcast %221 : vector<64x1xf32> to vector<64x128xf32>
    %223 = arith.subf %213, %222 : vector<64x128xf32>
    %224 = arith.mulf %223, %223 : vector<64x128xf32>
    %cst_82 = arith.constant dense<0.000000e+00> : vector<64xf32>
    %225 = vector.multi_reduction <add>, %224, %cst_82 [1] : vector<64x128xf32> to vector<64xf32>
    %226 = vector.shape_cast %225 : vector<64xf32> to vector<64x1xf32>
    %cst_83 = arith.constant 1.280000e+02 : f32
    %227 = vector.broadcast %cst_83 : f32 to vector<64x1xf32>
    %228 = arith.divf %226, %227 : vector<64x1xf32>
    %229 = vector.broadcast %221 : vector<64x1xf32> to vector<64x128xf32>
    %230 = arith.subf %213, %229 : vector<64x128xf32>
    %cst_84 = arith.constant 9.99999974E-6 : f32
    %231 = vector.broadcast %cst_84 : f32 to vector<64x1xf32>
    %232 = arith.addf %228, %231 : vector<64x1xf32>
    %233 = math.rsqrt %232 : vector<64x1xf32>
    %234 = vector.broadcast %233 : vector<64x1xf32> to vector<64x128xf32>
    %235 = arith.mulf %230, %234 : vector<64x128xf32>
    %236 = vector.broadcast %215 : vector<1x128xf32> to vector<64x128xf32>
    %237 = arith.mulf %235, %236 : vector<64x128xf32>
    %238 = vector.broadcast %217 : vector<1x128xf32> to vector<64x128xf32>
    %239 = arith.addf %237, %238 : vector<64x128xf32>
    %c0_85 = arith.constant 0 : index
    %c0_86 = arith.constant 0 : index
    %240 = vector.load %arg19[%c0_85, %c0_86] : memref<64x128xf32, #tpu.memory_space<vmem>>, vector<64x128xf32>
    tpu.vector_store %arg19[%c0_85, %c0_86], %239 {strides = array<i32>} : memref<64x128xf32, #tpu.memory_space<vmem>>, vector<64x128xf32>,
    return
  }
  func.func @transform_0(%arg0: i32) -> (i32, i32) {
    %c0_i32 = arith.constant 0 : i32
    %c0_i32_0 = arith.constant 0 : i32
    return %arg0, %c0_i32 : i32, i32
  }
  func.func @transform_1(%arg0: i32) -> (i32, i32) {
    %c0_i32 = arith.constant 0 : i32
    %c0_i32_0 = arith.constant 0 : i32
    return %arg0, %c0_i32 : i32, i32
  }
  func.func @transform_2(%arg0: i32) -> (i32, i32) {
    %c0_i32 = arith.constant 0 : i32
    %c0_i32_0 = arith.constant 0 : i32
    %c0_i32_1 = arith.constant 0 : i32
    return %c0_i32, %c0_i32_0 : i32, i32
  }
  func.func @transform_3(%arg0: i32) -> (i32, i32) {
    %c0_i32 = arith.constant 0 : i32
    %c0_i32_0 = arith.constant 0 : i32
    %c0_i32_1 = arith.constant 0 : i32
    return %c0_i32, %c0_i32_0 : i32, i32
  }
  func.func @transform_4(%arg0: i32) -> (i32, i32) {
    %c0_i32 = arith.constant 0 : i32
    %c0_i32_0 = arith.constant 0 : i32
    %c0_i32_1 = arith.constant 0 : i32
    return %c0_i32, %c0_i32_0 : i32, i32
  }
  func.func @transform_5(%arg0: i32) -> (i32, i32) {
    %c0_i32 = arith.constant 0 : i32
    %c0_i32_0 = arith.constant 0 : i32
    %c0_i32_1 = arith.constant 0 : i32
    return %c0_i32, %c0_i32_0 : i32, i32
  }
  func.func @transform_6(%arg0: i32) -> (i32, i32) {
    %c0_i32 = arith.constant 0 : i32
    %c0_i32_0 = arith.constant 0 : i32
    %c0_i32_1 = arith.constant 0 : i32
    return %c0_i32, %c0_i32_0 : i32, i32
  }
  func.func @transform_7(%arg0: i32) -> (i32, i32) {
    %c0_i32 = arith.constant 0 : i32
    %c0_i32_0 = arith.constant 0 : i32
    %c0_i32_1 = arith.constant 0 : i32
    return %c0_i32, %c0_i32_0 : i32, i32
  }
  func.func @transform_8(%arg0: i32) -> (i32, i32) {
    %c0_i32 = arith.constant 0 : i32
    %c0_i32_0 = arith.constant 0 : i32
    %c0_i32_1 = arith.constant 0 : i32
    return %c0_i32, %c0_i32_0 : i32, i32
  }
  func.func @transform_9(%arg0: i32) -> (i32, i32) {
    %c0_i32 = arith.constant 0 : i32
    %c0_i32_0 = arith.constant 0 : i32
    %c0_i32_1 = arith.constant 0 : i32
    return %c0_i32, %c0_i32_0 : i32, i32
  }
  func.func @transform_10(%arg0: i32) -> (i32, i32, i32) {
    %c0_i32 = arith.constant 0 : i32
    %c0_i32_0 = arith.constant 0 : i32
    %c0_i32_1 = arith.constant 0 : i32
    %c0_i32_2 = arith.constant 0 : i32
    return %c0_i32, %c0_i32_0, %c0_i32_1 : i32, i32, i32
  }
  func.func @transform_11(%arg0: i32) -> (i32, i32, i32) {
    %c0_i32 = arith.constant 0 : i32
    %c0_i32_0 = arith.constant 0 : i32
    %c0_i32_1 = arith.constant 0 : i32
    %c0_i32_2 = arith.constant 0 : i32
    return %c0_i32, %c0_i32_0, %c0_i32_1 : i32, i32, i32
  }
  func.func @transform_12(%arg0: i32) -> (i32, i32) {
    %c0_i32 = arith.constant 0 : i32
    %c0_i32_0 = arith.constant 0 : i32
    %c0_i32_1 = arith.constant 0 : i32
    return %c0_i32, %c0_i32_0 : i32, i32
  }
  func.func @transform_13(%arg0: i32) -> (i32, i32) {
    %c0_i32 = arith.constant 0 : i32
    %c0_i32_0 = arith.constant 0 : i32
    %c0_i32_1 = arith.constant 0 : i32
    return %c0_i32, %c0_i32_0 : i32, i32
  }
  func.func @transform_14(%arg0: i32) -> (i32, i32) {
    %c0_i32 = arith.constant 0 : i32
    %c0_i32_0 = arith.constant 0 : i32
    %c0_i32_1 = arith.constant 0 : i32
    return %c0_i32, %c0_i32_0 : i32, i32
  }
  func.func @transform_15(%arg0: i32) -> (i32, i32) {
    %c0_i32 = arith.constant 0 : i32
    %c0_i32_0 = arith.constant 0 : i32
    %c0_i32_1 = arith.constant 0 : i32
    return %c0_i32, %c0_i32_0 : i32, i32
  }
  func.func @transform_16(%arg0: i32) -> (i32, i32, i32) {
    %c0_i32 = arith.constant 0 : i32
    %c0_i32_0 = arith.constant 0 : i32
    %c0_i32_1 = arith.constant 0 : i32
    %c0_i32_2 = arith.constant 0 : i32
    return %c0_i32, %c0_i32_0, %c0_i32_1 : i32, i32, i32
  }
  func.func @transform_17(%arg0: i32) -> (i32, i32, i32) {
    %c0_i32 = arith.constant 0 : i32
    %c0_i32_0 = arith.constant 0 : i32
    %c0_i32_1 = arith.constant 0 : i32
    %c0_i32_2 = arith.constant 0 : i32
    return %c0_i32, %c0_i32_0, %c0_i32_1 : i32, i32, i32
  }
  func.func @transform_18(%arg0: i32) -> (i32, i32) {
    %c0_i32 = arith.constant 0 : i32
    %c0_i32_0 = arith.constant 0 : i32
    return %arg0, %c0_i32 : i32, i32
  }
}

</mosaic_0001>

<bundles_post_ra>
// kernel: tpu_custom_call.1
= control target key start
LH: loop header
LB: loop body
LE: loop exit
PB: predicated region body
PF: predicated region fallthrough
CT: control target
= control target key end

     0   :  { %s7570_s0 = inlined_call_operand.hbm [shape: f32[64,128], index: 0, kind: input, shape index: {}]   ;;  %s7571_s1 = inlined_call_operand.hbm [shape: f32[64,128], index: 1, kind: input, shape index: {}]   ;;  %s7572_s2 = inlined_call_operand.hbm [shape: f32[64,64], index: 2, kind: input, shape index: {}]   ;;  %s7573_s3 = inlined_call_operand.hbm [shape: f32[64,64], index: 3, kind: input, shape index: {}]   ;;  %s7574_s4 = inlined_call_operand.hbm [shape: bf16[128,384], index: 4, kind: input, shape index: {}]   ;;  %s7575_s5 = inlined_call_operand.vmem [shape: f32[1,384], index: 5, kind: input, shape index: {}]   ;;  %s7576_s6 = inlined_call_operand.hbm [shape: bf16[128,128], index: 6, kind: input, shape index: {}]   ;;  %s7577_s7 = inlined_call_operand.vmem [shape: f32[1,128], index: 7, kind: input, shape index: {}]   ;;  %s7578_s8 = inlined_call_operand.hbm [shape: bf16[128,256], index: 8, kind: input, shape index: {}]   ;;  %s7579_s9 = inlined_call_operand.vmem [shape: f32[1,256], index: 9, kind: input, shape index: {}]   ;;  %s7580_s10 = inlined_call_operand.hbm [shape: bf16[2,128,128], index: 10, kind: input, shape index: {}]   ;;  %s7581_s11 = inlined_call_operand.vmem [shape: f32[2,1,128], index: 11, kind: input, shape index: {}]   ;;  %s7582_s12 = inlined_call_operand.hbm [shape: bf16[128,256], index: 12, kind: input, shape index: {}]   ;;  %s7583_s13 = inlined_call_operand.vmem [shape: f32[1,256], index: 13, kind: input, shape index: {}]   ;;  %s7584_s14 = inlined_call_operand.hbm [shape: bf16[256,128], index: 14, kind: input, shape index: {}]   ;;  %s7585_s15 = inlined_call_operand.vmem [shape: f32[1,128], index: 15, kind: input, shape index: {}]   ;;  %s7586_s16 = inlined_call_operand.vmem [shape: f32[3,1,128], index: 16, kind: input, shape index: {}]   ;;  %s7587_s17 = inlined_call_operand.vmem [shape: f32[3,1,128], index: 17, kind: input, shape index: {}]   ;;  %s7588_s18 = inlined_call_operand.hbm [shape: f32[64,128], index: 18, kind: output, shape index: {}]  }
   0x1   :  { %7592 = sst [smem:[#allocation28_spill]] %s7570_s0 }
   0x2   :  { %7593 = sst [smem:[#allocation29_spill]] %s7571_s1 }
   0x3   :  { %7594 = sst [smem:[#allocation30_spill]] %s7572_s2 }
   0x4   :  { %23 = vsyncpa [#allocation3], 0 }
   0x5   :  { %24 = vsyncpa [#allocation6], 0 }
   0x6   :  { %25 = vsyncpa [#allocation9], 0 }
   0x7   :  { %26 = vsyncpa [#allocation12], 0 }
   0x8   :  { %27 = vsyncpa [#allocation15], 0 }
   0x9   :  { %28 = vsyncpa [#allocation18], 0 }
   0xa   :  { %29 = vsyncpa [#allocation4], 0  ;;  %s5881_s27 = smov [#allocation5]   ;;  %s5882_s29 = smov [#allocation8]  }
   0xb   :  { %s47_s28 = sshll.u32 %s5881_s27, 4  ;;  %s71_s30 = sshll.u32 %s5882_s29, 4  ;;  %s48_s28 = int_to_ptr.vmem [resolvable:$true] %s47_s28  ;;  %s72_s30 = int_to_ptr.vmem [resolvable:$true] %s71_s30 }
   0xc   :  { %s5655_s0 = scalar_lea.vmem %s48_s28, 1024  ;;  %p5660_p1 = scmp.lt.s32.totalorder %s48_s28, %s48_s28 }
   0xd   :  { %p5656_p0 = scmp.ne.s32.totalorder %s48_s28, %s5655_s0  ;;  %p5661_p2 = scmp.lt.s32.totalorder %s5655_s0, %s5655_s0 }
   0xf   :  { %p5662_p3 = por %p5661_p2, %p5660_p1 }
  0x11   :  { %p5663_p4 = pnand %p5662_p3, %p5656_p0 }
  0x13   :  { %5666 = shalt.err (!%p5663_p4)
}
  0x14   :  { %s5883_s19 = smov 128   ;;  %s5884_s1 = smov 8  }
  0x15   :  { %s7595_s22 = sld [smem:[#allocation29_spill]]  ;;  %s5675_s2 = scalar_lea.vmem %s72_s30, 1024 }
  0x16   :  { %p5676_p5 = scmp.ne.s32.totalorder %s72_s30, %s5675_s2  ;;  %p5680_p6 = scmp.lt.s32.totalorder %s72_s30, %s72_s30 }
  0x17   :  { %p5681_p7 = scmp.lt.s32.totalorder %s5675_s2, %s5675_s2 }
  0x19   :  { %p5682_p8 = por %p5681_p7, %p5680_p6 }
  0x1b   :  { %53 = dma.hbm_to_vmem [thread:$0]  %s7595_s22, 1024, %s48_s28, [#allocation6], %s5883_s19, %s5883_s19, %s5884_s1  }
  0x1c   :  { %p5683_p9 = pnand %p5682_p8, %p5676_p5 }
  0x1e   :  { %5686 = shalt.err (!%p5683_p9)
}
  0x1f   :  { %77 = dma.hbm_to_vmem [thread:$0]  %s7573_s3, 1024, %s72_s30, [#allocation9], %s5883_s19, %s5883_s19, %s5884_s1  }
  0x20   :  { %s5885_s25 = smov [#allocation11]  }
  0x21   :  { %s97_s26 = sshll.u32 %s5885_s25, 4  ;;  %s98_s26 = int_to_ptr.vmem [resolvable:$true] %s97_s26 }
  0x22   :  { %s5695_s27 = scalar_lea.vmem %s98_s26, 1024  ;;  %p5700_p11 = scmp.lt.s32.totalorder %s98_s26, %s98_s26 }
  0x23   :  { %p5696_p10 = scmp.ne.s32.totalorder %s98_s26, %s5695_s27  ;;  %p5701_p12 = scmp.lt.s32.totalorder %s5695_s27, %s5695_s27 }
  0x25   :  { %p5702_p13 = por %p5701_p12, %p5700_p11 }
  0x27   :  { %p5703_p0 = pnand %p5702_p13, %p5696_p10 }
  0x29   :  { %5706 = shalt.err (!%p5703_p0)
}
  0x2a   :  { %s5886_s28 = smov 64   ;;  %s5887_s29 = smov 4  }
  0x2b   :  { %103 = dma.hbm_to_vmem [thread:$0]  %s7576_s6, 1024, %s98_s26, [#allocation12], %s5886_s28, %s5886_s28, %s5887_s29  }
  0x2c   :  { %s5888_s3 = smov [#allocation14]   ;;  %s5889_s21 = smov [#allocation2]  }
  0x2d   :  { %s125_s30 = sshll.u32 %s5888_s3, 4  ;;  %s35_s22 = sshll.u32 %s5889_s21, 4  ;;  %s126_s30 = int_to_ptr.vmem [resolvable:$true] %s125_s30  ;;  %s36_s22 = int_to_ptr.vmem [resolvable:$true] %s35_s22 }
  0x2e   :  { %s5715_s2 = scalar_lea.vmem %s126_s30, 2048  ;;  %p5720_p2 = scmp.lt.s32.totalorder %s126_s30, %s126_s30 }
  0x2f   :  { %p5716_p1 = scmp.ne.s32.totalorder %s126_s30, %s5715_s2  ;;  %p5721_p3 = scmp.lt.s32.totalorder %s5715_s2, %s5715_s2 }
  0x31   :  { %p5722_p4 = por %p5721_p3, %p5720_p2 }
  0x33   :  { %p5723_p5 = pnand %p5722_p4, %p5716_p1 }
  0x35   :  { %5726 = shalt.err (!%p5723_p5)
}
  0x36   :  { %131 = dma.hbm_to_vmem [thread:$0]  %s7580_s10, 2048, %s126_s30, [#allocation15], %s5886_s28, %s5886_s28, %s5887_s29  }
  0x37   :  { %s5735_s6 = scalar_lea.vmem %s36_s22, 1024  ;;  %p5740_p7 = scmp.lt.s32.totalorder %s36_s22, %s36_s22 }
  0x38   :  { %p5736_p6 = scmp.ne.s32.totalorder %s36_s22, %s5735_s6  ;;  %p5741_p8 = scmp.lt.s32.totalorder %s5735_s6, %s5735_s6 }
  0x3a   :  { %p5742_p9 = por %p5741_p8, %p5740_p7 }
  0x3c   :  { %p5743_p10 = pnand %p5742_p9, %p5736_p6 }
  0x3e   :  { %5746 = shalt.err (!%p5743_p10)
}
  0x3f   :  { %s7596_s27 = sld [smem:[#allocation28_spill]]  ;;  %s5890_s0 = smov [#allocation7]  }
  0x40   :  { %s59_s20 = sshll.u32 %s5890_s0, 4  ;;  %s5891_s3 = smov [#allocation10]   ;;  %s60_s20 = int_to_ptr.vmem [resolvable:$true] %s59_s20 }
  0x41   :  { %s83_s10 = sshll.u32 %s5891_s3, 4  ;;  %s5755_s30 = scalar_lea.vmem %s60_s20, 1024  ;;  %s84_s10 = int_to_ptr.vmem [resolvable:$true] %s83_s10 }
  0x42   :  { %p5756_p11 = scmp.ne.s32.totalorder %s60_s20, %s5755_s30  ;;  %p5760_p12 = scmp.lt.s32.totalorder %s60_s20, %s60_s20 }
  0x43   :  { %p5761_p13 = scmp.lt.s32.totalorder %s5755_s30, %s5755_s30 }
  0x45   :  { %41 = dma.hbm_to_vmem [thread:$0]  %s7596_s27, 1024, %s36_s22, [#allocation3], %s5883_s19, %s5883_s19, %s5884_s1  }
  0x46   :  { %p5762_p0 = por %p5761_p13, %p5760_p12 }
  0x48   :  { %p5763_p1 = pnand %p5762_p0, %p5756_p11 }
  0x4a   :  { %5766 = shalt.err (!%p5763_p1)
}
  0x4b   :  { %s7597_s23 = sld [smem:[#allocation30_spill]]  ;;  %s5775_s22 = scalar_lea.vmem %s84_s10, 3072 }
  0x4c   :  { %p5776_p2 = scmp.ne.s32.totalorder %s84_s10, %s5775_s22  ;;  %p5780_p3 = scmp.lt.s32.totalorder %s84_s10, %s84_s10 }
  0x4d   :  { %p5781_p4 = scmp.lt.s32.totalorder %s5775_s22, %s5775_s22 }
  0x4f   :  { %p5782_p5 = por %p5781_p4, %p5780_p3 }
  0x51   :  { %65 = dma.hbm_to_vmem [thread:$0]  %s7597_s23, 1024, %s60_s20, [#allocation6], %s5883_s19, %s5883_s19, %s5884_s1  }
  0x52   :  { %p5783_p6 = pnand %p5782_p5, %p5776_p2 }
  0x54   :  { %5786 = shalt.err (!%p5783_p6)
}
  0x55   :  { %s5892_s24 = smov 192   ;;  %s5893_s6 = smov 12  }
  0x56   :  { %89 = dma.hbm_to_vmem [thread:$0]  %s7574_s4, 3072, %s84_s10, [#allocation9], %s5892_s24, %s5892_s24, %s5893_s6  }
  0x57   :  { %s5894_s27 = smov [#allocation13]   ;;  %s5895_s3 = smov [#allocation16]  }
  0x58   :  { %s111_s0 = sshll.u32 %s5894_s27, 4  ;;  %s139_s30 = sshll.u32 %s5895_s3, 4  ;;  %s112_s0 = int_to_ptr.vmem [resolvable:$true] %s111_s0  ;;  %s140_s30 = int_to_ptr.vmem [resolvable:$true] %s139_s30 }
  0x59   :  { %s5795_s20 = scalar_lea.vmem %s112_s0, 2048  ;;  %p5800_p8 = scmp.lt.s32.totalorder %s112_s0, %s112_s0 }
  0x5a   :  { %p5796_p7 = scmp.ne.s32.totalorder %s112_s0, %s5795_s20  ;;  %p5801_p9 = scmp.lt.s32.totalorder %s5795_s20, %s5795_s20 }
  0x5c   :  { %p5802_p10 = por %p5801_p9, %p5800_p8 }
  0x5e   :  { %p5803_p11 = pnand %p5802_p10, %p5796_p7 }
  0x60   :  { %5806 = shalt.err (!%p5803_p11)
}
  0x61   :  { %117 = dma.hbm_to_vmem [thread:$0]  %s7578_s8, 2048, %s112_s0, [#allocation12], %s5883_s19, %s5883_s19, %s5884_s1  }
  0x62   :  { %s5815_s4 = scalar_lea.vmem %s140_s30, 2048  ;;  %p5820_p13 = scmp.lt.s32.totalorder %s140_s30, %s140_s30 }
  0x63   :  { %p5816_p12 = scmp.ne.s32.totalorder %s140_s30, %s5815_s4  ;;  %p5821_p0 = scmp.lt.s32.totalorder %s5815_s4, %s5815_s4 }
  0x65   :  { %p5822_p1 = por %p5821_p0, %p5820_p13 }
  0x67   :  { %p5823_p2 = pnand %p5822_p1, %p5816_p12 }
  0x69   :  { %5826 = shalt.err (!%p5823_p2)
}
  0x6a   :  { %145 = dma.hbm_to_vmem [thread:$0]  %s7582_s12, 2048, %s140_s30, [#allocation15], %s5883_s19, %s5883_s19, %s5884_s1  }
  0x6b   :  { %s5896_s22 = smov [#allocation17]  }
  0x6c   :  { %s153_s24 = sshll.u32 %s5896_s22, 4  ;;  %s154_s24 = int_to_ptr.vmem [resolvable:$true] %s153_s24 }
  0x6d   :  { %s5835_s6 = scalar_lea.vmem %s154_s24, 2048  ;;  %p5840_p4 = scmp.lt.s32.totalorder %s154_s24, %s154_s24 }
  0x6e   :  { %p5836_p3 = scmp.ne.s32.totalorder %s154_s24, %s5835_s6  ;;  %p5841_p5 = scmp.lt.s32.totalorder %s5835_s6, %s5835_s6 }
  0x70   :  { %p5842_p6 = por %p5841_p5, %p5840_p4 }
  0x72   :  { %p5843_p7 = pnand %p5842_p6, %p5836_p3 }
  0x74   :  { %5846 = shalt.err (!%p5843_p7)
}
  0x75   :  { %159 = dma.hbm_to_vmem [thread:$0]  %s7584_s14, 2048, %s154_s24, [#allocation18], %s5886_s28, %s5886_s28, %s5887_s29  }
  0x76   :  { %5867 = dma.done.wait [#allocation3], 1024  }
  0x77   :  { %5868 = vsyncadd [#allocation3], 4294966272 }
  0x78   :  { %5869 = dma.done.wait [#allocation6], 2048  }
  0x79   :  { %5870 = vsyncadd [#allocation6], 4294965248 }
  0x7a   :  { %5871 = dma.done.wait [#allocation9], 4096  }
  0x7b   :  { %5872 = vsyncadd [#allocation9], 4294963200 }
  0x7c   :  { %5873 = dma.done.wait [#allocation12], 3072  }
  0x7d   :  { %5874 = vsyncadd [#allocation12], 4294964224 }
  0x7e   :  { %5875 = dma.done.wait [#allocation15], 4096  }
  0x7f   :  { %5876 = vsyncadd [#allocation15], 4294963200 }
  0x80   :  { %5877 = dma.done.wait [#allocation18], 2048  }
  0x81   :  { %5878 = vsyncadd [#allocation18], 4294965248  ;;  %v7589_v0 = vmov 0   ;;  %v5215_v1 = vld [vmem:[#allocation10 + $0xac] ss:$12 sps:$4 sm:$0xff]   ;;  %v197_v8 = vld [vmem:[#allocation2] sm:$0xff]  ;;  %v251_v37 = vlaneseq }
  0x82   :  { %426 = vmatprep.mubr.bf16.mxu0 %v7589_v0  ;;  %v5217_v2 = vld [vmem:[#allocation10 + $0xa8] ss:$12 sps:$4 sm:$0xff]   ;;  %394 = vmatprep.subr.bf16.mxu0 %v5215_v1  ;;  %v5220_v4 = vld [vmem:[#allocation10 + $0x90] ss:$12 sps:$4 sm:$0xff]   ;;  %v5223_v6 = vld [vmem:[#allocation10 + $0x78] ss:$12 sps:$4 sm:$0xff]  }
  0x83   :  { %v5218_v3 = vld [vmem:[#allocation10 + $0x94] ss:$12 sps:$4 sm:$0xff]   ;;  %395 = vmatpush1.bf16.msra.mxu0 %v5217_v2  ;;  %v5221_v5 = vld [vmem:[#allocation10 + $0x7c] ss:$12 sps:$4 sm:$0xff]   ;;  %v5224_v7 = vld [vmem:[#allocation10 + $0x64] ss:$12 sps:$4 sm:$0xff]  }
  0x84   :  { %396 = vmatprep.subr.bf16.mxu0 %v5218_v3  ;;  %v5226_v9 = vld [vmem:[#allocation10 + $0x60] ss:$12 sps:$4 sm:$0xff]   ;;  %v5229_v13 = vld [vmem:[#allocation10 + $0x48] ss:$12 sps:$4 sm:$0xff]   ;;  %v5239_v14 = vld [vmem:[#allocation10 + $0xb0] ss:$12 sps:$4 sm:$0xff]  }
  0x85   :  { %v198_v10 = vld [vmem:[#allocation2 + $0x8] sm:$0xff]  ;;  %v5240_v15 = vld [vmem:[#allocation10 + $0x98] ss:$12 sps:$4 sm:$0xff]   ;;  %v5230_v16 = vld [vmem:[#allocation10 + $0x34] ss:$12 sps:$4 sm:$0xff]   ;;  %4811 = vmatprep.subr.bf16.mxu1 %v5239_v14  ;;  %v6057_v38 = vshrl.u32 %v251_v37, 7 }
  0x86   :  { %v5227_v11 = vld [vmem:[#allocation10 + $0x4c] ss:$12 sps:$4 sm:$0xff]   ;;  %v213_v12 = vpack.c.bf16 %v198_v10, %v197_v8  ;;  %4812 = vmatpush3.bf16.msra.mxu1 %v5239_v14  ;;  %v5232_v18 = vld [vmem:[#allocation10 + $0x30] ss:$12 sps:$4 sm:$0xff]   ;;  %v5242_v21 = vld [vmem:[#allocation10 + $0x68] ss:$12 sps:$4 sm:$0xff]  }
  0x87   :  { %397 = vmatpush1.bf16.msra.mxu0 %v5220_v4  ;;  %4813 = vmatprep.subr.bf16.mxu1 %v5240_v15  ;;  %v5241_v17 = vld [vmem:[#allocation10 + $0x80] ss:$12 sps:$4 sm:$0xff]   ;;  %v5233_v19 = vld [vmem:[#allocation10 + $0x1c] ss:$12 sps:$4 sm:$0xff]   ;;  %v5235_v20 = vld [vmem:[#allocation10 + $0x18] ss:$12 sps:$4 sm:$0xff]  }
  0x88   :  { %398 = vmatprep.subr.bf16.mxu0 %v5221_v5  ;;  %4827 = vmatprep.mubr.bf16.mxu1 %v213_v12  ;;  %v5236_v22 = vld [vmem:[#allocation10 + $0x4] ss:$12 sps:$4 sm:$0xff]   ;;  %v5238_v24 = vld [vmem:[#allocation10] ss:$12 sps:$4 sm:$0xff]   ;;  %v200_v28 = vld [vmem:[#allocation2 + $0x18] sm:$0xff]  ;;  %v6060_v39 = vsub.s32 0, %v6057_v38 }
  0x89   :  { %v5243_v23 = vld [vmem:[#allocation10 + $0x50] ss:$12 sps:$4 sm:$0xff]   ;;  %v5244_v25 = vld [vmem:[#allocation10 + $0x38] ss:$12 sps:$4 sm:$0xff]   ;;  %v5245_v26 = vld [vmem:[#allocation10 + $0x20] ss:$12 sps:$4 sm:$0xff]  }
  0x8a   :  { %4814 = vmatpush3.bf16.msra.mxu1 %v5240_v15  ;;  %v199_v27 = vld [vmem:[#allocation2 + $0x10] sm:$0xff]  ;;  %v201_v31 = vld [vmem:[#allocation2 + $0x20] sm:$0xff]  ;;  %v202_v32 = vld [vmem:[#allocation2 + $0x28] sm:$0xff]  ;;  %7598 = vst [vmem:[#allocation27_spill] sm:$0xff] %v6060_v39  ;;  %vm648_vm0 = vcmask 261120   ;;  %v6076_v50 = vsub.s32 1, %v6057_v38 }
  0x8b   :  { %399 = vmatpush1.bf16.msra.mxu0 %v5223_v6  ;;  %4815 = vmatprep.subr.bf16.mxu1 %v5241_v17  ;;  %v5246_v29 = vld [vmem:[#allocation10 + $0x8] ss:$12 sps:$4 sm:$0xff]   ;;  %v214_v30 = vpack.c.bf16 %v200_v28, %v199_v27  ;;  %v215_v33 = vpack.c.bf16 %v202_v32, %v201_v31  ;;  %v204_v35 = vld [vmem:[#allocation2 + $0x38] sm:$0xff]  ;;  %v6065_v40 = vld [vmem:[%s7575_s5] sm:$0x7]  ;;  %s5898_s5 = smov 96  }
  0x8c   :  { %400 = vmatprep.subr.bf16.mxu0 %v5224_v7  ;;  %v203_v34 = vld [vmem:[#allocation2 + $0x30] sm:$0xff]  ;;  %v6069_v42 = vrot.slane %v6065_v40, %v6060_v39  ;;  %v258_v53 = vrot.slane %v6065_v40, %v6076_v50  ;;  %s5899_s29 = smov 32   ;;  %v261_v28 = vsub.s32 2, %v6057_v38  ;;  %vm1005_vm1 = vcmask 523264  }
  0x8d   :  { %v216_v36 = vpack.c.bf16 %v204_v35, %v203_v34  ;;  %vm1754_vm2 = vcmask 785408  }
  0x8e   :  { %4816 = vmatpush3.bf16.msra.mxu1 %v5241_v17  ;;  %v262_v31 = vrot.slane %v6065_v40, %v261_v28 }
  0x8f   :  { %401 = vmatpush1.bf16.msra.mxu0 %v5226_v9  ;;  %4817 = vmatprep.subr.bf16.mxu1 %v5242_v21 }
  0x90   :  { %402 = vmatprep.subr.bf16.mxu0 %v5227_v11 }
  0x92   :  { %4818 = vmatpush3.bf16.msra.mxu1 %v5242_v21 }
  0x93   :  { %403 = vmatpush1.bf16.msra.mxu0 %v5229_v13  ;;  %4819 = vmatprep.subr.bf16.mxu1 %v5243_v23 }
  0x94   :  { %404 = vmatprep.subr.bf16.mxu0 %v5230_v16 }
  0x96   :  { %4820 = vmatpush3.bf16.msra.mxu1 %v5243_v23 }
  0x97   :  { %405 = vmatpush1.bf16.msra.mxu0 %v5232_v18  ;;  %4821 = vmatprep.subr.bf16.mxu1 %v5244_v25 }
  0x98   :  { %406 = vmatprep.subr.bf16.mxu0 %v5233_v19 }
  0x9a   :  { %4822 = vmatpush3.bf16.msra.mxu1 %v5244_v25 }
  0x9b   :  { %407 = vmatpush1.bf16.msra.mxu0 %v5235_v20  ;;  %4823 = vmatprep.subr.bf16.mxu1 %v5245_v26 }
  0x9c   :  { %408 = vmatprep.subr.bf16.mxu0 %v5236_v22 }
  0x9e   :  { %4824 = vmatpush3.bf16.msra.mxu1 %v5245_v26 }
  0x9f   :  { %409 = vmatpush1.bf16.msra.mxu0 %v5238_v24  ;;  %4825 = vmatprep.subr.bf16.mxu1 %v5246_v29 }
  0xa2   :  { %427 = vmatmul.mubr.bf16.vlgmr.msra.gmra.mxu0 %v213_v12  ;;  %4826 = vmatpush3.bf16.msra.mxu1 %v5246_v29 }
  0xa3   :  { %436 = vmatprep.mubr.bf16.mxu0 %v7589_v0 }
  0xa5   :  { %4828 = vmatmul.mubr.bf16.vlgmr.msra.gmra.mxu1 %v214_v30 }
  0xa6   :  { %4831 = vmatprep.mubr.bf16.mxu1 %v215_v33 }
  0xaa   :  { %437 = vmatmul.mubr.bf16.gmra.mxu0 %v214_v30 }
  0xab   :  { %446 = vmatprep.mubr.bf16.mxu0 %v7589_v0 }
  0xad   :  { %4832 = vmatmul.mubr.bf16.gmra.mxu1 %v216_v36 }
  0xb2   :  { %447 = vmatmul.mubr.bf16.gmra.mxu0 %v215_v33 }
  0xb3   :  { %456 = vmatprep.mubr.bf16.mxu0 %v7589_v0 }
  0xba   :  { %457 = vmatmul.mubr.bf16.gmra.mxu0 %v216_v36 }
 0x162   :  { %v428_v41 = vpop.f32.mrf.mxu0 }
 0x163   :  { %v429_v45 = vadd.f32 %v428_v41, %v6069_v42 }
 0x164   :  { %v430_v43 = vpop.f32.mrf.mxu0 }
 0x165   :  { %v431_v61 = vadd.f32 %v430_v43, %v258_v53  ;;  %v4829_v25 = vpop.f32.mrf.mxu1 }
 0x166   :  { %v432_v44 = vpop.f32.mrf.mxu0 }
 0x167   :  { %v433_v46 = vadd.f32 %v432_v44, %v6069_v42  ;;  %v501_v26 = vpop.f32.mrf.mxu1 }
 0x168   :  { %v434_v47 = vpop.f32.mrf.mxu0  ;;  %v502_v35 = vadd.f32 %v501_v26, %v262_v31 }
 0x169   :  { %v6073_v48 = vpack.c.bf16 %v433_v46, %v429_v45  ;;  %v435_v58 = vadd.f32 %v434_v47, %v258_v53  ;;  %v4830_v27 = vpop.f32.mrf.mxu1 }
 0x16a   :  { %v438_v49 = vpop.f32.mrf.mxu0  ;;  %v513_v43 = vadd.f32 %v4830_v27, %v262_v31  ;;  %v6204_v27 = vld [vmem:[#allocation7] sm:$0xff] }
 0x16b   :  { %4843 = vmatprep.mubr.msk.bf16.mxu0 %vm648_vm0, %v6073_v48  ;;  %v533_v63 = vpack.c.bf16 %v435_v58, %v431_v61  ;;  %v439_v5 = vadd.f32 %v438_v49, %v6069_v42  ;;  %v504_v29 = vpop.f32.mrf.mxu1 }
 0x16c   :  { %v440_v51 = vpop.f32.mrf.mxu0  ;;  %v505_v36 = vadd.f32 %v504_v29, %v262_v31 }
 0x16d   :  { %v441_v55 = vadd.f32 %v440_v51, %v258_v53  ;;  %v662_v24 = vsel %vm648_vm0, %v533_v63, 0  ;;  %v4833_v30 = vpop.f32.mrf.mxu1 }
 0x16e   :  { %v442_v52 = vpop.f32.mrf.mxu0  ;;  %v526_v33 = vadd.f32 %v4833_v30, %v262_v31  ;;  %v6130_v40 = vpack.c.bf16 %v505_v36, %v502_v35  ;;  %v6218_v35 = vld [vmem:[#allocation7 + $0x8] sm:$0xff] }
 0x16f   :  { %v443_v3 = vadd.f32 %v442_v52, %v6069_v42  ;;  %v517_v32 = vpop.f32.mrf.mxu1 }
 0x170   :  { %v444_v54 = vpop.f32.mrf.mxu0  ;;  %v518_v37 = vadd.f32 %v517_v32, %v262_v31 }
 0x171   :  { %v445_v56 = vadd.f32 %v444_v54, %v258_v53  ;;  %v535_v7 = vpack.c.bf16 %v443_v3, %v439_v5  ;;  %v4834_v34 = vpop.f32.mrf.mxu1 }
 0x172   :  { %v448_v57 = vpop.f32.mrf.mxu0  ;;  %v529_v41 = vadd.f32 %v4834_v34, %v262_v31 }
 0x173   :  { %v536_v59 = vpack.c.bf16 %v445_v56, %v441_v55  ;;  %v449_v20 = vadd.f32 %v448_v57, %v6069_v42  ;;  %v520_v38 = vpop.f32.mrf.mxu1 }
 0x174   :  { %v450_v60 = vpop.f32.mrf.mxu0  ;;  %v6128_v44 = vpack.c.bf16 %v529_v41, %v526_v33  ;;  %v521_v45 = vadd.f32 %v520_v38, %v262_v31  ;;  %v6216_v33 = vld [vmem:[#allocation7 + $0x18] sm:$0xff]  ;;  %v6220_v41 = vld [vmem:[#allocation7 + $0x30] sm:$0xff] }
 0x175   :  { %586 = vrot.lane.b32.xlu1 %v536_v59, %s5898_s5  ;;  %v451_v12 = vadd.f32 %v450_v60, %v258_v53  ;;  %v665_v17 = vsel %vm648_vm0, %v536_v59, 0 }
 0x176   :  { %v452_v62 = vpop.f32.mrf.mxu0  ;;  %v6132_v46 = vpack.c.bf16 %v521_v45, %v518_v37 }
 0x177   :  { %v453_v18 = vadd.f32 %v452_v62, %v6069_v42 }
 0x178   :  { %v454_v1 = vpop.f32.mrf.mxu0 }
 0x179   :  { %584 = vrot.lane.b32.xlu1 %v533_v63, %s5898_s5  ;;  %v455_v8 = vadd.f32 %v454_v1, %v258_v53  ;;  %v538_v22 = vpack.c.bf16 %v453_v18, %v449_v20 }
 0x17a   :  { %v458_v2 = vpop.f32.mrf.mxu0 }
 0x17b   :  { %v539_v14 = vpack.c.bf16 %v455_v8, %v451_v12  ;;  %v459_v21 = vadd.f32 %v458_v2, %v6069_v42 }
 0x17c   :  { %v460_v4 = vpop.f32.mrf.mxu0 }
 0x17d   :  { %556 = vrot.lane.b32.xlu1 %v6073_v48, %s5898_s5  ;;  %v461_v10 = vadd.f32 %v460_v4, %v258_v53  ;;  %v668_v16 = vsel %vm648_vm0, %v539_v14, 0 }
 0x17e   :  { %v462_v6 = vpop.f32.mrf.mxu0 }
 0x17f   :  { %v463_v19 = vadd.f32 %v462_v6, %v6069_v42  ;;  %v510_v42 = vadd.f32 %v4829_v25, %v262_v31  ;;  %v6202_v25 = vld [vmem:[#allocation7 + $0x10] sm:$0xff] }
 0x180   :  { %v464_v9 = vpop.f32.mrf.mxu0 }
 0x181   :  { %v465_v11 = vadd.f32 %v464_v9, %v258_v53  ;;  %558 = vrot.lane.b32.xlu1 %v535_v7, %s5898_s5  ;;  %v541_v23 = vpack.c.bf16 %v463_v19, %v459_v21  ;;  %v6136_v47 = vpack.c.bf16 %v513_v43, %v510_v42 }
 0x183   :  { %v542_v13 = vpack.c.bf16 %v465_v11, %v461_v10 }
 0x185   :  { %590 = vrot.lane.b32.xlu0 %v542_v13, %s5898_s5  ;;  %5163 = vmatprep.subr.msk.bf16.mxu0 %vm648_vm0, %v542_v13  ;;  %v671_v15 = vsel %vm648_vm0, %v542_v13, 0 }
 0x186   :  { %604 = vrot.lane.b32.xlu1 %v539_v14, %s5899_s29  ;;  %4836 = vmatpush3.bf16.xpose.msra.mxu0 %v671_v15 }
 0x187   :  { %5164 = vmatprep.subr.msk.bf16.mxu0 %vm648_vm0, %v539_v14 }
 0x189   :  { %588 = vrot.lane.b32.xlu0 %v539_v14, %s5898_s5 }
 0x18a   :  { %602 = vrot.lane.b32.xlu1 %v536_v59, %s5899_s29 }
 0x18d   :  { %598 = vrot.lane.b32.xlu0 %v542_v13, %s5886_s28 }
 0x18e   :  { %592 = vrot.lane.b32.xlu1 %v533_v63, %s5886_s28  ;;  %4838 = vmatpush3.bf16.xpose.msra.mxu0 %v668_v16 }
 0x18f   :  { %5165 = vmatprep.subr.msk.bf16.mxu0 %vm648_vm0, %v536_v59 }
 0x191   :  { %606 = vrot.lane.b32.xlu0 %v542_v13, %s5899_s29 }
 0x192   :  { %600 = vrot.lane.b32.xlu1 %v533_v63, %s5899_s29 }
 0x195   :  { %596 = vrot.lane.b32.xlu0 %v539_v14, %s5886_s28 }
 0x196   :  { %566 = vrot.lane.b32.xlu1 %v535_v7, %s5886_s28  ;;  %4840 = vmatpush3.bf16.xpose.msra.mxu0 %v665_v17 }
 0x197   :  { %5166 = vmatprep.subr.msk.bf16.mxu0 %vm648_vm0, %v533_v63 }
 0x199   :  { %594 = vrot.lane.b32.xlu0 %v536_v59, %s5886_s28 }
 0x19a   :  { %574 = vrot.lane.b32.xlu1 %v535_v7, %s5899_s29 }
 0x19d   :  { %560 = vrot.lane.b32.xlu0 %v538_v22, %s5898_s5 }
 0x19e   :  { %570 = vrot.lane.b32.xlu1 %v541_v23, %s5886_s28  ;;  %4842 = vmatpush3.bf16.xpose.msra.mxu0 %v662_v24 }
 0x1a1   :  { %562 = vrot.lane.b32.xlu0 %v541_v23, %s5898_s5 }
 0x1a2   :  { %578 = vrot.lane.b32.xlu1 %v541_v23, %s5899_s29 }
 0x1a5   :  { %564 = vrot.lane.b32.xlu0 %v6073_v48, %s5886_s28  ;;  %4844 = vmatmul.mubr.msk.bf16.vlgmr.msra.gmra.mxu0 %vm648_vm0, %v535_v7 }
 0x1a6   :  { %4847 = vmatprep.mubr.msk.bf16.mxu0 %vm648_vm0, %v538_v22  ;;  %618 = vrot.lane.b32.xlu1 %v6128_v44, %s5898_s5 }
 0x1a9   :  { %572 = vrot.lane.b32.xlu0 %v6073_v48, %s5899_s29 }
 0x1aa   :  { %612 = vrot.lane.b32.xlu1 %v6130_v40, %s5898_s5 }
 0x1ad   :  { %568 = vrot.lane.b32.xlu0 %v538_v22, %s5886_s28  ;;  %4848 = vmatmul.mubr.msk.bf16.gmra.mxu0 %vm648_vm0, %v541_v23 }
 0x1ae   :  { %626 = vrot.lane.b32.xlu1 %v6136_v47, %s5886_s28 }
 0x1b1   :  { %576 = vrot.lane.b32.xlu0 %v538_v22, %s5899_s29 }
 0x1b5   :  { %616 = vrot.lane.b32.xlu0 %v6132_v46, %s5898_s5 }
 0x1b9   :  { %614 = vrot.lane.b32.xlu0 %v6136_v47, %s5898_s5 }
 0x1bd   :  { %630 = vrot.lane.b32.xlu0 %v6128_v44, %s5886_s28 }
 0x1c1   :  { %642 = vrot.lane.b32.xlu0 %v6128_v44, %s5899_s29 }
 0x1c5   :  { %628 = vrot.lane.b32.xlu0 %v6132_v46, %s5886_s28 }
 0x1c9   :  { %640 = vrot.lane.b32.xlu0 %v6132_v46, %s5899_s29 }
 0x1e7   :  { %v587_v48 = vpop.permute.xlu1 %586 }
 0x1e8   :  { %v754_v62 = vsel %vm648_vm0, %v587_v48, 0 }
 0x1eb   :  { %v585_v49 = vpop.permute.xlu1 %584 }
 0x1ec   :  { %v751_v5 = vsel %vm648_vm0, %v585_v49, 0 }
 0x1ef   :  { %v557_v51 = vpop.permute.xlu1 %556 }
 0x1f0   :  { %4859 = vmatprep.mubr.msk.bf16.mxu1 %vm648_vm0, %v557_v51  ;;  %v6238_v51 = vld [vmem:[#allocation7 + $0x20] sm:$0xff] }
 0x1f3   :  { %v559_v55 = vpop.permute.xlu1 %558 }
 0x1f7   :  { %v591_v52 = vpop.permute.xlu0 %590 }
 0x1f8   :  { %5167 = vmatprep.subr.msk.bf16.mxu1 %vm648_vm0, %v591_v52  ;;  %v760_v53 = vsel %vm648_vm0, %v591_v52, 0  ;;  %v605_v59 = vpop.permute.xlu1 %604  ;;  %v6240_v52 = vld [vmem:[#allocation7 + $0x38] sm:$0xff] }
 0x1f9   :  { %4852 = vmatpush3.bf16.xpose.msra.mxu1 %v760_v53  ;;  %v935_v16 = vsel %vm648_vm0, %v605_v59, 0 }
 0x1fb   :  { %v589_v54 = vpop.permute.xlu0 %588 }
 0x1fc   :  { %5168 = vmatprep.subr.msk.bf16.mxu1 %vm648_vm0, %v589_v54  ;;  %v757_v57 = vsel %vm648_vm0, %v589_v54, 0  ;;  %v603_v1 = vpop.permute.xlu1 %602 }
 0x1fd   :  { %v932_v18 = vsel %vm648_vm0, %v603_v1, 0 }
 0x1ff   :  { %v599_v56 = vpop.permute.xlu0 %598 }
 0x200   :  { %5171 = vmatprep.subr.msk.bf16.mxu0 %vm648_vm0, %v599_v56  ;;  %v849_v58 = vsel %vm648_vm0, %v599_v56, 0  ;;  %v593_v3 = vpop.permute.xlu1 %592  ;;  %v6246_v56 = vld [vmem:[#allocation7 + $0x28] sm:$0xff] }
 0x201   :  { %4854 = vmatpush3.bf16.xpose.msra.mxu1 %v757_v57  ;;  %4868 = vmatpush3.bf16.xpose.msra.mxu0 %v849_v58  ;;  %v840_v10 = vsel %vm648_vm0, %v593_v3, 0 }
 0x202   :  { %5169 = vmatprep.subr.msk.bf16.mxu1 %vm648_vm0, %v587_v48 }
 0x203   :  { %v607_v60 = vpop.permute.xlu0 %606 }
 0x204   :  { %v601_v8 = vpop.permute.xlu1 %600  ;;  %v938_v11 = vsel %vm648_vm0, %v607_v60, 0 }
 0x205   :  { %v929_v19 = vsel %vm648_vm0, %v601_v8, 0 }
 0x207   :  { %v597_v61 = vpop.permute.xlu0 %596 }
 0x208   :  { %5172 = vmatprep.subr.msk.bf16.mxu0 %vm648_vm0, %v597_v61  ;;  %v846_v63 = vsel %vm648_vm0, %v597_v61, 0  ;;  %v567_v12 = vpop.permute.xlu1 %566 }
 0x209   :  { %4856 = vmatpush3.bf16.xpose.msra.mxu1 %v754_v62  ;;  %4870 = vmatpush3.bf16.xpose.msra.mxu0 %v846_v63 }
 0x20a   :  { %5170 = vmatprep.subr.msk.bf16.mxu1 %vm648_vm0, %v585_v49 }
 0x20b   :  { %v595_v2 = vpop.permute.xlu0 %594 }
 0x20c   :  { %5173 = vmatprep.subr.msk.bf16.mxu0 %vm648_vm0, %v595_v2  ;;  %v843_v6 = vsel %vm648_vm0, %v595_v2, 0  ;;  %v575_v15 = vpop.permute.xlu1 %574 }
 0x20f   :  { %v561_v4 = vpop.permute.xlu0 %560 }
 0x210   :  { %v571_v17 = vpop.permute.xlu1 %570 }
 0x211   :  { %4858 = vmatpush3.bf16.xpose.msra.mxu1 %v751_v5  ;;  %4872 = vmatpush3.bf16.xpose.msra.mxu0 %v843_v6 }
 0x212   :  { %5174 = vmatprep.subr.msk.bf16.mxu0 %vm648_vm0, %v593_v3  ;;  %5175 = vmatprep.subr.msk.bf16.mxu1 %vm648_vm0, %v607_v60 }
 0x213   :  { %v563_v7 = vpop.permute.xlu0 %562 }
 0x214   :  { %v579_v21 = vpop.permute.xlu1 %578 }
 0x217   :  { %v565_v9 = vpop.permute.xlu0 %564 }
 0x218   :  { %4860 = vmatmul.mubr.msk.bf16.vlgmr.msra.gmra.mxu1 %vm648_vm0, %v559_v55  ;;  %4875 = vmatprep.mubr.msk.bf16.mxu0 %vm648_vm0, %v565_v9  ;;  %v6222_v38 = vpop.permute.xlu1 %618 }
 0x219   :  { %4863 = vmatprep.mubr.msk.bf16.mxu1 %vm648_vm0, %v561_v4  ;;  %4874 = vmatpush3.bf16.xpose.msra.mxu0 %v840_v10 }
 0x21a   :  { %4884 = vmatpush3.bf16.xpose.msra.mxu1 %v938_v11 }
 0x21b   :  { %5176 = vmatprep.subr.msk.bf16.mxu1 %vm648_vm0, %v605_v59  ;;  %v573_v13 = vpop.permute.xlu0 %572 }
 0x21c   :  { %v6242_v53 = vpop.permute.xlu1 %612 }
 0x21f   :  { %v569_v14 = vpop.permute.xlu0 %568 }
 0x220   :  { %4864 = vmatmul.mubr.msk.bf16.gmra.mxu1 %vm648_vm0, %v563_v7  ;;  %4876 = vmatmul.mubr.msk.bf16.vlgmr.msra.gmra.mxu0 %vm648_vm0, %v567_v12  ;;  %v627_v63 = vpop.permute.xlu1 %626 }
 0x221   :  { %4879 = vmatprep.mubr.msk.bf16.mxu0 %vm648_vm0, %v569_v14  ;;  %4891 = vmatprep.mubr.msk.bf16.mxu1 %vm648_vm0, %v573_v13 }
 0x222   :  { %4886 = vmatpush3.bf16.xpose.msra.mxu1 %v935_v16 }
 0x223   :  { %5177 = vmatprep.subr.msk.bf16.mxu1 %vm648_vm0, %v603_v1  ;;  %v577_v20 = vpop.permute.xlu0 %576 }
 0x227   :  { %v6198_v22 = vpop.permute.xlu0 %616 }
 0x228   :  { %4880 = vmatmul.mubr.msk.bf16.gmra.mxu0 %vm648_vm0, %v571_v17 }
 0x22a   :  { %4888 = vmatpush3.bf16.xpose.msra.mxu1 %v932_v18 }
 0x22b   :  { %5178 = vmatprep.subr.msk.bf16.mxu1 %vm648_vm0, %v601_v8  ;;  %v6200_v23 = vpop.permute.xlu0 %614 }
 0x22f   :  { %v631_v24 = vpop.permute.xlu0 %630 }
 0x230   :  { %4931 = vmatprep.subr.bf16.mxu0 %v631_v24 }
 0x231   :  { %4932 = vmatpush3.bf16.msra.mxu0 %v631_v24 }
 0x232   :  { %4890 = vmatpush3.bf16.xpose.msra.mxu1 %v929_v19 }
 0x233   :  { %4899 = vmatprep.subr.bf16.mxu1 %v6128_v44  ;;  %v6206_v28 = vpop.permute.xlu0 %642 }
 0x237   :  { %v629_v36 = vpop.permute.xlu0 %628 }
 0x238   :  { %4933 = vmatprep.subr.bf16.mxu0 %v629_v36 }
 0x239   :  { %4892 = vmatmul.mubr.msk.bf16.vlgmr.msra.gmra.mxu1 %vm648_vm0, %v575_v15  ;;  %4934 = vmatpush3.bf16.msra.mxu0 %v629_v36 }
 0x23a   :  { %4895 = vmatprep.mubr.msk.bf16.mxu1 %vm648_vm0, %v577_v20  ;;  %4900 = vmatpush3.bf16.msra.mxu1 %v6128_v44 }
 0x23b   :  { %4901 = vmatprep.subr.bf16.mxu1 %v6132_v46  ;;  %4935 = vmatprep.subr.bf16.mxu0 %v627_v63 }
 0x23d   :  { %4936 = vmatpush3.bf16.msra.mxu0 %v627_v63 }
 0x23e   :  { %4902 = vmatpush3.bf16.msra.mxu1 %v6132_v46 }
 0x23f   :  { %4903 = vmatprep.subr.bf16.mxu1 %v6136_v47 }
 0x241   :  { %4896 = vmatmul.mubr.msk.bf16.gmra.mxu1 %vm648_vm0, %v579_v21 }
 0x242   :  { %4904 = vmatpush3.bf16.msra.mxu1 %v6136_v47 }
 0x243   :  { %4905 = vmatprep.subr.bf16.mxu1 %v6130_v40 }
 0x246   :  { %4906 = vmatpush3.bf16.msra.mxu1 %v6130_v40 }
 0x247   :  { %4915 = vmatprep.subr.bf16.mxu1 %v6222_v38 }
 0x265   :  { %v4845_v26 = vpop.f32.mrf.mxu0 }
 0x266   :  { %v6209_v29 = vadd.f32 %v4845_v26, %v6202_v25 }
 0x267   :  { %v707_v30 = vpop.f32.mrf.mxu0 }
 0x268   :  { %v6212_v31 = vadd.f32 %v707_v30, %v6204_v27  ;;  %v1012_v32 = vsel %vm1005_vm1, %v6209_v29, -inf }
 0x269   :  { %1013 = vmax.xlane.f32.xlu0 %v1012_v32  ;;  %v4846_v34 = vpop.f32.mrf.mxu0 }
 0x26a   :  { %v6225_v42 = vadd.f32 %v4846_v34, %v6216_v33  ;;  %v1006_v44 = vsel %vm1005_vm1, %v6212_v31, -inf }
 0x26b   :  { %v710_v37 = vpop.f32.mrf.mxu0 }
 0x26c   :  { %v6228_v43 = vadd.f32 %v710_v37, %v6218_v35  ;;  %v1015_v54 = vsel %vm1005_vm1, %v6225_v42, -inf }
 0x26d   :  { %v4849_v45 = vpop.f32.mrf.mxu0  ;;  %1007 = vmax.xlane.f32.xlu0 %v1006_v44 }
 0x26e   :  { %v6234_v46 = vadd.f32 %v4849_v45, %v6220_v41  ;;  %v1009_v48 = vsel %vm1005_vm1, %v6228_v43, -inf  ;;  %v6306_v45 = vpop.permute.xlu0 %640 }
 0x26f   :  { %v723_v49 = vpop.f32.mrf.mxu0  ;;  %1010 = vmax.xlane.f32.xlu1 %v1009_v48 }
 0x270   :  { %v6249_v57 = vadd.f32 %v723_v49, %v6238_v51  ;;  %v1024_v59 = vsel %vm1005_vm1, %v6234_v46, -inf }
 0x271   :  { %v4850_v55 = vpop.f32.mrf.mxu0  ;;  %1016 = vmax.xlane.f32.xlu0 %v1015_v54 }
 0x272   :  { %v6252_v58 = vadd.f32 %v4850_v55, %v6240_v52  ;;  %v1018_v1 = vsel %vm1005_vm1, %v6249_v57, -inf }
 0x273   :  { %v726_v60 = vpop.f32.mrf.mxu0  ;;  %1025 = vmax.xlane.f32.xlu1 %v1024_v59 }
 0x274   :  { %v6257_v61 = vadd.f32 %v726_v60, %v6246_v56  ;;  %v1027_v62 = vsel %vm1005_vm1, %v6252_v58, -inf }
 0x275   :  { %1028 = vmax.xlane.f32.xlu0 %v1027_v62 }
 0x276   :  { %v1021_v2 = vsel %vm1005_vm1, %v6257_v61, -inf }
 0x277   :  { %1019 = vmax.xlane.f32.xlu1 %v1018_v1 }
 0x279   :  { %1022 = vmax.xlane.f32.xlu0 %v1021_v2 }
 0x2d8   :  { %v4861_v3 = vpop.f32.mrf.mxu1 }
 0x2d9   :  { %v6266_v4 = vadd.f32 %v4861_v3, %v6202_v25 }
 0x2da   :  { %v796_v5 = vpop.f32.mrf.mxu1 }
 0x2db   :  { %v1036_v6 = vsel %vm1005_vm1, %v6266_v4, -inf  ;;  %v6279_v14 = vadd.f32 %v796_v5, %v6204_v27 }
 0x2dc   :  { %v4862_v7 = vpop.f32.mrf.mxu1  ;;  %1037 = vmax.xlane.f32.xlu1 %v1036_v6 }
 0x2dd   :  { %v6271_v8 = vadd.f32 %v4862_v7, %v6216_v33  ;;  %v1030_v24 = vsel %vm1005_vm1, %v6279_v14, -inf }
 0x2de   :  { %v799_v10 = vpop.f32.mrf.mxu1 }
 0x2df   :  { %v1039_v9 = vsel %vm1005_vm1, %v6271_v8, -inf  ;;  %v6287_v20 = vadd.f32 %v799_v10, %v6218_v35 }
 0x2e0   :  { %v4877_v11 = vpop.f32.mrf.mxu0  ;;  %1040 = vmax.xlane.f32.xlu0 %v1039_v9  ;;  %v4865_v16 = vpop.f32.mrf.mxu1 }
 0x2e1   :  { %v6276_v12 = vadd.f32 %v4877_v11, %v6202_v25  ;;  %v6297_v34 = vadd.f32 %v4865_v16, %v6220_v41  ;;  %v1033_v44 = vsel %vm1005_vm1, %v6287_v20, -inf }
 0x2e2   :  { %v885_v13 = vpop.f32.mrf.mxu0  ;;  %v812_v30 = vpop.f32.mrf.mxu1 }
 0x2e3   :  { %v1060_v15 = vsel %vm1005_vm1, %v6276_v12, -inf  ;;  %v6290_v21 = vadd.f32 %v885_v13, %v6204_v27  ;;  %v1048_v59 = vsel %vm1005_vm1, %v6297_v34, -inf  ;;  %v6319_v1 = vadd.f32 %v812_v30, %v6238_v51 }
 0x2e4   :  { %v4878_v17 = vpop.f32.mrf.mxu0  ;;  %1061 = vmax.xlane.f32.xlu1 %v1060_v15  ;;  %v4866_v48 = vpop.f32.mrf.mxu1 }
 0x2e5   :  { %v6284_v18 = vadd.f32 %v4878_v17, %v6216_v33  ;;  %v1054_v37 = vsel %vm1005_vm1, %v6290_v21, -inf  ;;  %v6309_v54 = vadd.f32 %v4866_v48, %v6240_v52  ;;  %v1042_v15 = vsel %vm1005_vm1, %v6319_v1, -inf }
 0x2e6   :  { %v888_v19 = vpop.f32.mrf.mxu0  ;;  %v815_v6 = vpop.f32.mrf.mxu1 }
 0x2e7   :  { %v1063_v26 = vsel %vm1005_vm1, %v6284_v18, -inf  ;;  %v6300_v36 = vadd.f32 %v888_v19, %v6218_v35  ;;  %v1051_v5 = vsel %vm1005_vm1, %v6309_v54, -inf  ;;  %v6330_v10 = vadd.f32 %v815_v6, %v6246_v56 }
 0x2e8   :  { %v4881_v32 = vpop.f32.mrf.mxu0  ;;  %1031 = vmax.xlane.f32.xlu1 %v1030_v24  ;;  %1064 = vmax.xlane.f32.xlu0 %v1063_v26 }
 0x2e9   :  { %v6312_v55 = vadd.f32 %v4881_v32, %v6220_v41  ;;  %v1057_v60 = vsel %vm1005_vm1, %v6300_v36, -inf }
 0x2ea   :  { %v901_v49 = vpop.f32.mrf.mxu0 }
 0x2eb   :  { %v1072_v3 = vsel %vm1005_vm1, %v6312_v55, -inf  ;;  %v6333_v11 = vadd.f32 %v901_v49, %v6238_v51  ;;  %v1045_v49 = vsel %vm1005_vm1, %v6330_v10, -inf }
 0x2ec   :  { %1055 = vmax.xlane.f32.xlu1 %v1054_v37  ;;  %1034 = vmax.xlane.f32.xlu0 %v1033_v44  ;;  %v4882_v62 = vpop.f32.mrf.mxu0 }
 0x2ed   :  { %v6322_v2 = vadd.f32 %v4882_v62, %v6240_v52  ;;  %v1066_v48 = vsel %vm1005_vm1, %v6333_v11, -inf }
 0x2ee   :  { %v904_v13 = vpop.f32.mrf.mxu0 }
 0x2ef   :  { %v1075_v16 = vsel %vm1005_vm1, %v6322_v2, -inf }
 0x2f0   :  { %1049 = vmax.xlane.f32.xlu1 %v1048_v59  ;;  %1058 = vmax.xlane.f32.xlu0 %v1057_v60 }
 0x2f2   :  { %v1014_v63 = vpop.xlane.xlu0 %1013 }
 0x2f3   :  { %v1104_v7 = vsub.f32 %v6209_v29, %v1014_v63  ;;  %v6340_v29 = vadd.f32 %v904_v13, %v6246_v56 }
 0x2f4   :  { %1073 = vmax.xlane.f32.xlu1 %v1072_v3  ;;  %1052 = vmax.xlane.f32.xlu0 %v1051_v5 }
 0x2f5   :  { %v1138_v24 = vmul.f32 1.442695, %v1104_v7 }
 0x2f6   :  { %v1008_v9 = vpop.xlane.xlu0 %1007 }
 0x2f7   :  { %v1102_v26 = vsub.f32 %v6212_v31, %v1008_v9  ;;  %5335 = vpow2.f32 %v1138_v24 }
 0x2f8   :  { %1043 = vmax.xlane.f32.xlu1 %v1042_v15  ;;  %v1011_v17 = vpop.xlane.xlu1 %1010  ;;  %1076 = vmax.xlane.f32.xlu0 %v1075_v16 }
 0x2f9   :  { %v4893_v19 = vpop.f32.mrf.mxu1  ;;  %v1103_v60 = vsub.f32 %v6228_v43, %v1011_v17  ;;  %v1134_v31 = vmul.f32 1.442695, %v1102_v26 }
 0x2fa   :  { %v1017_v30 = vpop.xlane.xlu0 %1016  ;;  %v6344_v32 = vadd.f32 %v4893_v19, %v6202_v25 }
 0x2fb   :  { %v974_v37 = vpop.f32.mrf.mxu1  ;;  %v1105_v44 = vsub.f32 %v6225_v42, %v1017_v30  ;;  %v1069_v42 = vsel %vm1005_vm1, %v6340_v29, -inf  ;;  %v1136_v13 = vmul.f32 1.442695, %v1103_v60  ;;  %5337 = vpow2.f32 %v1134_v31 }
 0x2fc   :  { %1067 = vmax.xlane.f32.xlu1 %v1066_v48  ;;  %v1026_v59 = vpop.xlane.xlu1 %1025  ;;  %1046 = vmax.xlane.f32.xlu0 %v1045_v49  ;;  %v6356_v3 = vadd.f32 %v974_v37, %v6204_v27  ;;  %v1084_v43 = vsel %vm1005_vm1, %v6344_v32, -inf }
 0x2fd   :  { %v4894_v62 = vpop.f32.mrf.mxu1  ;;  %v1108_v25 = vsub.f32 %v6234_v46, %v1026_v59  ;;  %v1140_v5 = vmul.f32 1.442695, %v1105_v44 }
 0x2fe   :  { %v1029_v63 = vpop.xlane.xlu0 %1028  ;;  %v6359_v6 = vadd.f32 %v4894_v62, %v6216_v33  ;;  %v1078_v24 = vsel %vm1005_vm1, %v6356_v3, -inf }
 0x2ff   :  { %v977_v7 = vpop.f32.mrf.mxu1  ;;  %v1109_v46 = vsub.f32 %v6252_v58, %v1029_v63  ;;  %v1146_v16 = vmul.f32 1.442695, %v1108_v25  ;;  %5339 = vpow2.f32 %v1140_v5 }
 0x300   :  { %1085 = vmax.xlane.f32.xlu1 %v1084_v43  ;;  %v1020_v9 = vpop.xlane.xlu1 %1019  ;;  %1070 = vmax.xlane.f32.xlu0 %v1069_v42  ;;  %v6365_v27 = vadd.f32 %v977_v7, %v6218_v35  ;;  %v1087_v26 = vsel %vm1005_vm1, %v6359_v6, -inf  ;;  %5341 = vpow2.f32 %v1136_v13 }
 0x301   :  { %v4897_v15 = vpop.f32.mrf.mxu1  ;;  %v1106_v17 = vsub.f32 %v6249_v57, %v1020_v9  ;;  %v1148_v30 = vmul.f32 1.442695, %v1109_v46  ;;  %5343 = vpow2.f32 %v1146_v16 }
 0x302   :  { %v6369_v33 = vadd.f32 %v4897_v15, %v6220_v41  ;;  %v1023_v58 = vpop.xlane.xlu0 %1022  ;;  %v1081_v57 = vsel %vm1005_vm1, %v6365_v27, -inf }
 0x303   :  { %v990_v19 = vpop.f32.mrf.mxu1  ;;  %v1142_v37 = vmul.f32 1.442695, %v1106_v17  ;;  %v1107_v44 = vsub.f32 %v6257_v61, %v1023_v58  ;;  %5345 = vpow2.f32 %v1148_v30 }
 0x304   :  { %1079 = vmax.xlane.f32.xlu1 %v1078_v24  ;;  %1088 = vmax.xlane.f32.xlu0 %v1087_v26  ;;  %v6378_v41 = vadd.f32 %v990_v19, %v6238_v51  ;;  %v1096_v49 = vsel %vm1005_vm1, %v6369_v33, -inf  ;;  %v6386_v60 = vpop.eup %5335 }
 0x305   :  { %v4898_v35 = vpop.f32.mrf.mxu1  ;;  %5347 = vpow2.f32 %v1142_v37  ;;  %v1144_v62 = vmul.f32 1.442695, %v1107_v44  ;;  %v1204_v25 = vsel %vm1005_vm1, %v6386_v60, 0.0 }
 0x306   :  { %v6382_v48 = vadd.f32 %v4898_v35, %v6240_v52  ;;  %v1090_v51 = vsel %vm1005_vm1, %v6378_v41, -inf }
 0x307   :  { %v993_v59 = vpop.f32.mrf.mxu1  ;;  %5349 = vpow2.f32 %v1144_v62 }
 0x308   :  { %1097 = vmax.xlane.f32.xlu1 %v1096_v49  ;;  %1082 = vmax.xlane.f32.xlu0 %v1081_v57  ;;  %v6389_v31 = vadd.f32 %v993_v59, %v6246_v56  ;;  %v1099_v52 = vsel %vm1005_vm1, %v6382_v48, -inf  ;;  %v6395_v61 = vpop.eup %5337 }
 0x309   :  { %v1198_v7 = vsel %vm1005_vm1, %v6395_v61, 0.0 }
 0x30a   :  { %v1093_v63 = vsel %vm1005_vm1, %v6389_v31, -inf }
 0x30c   :  { %1091 = vmax.xlane.f32.xlu1 %v1090_v51  ;;  %1100 = vmax.xlane.f32.xlu0 %v1099_v52  ;;  %v6401_v42 = vpop.eup %5339 }
 0x30d   :  { %v6403_v56 = vpop.eup %5341  ;;  %v1207_v43 = vsel %vm1005_vm1, %v6401_v42, 0.0 }
 0x30e   :  { %v6405_v5 = vpop.eup %5343  ;;  %v1201_v15 = vsel %vm1005_vm1, %v6403_v56, 0.0 }
 0x30f   :  { %v1216_v46 = vsel %vm1005_vm1, %v6405_v5, 0.0 }
 0x310   :  { %1205 = vadd.xlane.f32.xlu1 %v1204_v25  ;;  %1094 = vmax.xlane.f32.xlu0 %v1093_v63  ;;  %v6411_v9 = vpop.eup %5345 }
 0x311   :  { %v1219_v17 = vsel %vm1005_vm1, %v6411_v9, 0.0 }
 0x312   :  { %v6413_v13 = vpop.eup %5347 }
 0x313   :  { %v1210_v16 = vsel %vm1005_vm1, %v6413_v13, 0.0 }
 0x314   :  { %1199 = vadd.xlane.f32.xlu1 %v1198_v7  ;;  %1208 = vadd.xlane.f32.xlu0 %v1207_v43  ;;  %v6423_v19 = vpop.eup %5349 }
 0x315   :  { %v1213_v24 = vsel %vm1005_vm1, %v6423_v19, 0.0 }
 0x318   :  { %1217 = vadd.xlane.f32.xlu1 %v1216_v46  ;;  %1202 = vadd.xlane.f32.xlu0 %v1201_v15 }
 0x31c   :  { %1211 = vadd.xlane.f32.xlu1 %v1210_v16  ;;  %1220 = vadd.xlane.f32.xlu0 %v1219_v17 }
 0x320   :  { %1214 = vadd.xlane.f32.xlu0 %v1213_v24 }
 0x365   :  { %v1038_v26 = vpop.xlane.xlu1 %1037 }
 0x366   :  { %v1112_v58 = vsub.f32 %v6266_v4, %v1038_v26 }
 0x368   :  { %v1154_v30 = vmul.f32 1.442695, %v1112_v58 }
 0x369   :  { %v1041_v35 = vpop.xlane.xlu0 %1040 }
 0x36a   :  { %5351 = vpow2.f32 %v1154_v30  ;;  %v1113_v51 = vsub.f32 %v6271_v8, %v1041_v35 }
 0x36c   :  { %v1156_v43 = vmul.f32 1.442695, %v1113_v51 }
 0x36d   :  { %v1062_v37 = vpop.xlane.xlu1 %1061 }
 0x36e   :  { %v1120_v57 = vsub.f32 %v6276_v12, %v1062_v37 }
 0x370   :  { %v1170_v44 = vmul.f32 1.442695, %v1120_v57 }
 0x371   :  { %v1032_v49 = vpop.xlane.xlu1 %1031  ;;  %v1065_v59 = vpop.xlane.xlu0 %1064 }
 0x372   :  { %5353 = vpow2.f32 %v1170_v44  ;;  %v1110_v62 = vsub.f32 %v6279_v14, %v1032_v49  ;;  %v1121_v46 = vsub.f32 %v6284_v18, %v1065_v59 }
 0x374   :  { %v1150_v52 = vmul.f32 1.442695, %v1110_v62  ;;  %v1172_v24 = vmul.f32 1.442695, %v1121_v46 }
 0x375   :  { %v1056_v25 = vpop.xlane.xlu1 %1055  ;;  %v1035_v63 = vpop.xlane.xlu0 %1034 }
 0x376   :  { %5355 = vpow2.f32 %v1150_v52  ;;  %v1118_v4 = vsub.f32 %v6290_v21, %v1056_v25  ;;  %v1111_v17 = vsub.f32 %v6287_v20, %v1035_v63 }
 0x377   :  { %v6432_v7 = vpop.eup %5351 }
 0x378   :  { %v1166_v12 = vmul.f32 1.442695, %v1118_v4  ;;  %v1228_v15 = vsel %vm1005_vm1, %v6432_v7, 0.0  ;;  %v1152_v18 = vmul.f32 1.442695, %v1111_v17 }
 0x379   :  { %v1050_v16 = vpop.xlane.xlu1 %1049  ;;  %1229 = vadd.xlane.f32.xlu1 %v1228_v15  ;;  %v1059_v14 = vpop.xlane.xlu0 %1058 }
 0x37a   :  { %5357 = vpow2.f32 %v1166_v12  ;;  %v1116_v8 = vsub.f32 %v6297_v34, %v1050_v16  ;;  %v1119_v35 = vsub.f32 %v6300_v36, %v1059_v14 }
 0x37b   :  { %5359 = vpow2.f32 %v1156_v43 }
 0x37c   :  { %v1162_v21 = vmul.f32 1.442695, %v1116_v8  ;;  %v1168_v49 = vmul.f32 1.442695, %v1119_v35 }
 0x37d   :  { %v1074_v26 = vpop.xlane.xlu1 %1073  ;;  %v1053_v58 = vpop.xlane.xlu0 %1052 }
 0x37e   :  { %5361 = vpow2.f32 %v1162_v21  ;;  %v1117_v36 = vsub.f32 %v6309_v54, %v1053_v58  ;;  %v1124_v21 = vsub.f32 %v6312_v55, %v1074_v26 }
 0x37f   :  { %v6439_v30 = vpop.eup %5353  ;;  %5363 = vpow2.f32 %v1172_v24 }
 0x380   :  { %v1252_v37 = vsel %vm1005_vm1, %v6439_v30, 0.0  ;;  %5365 = vpow2.f32 %v1152_v18  ;;  %v1164_v15 = vmul.f32 1.442695, %v1117_v36 }
 0x381   :  { %v1044_v57 = vpop.xlane.xlu1 %1043  ;;  %1253 = vadd.xlane.f32.xlu0 %v1252_v37  ;;  %v1077_v34 = vpop.xlane.xlu0 %1076 }
 0x382   :  { %v1114_v44 = vsub.f32 %v6319_v1, %v1044_v57  ;;  %v1125_v55 = vsub.f32 %v6322_v2, %v1077_v34 }
 0x383   :  { %v6445_v20 = vpop.eup %5355 }
 0x384   :  { %v1158_v59 = vmul.f32 1.442695, %v1114_v44  ;;  %v1222_v62 = vsel %vm1005_vm1, %v6445_v20, 0.0  ;;  %v1180_v2 = vmul.f32 1.442695, %v1125_v55 }
 0x385   :  { %v1068_v51 = vpop.xlane.xlu1 %1067  ;;  %1223 = vadd.xlane.f32.xlu1 %v1222_v62  ;;  %v1047_v52 = vpop.xlane.xlu0 %1046 }
 0x386   :  { %5367 = vpow2.f32 %v1158_v59  ;;  %v1122_v25 = vsub.f32 %v6333_v11, %v1068_v51  ;;  %v1115_v11 = vsub.f32 %v6330_v10, %v1047_v52 }
 0x387   :  { %v6451_v63 = vpop.eup %5357  ;;  %5369 = vpow2.f32 %v1168_v49  ;;  %v1178_v49 = vmul.f32 1.442695, %v1124_v21 }
 0x388   :  { %v6453_v4 = vpop.eup %5359  ;;  %v1174_v1 = vmul.f32 1.442695, %v1122_v25  ;;  %v1246_v43 = vsel %vm1005_vm1, %v6451_v63, 0.0  ;;  %v1160_v37 = vmul.f32 1.442695, %v1115_v11 }
 0x389   :  { %v1086_v46 = vpop.xlane.xlu1 %1085  ;;  %1247 = vadd.xlane.f32.xlu0 %v1246_v43  ;;  %v1071_v12 = vpop.xlane.xlu0 %1070  ;;  %v1231_v54 = vsel %vm1005_vm1, %v6453_v4, 0.0 }
 0x38a   :  { %v1123_v16 = vsub.f32 %v6340_v29, %v1071_v12  ;;  %5371 = vpow2.f32 %v1174_v1  ;;  %v1128_v10 = vsub.f32 %v6344_v32, %v1086_v46 }
 0x38b   :  { %v6458_v14 = vpop.eup %5361  ;;  %5373 = vpow2.f32 %v1164_v15 }
 0x38c   :  { %v1176_v8 = vmul.f32 1.442695, %v1123_v16  ;;  %v1240_v17 = vsel %vm1005_vm1, %v6458_v14, 0.0  ;;  %v6465_v24 = vpop.eup %5363  ;;  %v1186_v51 = vmul.f32 1.442695, %v1128_v10 }
 0x38d   :  { %v1080_v58 = vpop.xlane.xlu1 %1079  ;;  %1241 = vadd.xlane.f32.xlu1 %v1240_v17  ;;  %1232 = vadd.xlane.f32.xlu0 %v1231_v54  ;;  %v1089_v29 = vpop.xlane.xlu0 %1088  ;;  %v1255_v44 = vsel %vm1005_vm1, %v6465_v24, 0.0 }
 0x38e   :  { %v1126_v18 = vsub.f32 %v6356_v3, %v1080_v58  ;;  %5375 = vpow2.f32 %v1176_v8  ;;  %v6469_v35 = vpop.eup %5365  ;;  %v1129_v32 = vsub.f32 %v6359_v6, %v1089_v29 }
 0x38f   :  { %v1225_v3 = vsel %vm1005_vm1, %v6469_v35, 0.0 }
 0x390   :  { %v1182_v57 = vmul.f32 1.442695, %v1126_v18  ;;  %v1188_v43 = vmul.f32 1.442695, %v1129_v32 }
 0x391   :  { %v6475_v26 = vpop.xlane.xlu1 %1097  ;;  %1256 = vadd.xlane.f32.xlu0 %v1255_v44  ;;  %v1083_v59 = vpop.xlane.xlu0 %1082 }
 0x392   :  { %5377 = vpow2.f32 %v1182_v57  ;;  %v1127_v1 = vsub.f32 %v6365_v27, %v1083_v59 }
 0x393   :  { %v6477_v62 = vpop.eup %5367  ;;  %5379 = vpow2.f32 %v1160_v37 }
 0x394   :  { %v1234_v52 = vsel %vm1005_vm1, %v6477_v62, 0.0  ;;  %v6484_v36 = vpop.eup %5369  ;;  %5381 = vpow2.f32 %v1178_v49  ;;  %v1184_v54 = vmul.f32 1.442695, %v1127_v1 }
 0x395   :  { %v6486_v34 = vpop.xlane.xlu1 %1091  ;;  %1235 = vadd.xlane.f32.xlu1 %v1234_v52  ;;  %1226 = vadd.xlane.f32.xlu0 %v1225_v3  ;;  %v6488_v25 = vpop.xlane.xlu0 %1100  ;;  %5383 = vpow2.f32 %v1186_v51  ;;  %v1249_v6 = vsel %vm1005_vm1, %v6484_v36, 0.0 }
 0x396   :  { %5385 = vpow2.f32 %v1180_v2 }
 0x397   :  { %v6493_v46 = vpop.eup %5371  ;;  %5387 = vpow2.f32 %v1188_v43 }
 0x398   :  { %v6497_v16 = vpop.eup %5373  ;;  %v1258_v27 = vsel %vm1005_vm1, %v6493_v46, 0.0  ;;  %5389 = vpow2.f32 %v1184_v54 }
 0x399   :  { %v1206_v12 = vpop.xlane.xlu1 %1205  ;;  %1250 = vadd.xlane.f32.xlu0 %v1249_v6  ;;  %v6495_v15 = vpop.xlane.xlu0 %1094  ;;  %v1243_v29 = vsel %vm1005_vm1, %v6497_v16, 0.0 }
 0x39b   :  { %v6499_v11 = vpop.eup %5375 }
 0x39c   :  { %v1261_v17 = vsel %vm1005_vm1, %v6499_v11, 0.0 }
 0x39d   :  { %v1200_v8 = vpop.xlane.xlu1 %1199  ;;  %1259 = vadd.xlane.f32.xlu0 %v1258_v27  ;;  %v1209_v21 = vpop.xlane.xlu0 %1208  ;;  %1262 = vadd.xlane.f32.xlu1 %v1261_v17 }
 0x39e   :  { %5391 = vrcp.f32 %v1209_v21 }
 0x39f   :  { %v6505_v58 = vpop.eup %5377  ;;  %5393 = vrcp.f32 %v1200_v8 }
 0x3a0   :  { %v1270_v18 = vsel %vm1005_vm1, %v6505_v58, 0.0  ;;  %v6511_v37 = vpop.eup %5379  ;;  %5395 = vrcp.f32 %v1206_v12 }
 0x3a1   :  { %v1218_v10 = vpop.xlane.xlu1 %1217  ;;  %1244 = vadd.xlane.f32.xlu0 %v1243_v29  ;;  %v1203_v57 = vpop.xlane.xlu0 %1202  ;;  %1271 = vadd.xlane.f32.xlu1 %v1270_v18  ;;  %v1237_v49 = vsel %vm1005_vm1, %v6511_v37, 0.0 }
 0x3a2   :  { %v6513_v44 = vpop.eup %5381  ;;  %5397 = vrcp.f32 %v1203_v57 }
 0x3a3   :  { %v6517_v55 = vpop.eup %5383  ;;  %v1264_v3 = vsel %vm1005_vm1, %v6513_v44, 0.0 }
 0x3a4   :  { %v6521_v32 = vpop.eup %5385  ;;  %v1276_v52 = vsel %vm1005_vm1, %v6517_v55, 0.0 }
 0x3a5   :  { %v1212_v59 = vpop.xlane.xlu1 %1211  ;;  %1238 = vadd.xlane.f32.xlu0 %v1237_v49  ;;  %v1221_v51 = vpop.xlane.xlu0 %1220  ;;  %1265 = vadd.xlane.f32.xlu1 %v1264_v3  ;;  %v1267_v1 = vsel %vm1005_vm1, %v6521_v32, 0.0 }
 0x3a6   :  { %5399 = vrcp.f32 %v1212_v59  ;;  %v6525_v2 = vpop.eup %5387 }
 0x3a7   :  { %5401 = vrcp.f32 %v1221_v51  ;;  %v6529_v6 = vpop.eup %5389  ;;  %v1279_v12 = vsel %vm1005_vm1, %v6525_v2, 0.0 }
 0x3a8   :  { %5403 = vrcp.f32 %v1218_v10  ;;  %v1273_v29 = vsel %vm1005_vm1, %v6529_v6, 0.0 }
 0x3a9   :  { %1277 = vadd.xlane.f32.xlu0 %v1276_v52  ;;  %v1215_v43 = vpop.xlane.xlu0 %1214  ;;  %1268 = vadd.xlane.f32.xlu1 %v1267_v1 }
 0x3aa   :  { %5405 = vrcp.f32 %v1215_v43 }
 0x3ab   :  { %v5392_v54 = vpop.eup %5391 }
 0x3ac   :  { %v5394_v27 = vpop.eup %5393  ;;  %v1329_v21 = vmul.f32 %v5392_v54, %v6401_v42 }
 0x3ad   :  { %1280 = vadd.xlane.f32.xlu0 %v1279_v12  ;;  %v5396_v8 = vpop.eup %5395  ;;  %v1326_v18 = vmul.f32 %v5394_v27, %v6395_v61 }
 0x3ae   :  { %v1328_v57 = vmul.f32 %v5396_v8, %v6386_v60 }
 0x3af   :  { %v5398_v17 = vpop.eup %5397 }
 0x3b0   :  { %v1327_v10 = vmul.f32 %v5398_v17, %v6403_v56  ;;  %v1359_v3 = vpack.c.bf16 %v1329_v21, %v1328_v57 }
 0x3b1   :  { %1274 = vadd.xlane.f32.xlu0 %v1273_v29 }
 0x3b2   :  { %v1358_v49 = vpack.c.bf16 %v1327_v10, %v1326_v18 }
 0x3b3   :  { %v5400_v59 = vpop.eup %5399 }
 0x3b4   :  { %v5402_v51 = vpop.eup %5401  ;;  %4907 = vmatprep.mubr.msk.bf16.mxu1 %vm1005_vm1, %v1358_v49  ;;  %v1330_v61 = vmul.f32 %v5400_v59, %v6413_v13  ;;  %v1132_v13 = vsub.f32 %v6369_v33, %v6475_v26 }
 0x3b5   :  { %v5404_v52 = vpop.eup %5403  ;;  %4908 = vmatmul.mubr.msk.bf16.vlgmr.msra.gmra.mxu1 %vm1005_vm1, %v1359_v3  ;;  %v1333_v60 = vmul.f32 %v5402_v51, %v6411_v9  ;;  %v1133_v9 = vsub.f32 %v6382_v48, %v6488_v25 }
 0x3b6   :  { %4916 = vmatpush3.bf16.msra.mxu1 %v6222_v38  ;;  %v1332_v43 = vmul.f32 %v5404_v52, %v6405_v5 }
 0x3b7   :  { %v5406_v42 = vpop.eup %5405  ;;  %4917 = vmatprep.subr.bf16.mxu1 %v6198_v22 }
 0x3b8   :  { %v1331_v56 = vmul.f32 %v5406_v42, %v6423_v19  ;;  %v1361_v38 = vpack.c.bf16 %v1333_v60, %v1332_v43  ;;  %v1194_v19 = vmul.f32 1.442695, %v1132_v13 }
 0x3ba   :  { %v1360_v1 = vpack.c.bf16 %v1331_v56, %v1330_v61  ;;  %4918 = vmatpush3.bf16.msra.mxu1 %v6198_v22  ;;  %624 = vrot.lane.b32.xlu1 %v6130_v40, %s5886_s28  ;;  %v1130_v22 = vsub.f32 %v6378_v41, %v6486_v34 }
 0x3bb   :  { %4919 = vmatprep.subr.bf16.mxu1 %v6200_v23 }
 0x3bc   :  { %4911 = vmatprep.mubr.msk.bf16.mxu1 %vm1005_vm1, %v1360_v1  ;;  %v1190_v5 = vmul.f32 1.442695, %v1130_v22 }
 0x3bd   :  { %4912 = vmatmul.mubr.msk.bf16.gmra.mxu1 %vm1005_vm1, %v1361_v38 }
 0x3be   :  { %4920 = vmatpush3.bf16.msra.mxu1 %v6200_v23  ;;  %5407 = vpow2.f32 %v1190_v5  ;;  %v1196_v23 = vmul.f32 1.442695, %v1133_v9 }
 0x3bf   :  { %4921 = vmatprep.subr.bf16.mxu1 %v6242_v53 }
 0x3c0   :  { %5409 = vpow2.f32 %v1196_v23 }
 0x3c1   :  { %5411 = vpow2.f32 %v1194_v19 }
 0x3c2   :  { %4922 = vmatpush3.bf16.msra.mxu1 %v6242_v53  ;;  %v1131_v53 = vsub.f32 %v6389_v31, %v6495_v15 }
 0x3c3   :  { %4947 = vmatprep.subr.bf16.mxu1 %v6206_v28 }
 0x3c4   :  { %v1192_v12 = vmul.f32 1.442695, %v1131_v53 }
 0x3c6   :  { %5413 = vpow2.f32 %v1192_v12 }
 0x3c7   :  { %638 = vrot.lane.b32.xlu0 %v6136_v47, %s5899_s29 }
 0x3cb   :  { %v6567_v41 = vpop.eup %5407 }
 0x3cc   :  { %v1282_v47 = vsel %vm1005_vm1, %v6567_v41, 0.0 }
 0x3cd   :  { %v6571_v34 = vpop.eup %5409 }
 0x3ce   :  { %v6573_v48 = vpop.eup %5411  ;;  %v1291_v33 = vsel %vm1005_vm1, %v6571_v34, 0.0 }
 0x3cf   :  { %v1288_v31 = vsel %vm1005_vm1, %v6573_v48, 0.0 }
 0x3d3   :  { %v6577_v26 = vpop.eup %5413 }
 0x3d4   :  { %v1285_v25 = vsel %vm1005_vm1, %v6577_v26, 0.0 }
 0x3de   :  { %1283 = vadd.xlane.f32.xlu1 %v1282_v47 }
 0x3e2   :  { %1292 = vadd.xlane.f32.xlu1 %v1291_v33 }
 0x3e6   :  { %1289 = vadd.xlane.f32.xlu0 %v1288_v31  ;;  %1286 = vadd.xlane.f32.xlu1 %v1285_v25 }
 0x3f7   :  { %636 = vrot.lane.b32.xlu1 %v6130_v40, %s5899_s29 }
 0x402   :  { %v1230_v8 = vpop.xlane.xlu1 %1229 }
 0x40a   :  { %v1254_v15 = vpop.xlane.xlu0 %1253 }
 0x40e   :  { %v1224_v21 = vpop.xlane.xlu1 %1223 }
 0x412   :  { %v1248_v54 = vpop.xlane.xlu0 %1247 }
 0x416   :  { %v1233_v27 = vpop.xlane.xlu0 %1232  ;;  %v1242_v18 = vpop.xlane.xlu1 %1241 }
 0x417   :  { %5415 = vrcp.f32 %v1233_v27 }
 0x418   :  { %5417 = vrcp.f32 %v1224_v21 }
 0x419   :  { %5419 = vrcp.f32 %v1230_v8 }
 0x41a   :  { %v1257_v17 = vpop.xlane.xlu0 %1256 }
 0x41e   :  { %v1227_v29 = vpop.xlane.xlu0 %1226  ;;  %v1236_v57 = vpop.xlane.xlu1 %1235 }
 0x41f   :  { %5421 = vrcp.f32 %v1227_v29 }
 0x420   :  { %5423 = vrcp.f32 %v1248_v54 }
 0x422   :  { %v1251_v10 = vpop.xlane.xlu0 %1250 }
 0x423   :  { %5425 = vrcp.f32 %v1251_v10 }
 0x424   :  { %5427 = vrcp.f32 %v1254_v15  ;;  %v5416_v59 = vpop.eup %5415 }
 0x425   :  { %5429 = vrcp.f32 %v1257_v17  ;;  %v5418_v51 = vpop.eup %5417  ;;  %v1337_v56 = vmul.f32 %v5416_v59, %v6453_v4 }
 0x426   :  { %v1260_v49 = vpop.xlane.xlu0 %1259  ;;  %v1263_v40 = vpop.xlane.xlu1 %1262  ;;  %v1334_v43 = vmul.f32 %v5418_v51, %v6445_v20 }
 0x427   :  { %5431 = vrcp.f32 %v1260_v49  ;;  %v5420_v42 = vpop.eup %5419 }
 0x428   :  { %5433 = vrcp.f32 %v1263_v40  ;;  %v1336_v22 = vmul.f32 %v5420_v42, %v6432_v7 }
 0x42a   :  { %v1245_v3 = vpop.xlane.xlu0 %1244  ;;  %v1272_v52 = vpop.xlane.xlu1 %1271  ;;  %v1363_v23 = vpack.c.bf16 %v1337_v56, %v1336_v22 }
 0x42b   :  { %5435 = vrcp.f32 %v1245_v3 }
 0x42c   :  { %v5422_v61 = vpop.eup %5421  ;;  %5437 = vrcp.f32 %v1236_v57 }
 0x42d   :  { %v5424_v60 = vpop.eup %5423  ;;  %5439 = vrcp.f32 %v1242_v18  ;;  %v1335_v38 = vmul.f32 %v5422_v61, %v6469_v35 }
 0x42e   :  { %v1239_v1 = vpop.xlane.xlu0 %1238  ;;  %v1266_v5 = vpop.xlane.xlu1 %1265  ;;  %v1342_v53 = vmul.f32 %v5424_v60, %v6451_v63 }
 0x42f   :  { %5441 = vrcp.f32 %v1239_v1  ;;  %v1362_v13 = vpack.c.bf16 %v1335_v38, %v1334_v43 }
 0x430   :  { %v5426_v9 = vpop.eup %5425  ;;  %5443 = vrcp.f32 %v1266_v5 }
 0x431   :  { %v1343_v19 = vmul.f32 %v5426_v9, %v6484_v36  ;;  %v5428_v4 = vpop.eup %5427  ;;  %4923 = vmatprep.mubr.msk.bf16.mxu1 %vm1005_vm1, %v1362_v13 }
 0x432   :  { %v1278_v12 = vpop.xlane.xlu0 %1277  ;;  %v5430_v47 = vpop.eup %5429  ;;  %4924 = vmatmul.mubr.msk.bf16.vlgmr.msra.gmra.mxu1 %vm1005_vm1, %v1363_v23  ;;  %v1344_v54 = vmul.f32 %v5428_v4, %v6439_v30 }
 0x433   :  { %v1269_v20 = vpop.xlane.xlu1 %1268  ;;  %v1366_v35 = vpack.c.bf16 %v1343_v19, %v1342_v53  ;;  %4948 = vmatpush3.bf16.msra.mxu1 %v6206_v28  ;;  %v1345_v63 = vmul.f32 %v5430_v47, %v6465_v24 }
 0x434   :  { %v5432_v7 = vpop.eup %5431  ;;  %5445 = vrcp.f32 %v1269_v20  ;;  %4949 = vmatprep.subr.bf16.mxu1 %v6306_v45 }
 0x435   :  { %v5434_v33 = vpop.eup %5433  ;;  %4939 = vmatprep.mubr.msk.bf16.mxu0 %vm1005_vm1, %v1366_v35  ;;  %v1346_v25 = vmul.f32 %v5432_v7, %v6493_v46  ;;  %5447 = vrcp.f32 %v1272_v52  ;;  %v1367_v17 = vpack.c.bf16 %v1345_v63, %v1344_v54 }
 0x436   :  { %v1281_v36 = vpop.xlane.xlu0 %1280  ;;  %v1347_v15 = vmul.f32 %v5434_v33, %v6499_v11 }
 0x437   :  { %v625_v31 = vpop.permute.xlu1 %624  ;;  %4950 = vmatpush3.bf16.msra.mxu1 %v6306_v45 }
 0x438   :  { %4937 = vmatprep.subr.bf16.mxu0 %v625_v31  ;;  %v5436_v27 = vpop.eup %5435  ;;  %v1368_v24 = vpack.c.bf16 %v1347_v15, %v1346_v25 }
 0x439   :  { %4938 = vmatpush3.bf16.msra.mxu0 %v625_v31  ;;  %v5438_v28 = vpop.eup %5437  ;;  %v1341_v46 = vmul.f32 %v5436_v27, %v6497_v16 }
 0x43a   :  { %v1275_v8 = vpop.xlane.xlu0 %1274  ;;  %v5440_v21 = vpop.eup %5439  ;;  %v1338_v30 = vmul.f32 %v5438_v28, %v6477_v62 }
 0x43b   :  { %5449 = vrcp.f32 %v1275_v8  ;;  %v1340_v18 = vmul.f32 %v5440_v21, %v6458_v14  ;;  %v5247_v21 = vld [vmem:[#allocation14 + $0x38] sm:$0xff]  }
 0x43c   :  { %v5442_v29 = vpop.eup %5441  ;;  %4940 = vmatmul.mubr.msk.bf16.vlgmr.msra.gmra.mxu0 %vm1005_vm1, %v1367_v17  ;;  %5451 = vrcp.f32 %v1281_v36  ;;  %4963 = vmatprep.subr.bf16.mxu0 %v5247_v21 }
 0x43d   :  { %4943 = vmatprep.mubr.msk.bf16.mxu0 %vm1005_vm1, %v1368_v24  ;;  %v1339_v45 = vmul.f32 %v5442_v29, %v6511_v37  ;;  %v5444_v10 = vpop.eup %5443  ;;  %v1365_v49 = vpack.c.bf16 %v1341_v46, %v1340_v18  ;;  %5453 = vrcp.f32 %v1278_v12  ;;  %v5248_v24 = vld [vmem:[#allocation14 + $0x30] sm:$0xff]   ;;  %4964 = vmatpush3.bf16.msra.mxu0 %v5247_v21  ;;  %v5250_v18 = vld [vmem:[#allocation14 + $0x20] sm:$0xff]  }
 0x43e   :  { %v639_v11 = vpop.permute.xlu0 %638  ;;  %v1348_v16 = vmul.f32 %v5444_v10, %v6513_v44  ;;  %4965 = vmatprep.subr.bf16.mxu0 %v5248_v24 }
 0x43f   :  { %4951 = vmatprep.subr.bf16.mxu1 %v639_v11  ;;  %v1364_v57 = vpack.c.bf16 %v1339_v45, %v1338_v30  ;;  %v5249_v30 = vld [vmem:[#allocation14 + $0x28] sm:$0xff]  }
 0x440   :  { %4952 = vmatpush3.bf16.msra.mxu1 %v639_v11 }
 0x441   :  { %v5446_v40 = vpop.eup %5445  ;;  %4927 = vmatprep.mubr.msk.bf16.mxu1 %vm1005_vm1, %v1364_v57  ;;  %4966 = vmatpush3.bf16.msra.mxu0 %v5248_v24 }
 0x442   :  { %4928 = vmatmul.mubr.msk.bf16.gmra.mxu1 %vm1005_vm1, %v1365_v49  ;;  %v1349_v59 = vmul.f32 %v5446_v40, %v6521_v32  ;;  %v5448_v3 = vpop.eup %5447  ;;  %4967 = vmatprep.subr.bf16.mxu0 %v5249_v30 }
 0x443   :  { %v1350_v14 = vmul.f32 %v5448_v3, %v6505_v58 }
 0x444   :  { %v1369_v62 = vpack.c.bf16 %v1349_v59, %v1348_v16  ;;  %v5251_v16 = vld [vmem:[#allocation14 + $0x18] sm:$0xff]   ;;  %v5252_v59 = vld [vmem:[#allocation14 + $0x10] sm:$0xff]  }
 0x445   :  { %4968 = vmatpush3.bf16.msra.mxu0 %v5249_v30 }
 0x446   :  { %4944 = vmatmul.mubr.msk.bf16.gmra.mxu0 %vm1005_vm1, %v1369_v62  ;;  %4969 = vmatprep.subr.bf16.mxu0 %v5250_v18  ;;  %v5253_v62 = vld [vmem:[#allocation14 + $0x8] sm:$0xff]  }
 0x448   :  { %v5450_v37 = vpop.eup %5449 }
 0x449   :  { %v1351_v51 = vmul.f32 %v5450_v37, %v6529_v6  ;;  %v5452_v32 = vpop.eup %5451  ;;  %4970 = vmatpush3.bf16.msra.mxu0 %v5250_v18 }
 0x44a   :  { %v5454_v60 = vpop.eup %5453  ;;  %v1353_v1 = vmul.f32 %v5452_v32, %v6525_v2  ;;  %4971 = vmatprep.subr.bf16.mxu0 %v5251_v16 }
 0x44b   :  { %v1370_v52 = vpack.c.bf16 %v1351_v51, %v1350_v14  ;;  %v1352_v6 = vmul.f32 %v5454_v60, %v6517_v55  ;;  %v5254_v51 = vld [vmem:[#allocation14] sm:$0xff]  }
 0x44d   :  { %4955 = vmatprep.mubr.msk.bf16.mxu1 %vm1005_vm1, %v1370_v52  ;;  %v1371_v38 = vpack.c.bf16 %v1353_v1, %v1352_v6  ;;  %4972 = vmatpush3.bf16.msra.mxu0 %v5251_v16 }
 0x44e   :  { %4973 = vmatprep.subr.bf16.mxu0 %v5252_v59 }
 0x451   :  { %4974 = vmatpush3.bf16.msra.mxu0 %v5252_v59  ;;  %v5642_v59 = vld [vmem:[#allocation2 + $0x18] sm:$0xff] }
 0x452   :  { %4975 = vmatprep.subr.bf16.mxu0 %v5253_v62 }
 0x455   :  { %4976 = vmatpush3.bf16.msra.mxu0 %v5253_v62 }
 0x456   :  { %4977 = vmatprep.subr.bf16.mxu0 %v5254_v51 }
 0x459   :  { %4978 = vmatpush3.bf16.msra.mxu0 %v5254_v51 }
 0x467   :  { %v1284_v42 = vpop.xlane.xlu1 %1283 }
 0x46b   :  { %v1293_v61 = vpop.xlane.xlu1 %1292 }
 0x46c   :  { %5455 = vrcp.f32 %v1293_v61 }
 0x46d   :  { %5457 = vrcp.f32 %v1284_v42 }
 0x46f   :  { %v1290_v44 = vpop.xlane.xlu0 %1289  ;;  %v1287_v56 = vpop.xlane.xlu1 %1286 }
 0x470   :  { %5459 = vrcp.f32 %v1290_v44 }
 0x471   :  { %5461 = vrcp.f32 %v1287_v56 }
 0x473   :  { %v637_v58 = vpop.permute.xlu1 %636 }
 0x474   :  { %4953 = vmatprep.subr.bf16.mxu1 %v637_v58 }
 0x475   :  { %v6617_v43 = vpop.f32.mrf.mxu1  ;;  %4954 = vmatpush3.bf16.msra.mxu1 %v637_v58 }
 0x477   :  { %v6619_v22 = vpop.f32.mrf.mxu1 }
 0x478   :  { %4956 = vmatmul.mubr.msk.bf16.vlgmr.msra.gmra.mxu1 %vm1005_vm1, %v1371_v38 }
 0x479   :  { %v6622_v5 = vpop.f32.mrf.mxu1  ;;  %v5456_v9 = vpop.eup %5455 }
 0x47a   :  { %v1683_v13 = vpack.c.bf16 %v6622_v5, %v6617_v43  ;;  %v5458_v23 = vpop.eup %5457  ;;  %v1357_v47 = vmul.f32 %v5456_v9, %v6571_v34 }
 0x47b   :  { %v6626_v2 = vpop.f32.mrf.mxu1  ;;  %v1354_v20 = vmul.f32 %v5458_v23, %v6567_v41 }
 0x47c   :  { %v1682_v55 = vpack.c.bf16 %v6626_v2, %v6619_v22 }
 0x47d   :  { %v5460_v53 = vpop.eup %5459  ;;  %v6630_v4 = vpop.f32.mrf.mxu1 }
 0x47e   :  { %v5462_v19 = vpop.eup %5461  ;;  %v1356_v12 = vmul.f32 %v5460_v53, %v6573_v48 }
 0x47f   :  { %v1355_v35 = vmul.f32 %v5462_v19, %v6577_v26  ;;  %v6636_v7 = vpop.f32.mrf.mxu1 }
 0x480   :  { %v1373_v33 = vpack.c.bf16 %v1357_v47, %v1356_v12 }
 0x481   :  { %v1372_v63 = vpack.c.bf16 %v1355_v35, %v1354_v20  ;;  %v6638_v36 = vpop.f32.mrf.mxu1 }
 0x482   :  { %v1685_v31 = vpack.c.bf16 %v6638_v36, %v6630_v4  ;;  %v5639_v4 = vld [vmem:[#allocation2] sm:$0xff] }
 0x483   :  { %4959 = vmatprep.mubr.msk.bf16.mxu1 %vm1005_vm1, %v1372_v63  ;;  %v6644_v48 = vpop.f32.mrf.mxu1 }
 0x484   :  { %4960 = vmatmul.mubr.msk.bf16.gmra.mxu1 %vm1005_vm1, %v1373_v33  ;;  %v1684_v22 = vpack.c.bf16 %v6644_v48, %v6636_v7 }
 0x4f2   :  { %v4925_v34 = vpop.f32.mrf.mxu1 }
 0x4f4   :  { %v1497_v25 = vpop.f32.mrf.mxu1 }
 0x4f6   :  { %v4926_v41 = vpop.f32.mrf.mxu1 }
 0x4f7   :  { %v1687_v15 = vpack.c.bf16 %v4926_v41, %v4925_v34 }
 0x4f8   :  { %v1500_v26 = vpop.f32.mrf.mxu1 }
 0x4f9   :  { %1704 = vrot.lane.b32.xlu1 %v1687_v15, %s5899_s29  ;;  %v1686_v54 = vpack.c.bf16 %v1500_v26, %v1497_v25 }
 0x4fc   :  { %v4941_v27 = vpop.f32.mrf.mxu0 }
 0x4fd   :  { %1702 = vrot.lane.b32.xlu1 %v1686_v54, %s5899_s29 }
 0x4fe   :  { %v1574_v28 = vpop.f32.mrf.mxu0 }
 0x500   :  { %v4942_v8 = vpop.f32.mrf.mxu0 }
 0x501   :  { %v1691_v17 = vpack.c.bf16 %v4942_v8, %v4941_v27 }
 0x502   :  { %v1577_v29 = vpop.f32.mrf.mxu0  ;;  %v4929_v3 = vpop.f32.mrf.mxu1 }
 0x503   :  { %v1690_v46 = vpack.c.bf16 %v1577_v29, %v1574_v28  ;;  %1716 = vrot.lane.b32.xlu1 %v1691_v17, %s5886_s28  ;;  %v4476_v29 = vld [vmem:[%s7581_s11] ss:$0 sm:$0xff] }
 0x504   :  { %v1513_v37 = vpop.f32.mrf.mxu1 }
 0x505   :  { %1714 = vrot.lane.b32.xlu0 %v1690_v46, %s5886_s28 }
 0x506   :  { %v4945_v45 = vpop.f32.mrf.mxu0  ;;  %v4930_v14 = vpop.f32.mrf.mxu1 }
 0x507   :  { %v1689_v53 = vpack.c.bf16 %v4930_v14, %v4929_v3 }
 0x508   :  { %v1590_v11 = vpop.f32.mrf.mxu0  ;;  %v1516_v52 = vpop.f32.mrf.mxu1 }
 0x509   :  { %v1688_v6 = vpack.c.bf16 %v1516_v52, %v1513_v37 }
 0x50a   :  { %v4946_v10 = vpop.f32.mrf.mxu0 }
 0x50b   :  { %v1693_v57 = vpack.c.bf16 %v4946_v10, %v4945_v45  ;;  %v5640_v10 = vld [vmem:[#allocation2 + $0x10] sm:$0xff] }
 0x50c   :  { %v1593_v49 = vpop.f32.mrf.mxu0 }
 0x50d   :  { %v1692_v40 = vpack.c.bf16 %v1593_v49, %v1590_v11 }
 0x50f   :  { %1718 = vrot.lane.b32.xlu0 %v1692_v40, %s5886_s28  ;;  %v5641_v40 = vld [vmem:[#allocation2 + $0x8] sm:$0xff] }
 0x538   :  { %v4957_v42 = vpop.f32.mrf.mxu1 }
 0x53a   :  { %v1651_v61 = vpop.f32.mrf.mxu1 }
 0x53c   :  { %v4958_v44 = vpop.f32.mrf.mxu1 }
 0x53d   :  { %v1695_v60 = vpack.c.bf16 %v4958_v44, %v4957_v42  ;;  %v5643_v42 = vld [vmem:[#allocation2 + $0x20] sm:$0xff] }
 0x53e   :  { %v1654_v32 = vpop.f32.mrf.mxu1 }
 0x53f   :  { %v1694_v56 = vpack.c.bf16 %v1654_v32, %v1651_v61 }
 0x541   :  { %1726 = vrot.lane.b32.xlu1 %v1694_v56, %s5898_s5  ;;  %v5644_v56 = vld [vmem:[#allocation2 + $0x30] sm:$0xff] }
 0x544   :  { %v4961_v1 = vpop.f32.mrf.mxu1 }
 0x545   :  { %1728 = vrot.lane.b32.xlu1 %v1695_v60, %s5898_s5 }
 0x546   :  { %v1667_v58 = vpop.f32.mrf.mxu1 }
 0x548   :  { %v4962_v38 = vpop.f32.mrf.mxu1 }
 0x549   :  { %1706 = vrot.lane.b32.xlu1 %v1688_v6, %s5899_s29  ;;  %v1697_v19 = vpack.c.bf16 %v4962_v38, %v4961_v1  ;;  %v5646_v38 = vld [vmem:[#allocation2 + $0x38] sm:$0xff] }
 0x54a   :  { %v1670_v9 = vpop.f32.mrf.mxu1 }
 0x54b   :  { %v1696_v23 = vpack.c.bf16 %v1670_v9, %v1667_v58  ;;  %v5645_v58 = vld [vmem:[#allocation2 + $0x28] sm:$0xff] }
 0x54d   :  { %1730 = vrot.lane.b32.xlu0 %v1696_v23, %s5898_s5  ;;  %1708 = vrot.lane.b32.xlu1 %v1689_v53, %s5899_s29  ;;  %v5255_v23 = vld [vmem:[#allocation13 + $0x70] ss:$8 sps:$4 sm:$0xff]   ;;  %v5257_v53 = vld [vmem:[#allocation13 + $0x74] ss:$8 sps:$4 sm:$0xff]  }
 0x54e   :  { %2286 = vmatprep.subr.bf16.mxu0 %v5257_v53 }
 0x551   :  { %1720 = vrot.lane.b32.xlu1 %v1693_v57, %s5886_s28 }
 0x555   :  { %1732 = vrot.lane.b32.xlu1 %v1697_v19, %s5898_s5  ;;  %v5260_v19 = vld [vmem:[#allocation13 + $0x64] ss:$8 sps:$4 sm:$0xff]  }
 0x56b   :  { %v1705_v12 = vpop.permute.xlu1 %1704 }
 0x56c   :  { %v1739_v41 = vsel %vm648_vm0, %v1683_v13, %v1705_v12  ;;  %v5258_v12 = vld [vmem:[#allocation13 + $0x60] ss:$8 sps:$4 sm:$0xff]  }
 0x56f   :  { %v1703_v47 = vpop.permute.xlu1 %1702 }
 0x570   :  { %v1736_v33 = vsel %vm648_vm0, %v1682_v55, %v1703_v47  ;;  %v5263_v47 = vld [vmem:[#allocation13 + $0x54] ss:$8 sps:$4 sm:$0xff]  }
 0x575   :  { %v1717_v20 = vpop.permute.xlu1 %1716 }
 0x576   :  { %v1749_v15 = vsel %vm1005_vm1, %v1739_v41, %v1717_v20  ;;  %v5261_v20 = vld [vmem:[#allocation13 + $0x50] ss:$8 sps:$4 sm:$0xff]   ;;  %v5270_v41 = vld [vmem:[#allocation13 + $0x20] ss:$8 sps:$4 sm:$0xff]  }
 0x577   :  { %v1715_v35 = vpop.permute.xlu0 %1714 }
 0x578   :  { %v1747_v63 = vsel %vm1005_vm1, %v1736_v33, %v1715_v35  ;;  %v5266_v35 = vld [vmem:[#allocation13 + $0x44] ss:$8 sps:$4 sm:$0xff]   ;;  %v5264_v33 = vld [vmem:[#allocation13 + $0x40] ss:$8 sps:$4 sm:$0xff]  }
 0x581   :  { %v1719_v2 = vpop.permute.xlu0 %1718 }
 0x5b3   :  { %v1727_v34 = vpop.permute.xlu1 %1726 }
 0x5b4   :  { %v1756_v25 = vsel %vm1754_vm2, %v1747_v63, %v1727_v34  ;;  %v5269_v63 = vld [vmem:[#allocation13 + $0x34] ss:$8 sps:$4 sm:$0xff]   ;;  %v5267_v34 = vld [vmem:[#allocation13 + $0x30] ss:$8 sps:$4 sm:$0xff]  }
 0x5b5   :  { %4979 = vmatprep.mubr.bf16.mxu0 %v1756_v25  ;;  %v5272_v25 = vld [vmem:[#allocation13 + $0x24] ss:$8 sps:$4 sm:$0xff]  }
 0x5b7   :  { %v1729_v26 = vpop.permute.xlu1 %1728 }
 0x5b8   :  { %v1759_v54 = vsel %vm1754_vm2, %v1749_v15, %v1729_v26  ;;  %v5275_v15 = vld [vmem:[#allocation13 + $0x14] ss:$8 sps:$4 sm:$0xff]   ;;  %v5273_v26 = vld [vmem:[#allocation13 + $0x10] ss:$8 sps:$4 sm:$0xff]  }
 0x5b9   :  { %4980 = vmatmul.mubr.bf16.vlgmr.msra.gmra.mxu0 %v1759_v54  ;;  %v5278_v54 = vld [vmem:[#allocation13 + $0x4] ss:$8 sps:$4 sm:$0xff]  }
 0x5ba   :  { %2287 = vmatpush1.bf16.msra.mxu0 %v5255_v23 }
 0x5bb   :  { %v1707_v55 = vpop.permute.xlu1 %1706  ;;  %2288 = vmatprep.subr.bf16.mxu0 %v5260_v19  ;;  %v5281_v19 = vld [vmem:[#allocation11 + $0x28] sm:$0xff]  }
 0x5bc   :  { %v1742_v27 = vsel %vm648_vm0, %v1684_v22, %v1707_v55  ;;  %v5276_v22 = vld [vmem:[#allocation13] ss:$8 sps:$4 sm:$0xff]  }
 0x5bd   :  { %v1751_v28 = vsel %vm1005_vm1, %v1742_v27, %v1719_v2  ;;  %v205_v2 = vld [vmem:[#allocation5] sm:$0xff]  ;;  %v206_v55 = vld [vmem:[#allocation5 + $0x8] sm:$0xff] }
 0x5be   :  { %2289 = vmatpush1.bf16.msra.mxu0 %v5258_v12  ;;  %v2174_v27 = vpack.c.bf16 %v206_v55, %v205_v2 }
 0x5bf   :  { %v1731_v8 = vpop.permute.xlu0 %1730  ;;  %v1709_v17 = vpop.permute.xlu1 %1708  ;;  %2290 = vmatprep.subr.bf16.mxu0 %v5263_v47  ;;  %v5283_v47 = vld [vmem:[#allocation11 + $0x18] sm:$0xff]  }
 0x5c0   :  { %v1762_v43 = vsel %vm1754_vm2, %v1751_v28, %v1731_v8  ;;  %v1745_v13 = vsel %vm648_vm0, %v1685_v31, %v1709_v17  ;;  %v207_v28 = vld [vmem:[#allocation5 + $0x10] sm:$0xff]  ;;  %v208_v8 = vld [vmem:[#allocation5 + $0x18] sm:$0xff] }
 0x5c1   :  { %4983 = vmatprep.mubr.bf16.mxu0 %v1762_v43  ;;  %v2175_v17 = vpack.c.bf16 %v208_v8, %v207_v28  ;;  %v209_v43 = vld [vmem:[#allocation5 + $0x20] sm:$0xff] }
 0x5c2   :  { %2291 = vmatpush1.bf16.msra.mxu0 %v5261_v20  ;;  %v5284_v20 = vld [vmem:[#allocation11 + $0x10] sm:$0xff]  }
 0x5c3   :  { %v1721_v5 = vpop.permute.xlu1 %1720  ;;  %2292 = vmatprep.subr.bf16.mxu0 %v5266_v35  ;;  %v5285_v35 = vld [vmem:[#allocation11 + $0x8] sm:$0xff]  }
 0x5c4   :  { %v1753_v21 = vsel %vm1005_vm1, %v1745_v13, %v1721_v5  ;;  %v210_v5 = vld [vmem:[#allocation5 + $0x28] sm:$0xff] }
 0x5c5   :  { %v2176_v13 = vpack.c.bf16 %v210_v5, %v209_v43 }
 0x5c6   :  { %2293 = vmatpush1.bf16.msra.mxu0 %v5264_v33  ;;  %v2194_v33 = vld [vmem:[%s7579_s9] sm:$0x3] }
 0x5c7   :  { %v1733_v7 = vpop.permute.xlu1 %1732  ;;  %2294 = vmatprep.subr.bf16.mxu0 %v5269_v63  ;;  %v2203_v63 = vrot.slane %v2194_v33, %v6076_v50 }
 0x5c8   :  { %v1765_v48 = vsel %vm1754_vm2, %v1753_v21, %v1733_v7  ;;  %v211_v21 = vld [vmem:[#allocation5 + $0x30] sm:$0xff]  ;;  %v212_v7 = vld [vmem:[#allocation5 + $0x38] sm:$0xff] }
 0x5c9   :  { %4984 = vmatmul.mubr.bf16.gmra.mxu0 %v1765_v48  ;;  %v2177_v48 = vpack.c.bf16 %v212_v7, %v211_v21  ;;  %v2199_v21 = vrot.slane %v2194_v33, %v6060_v39 }
 0x5ca   :  { %2318 = vmatprep.mubr.bf16.mxu0 %v7589_v0  ;;  %2295 = vmatpush1.bf16.msra.mxu0 %v5267_v34 }
 0x5cb   :  { %2296 = vmatprep.subr.bf16.mxu0 %v5272_v25 }
 0x5ce   :  { %2297 = vmatpush1.bf16.msra.mxu0 %v5270_v41 }
 0x5cf   :  { %2298 = vmatprep.subr.bf16.mxu0 %v5275_v15 }
 0x5d2   :  { %2299 = vmatpush1.bf16.msra.mxu0 %v5273_v26 }
 0x5d3   :  { %2300 = vmatprep.subr.bf16.mxu0 %v5278_v54 }
 0x5d6   :  { %2301 = vmatpush1.bf16.msra.mxu0 %v5276_v22 }
 0x5d9   :  { %2319 = vmatmul.mubr.bf16.vlgmr.msra.gmra.mxu0 %v2174_v27 }
 0x5da   :  { %2328 = vmatprep.mubr.bf16.mxu0 %v7589_v0 }
 0x5e1   :  { %2329 = vmatmul.mubr.bf16.gmra.mxu0 %v2175_v17 }
 0x5e2   :  { %2338 = vmatprep.mubr.bf16.mxu0 %v7589_v0 }
 0x5e9   :  { %2339 = vmatmul.mubr.bf16.gmra.mxu0 %v2176_v13 }
 0x5ea   :  { %2348 = vmatprep.mubr.bf16.mxu0 %v7589_v0 }
 0x5f1   :  { %2349 = vmatmul.mubr.bf16.gmra.mxu0 %v2177_v48 }
 0x679   :  { %v4981_v24 = vpop.f32.mrf.mxu0 }
 0x67a   :  { %v1881_v11 = vadd.f32 %v4981_v24, %v4476_v29 }
 0x67b   :  { %v1872_v46 = vpop.f32.mrf.mxu0 }
 0x67c   :  { %v1873_v30 = vadd.f32 %v4476_v29, %v1872_v46  ;;  %v6688_v57 = vadd.f32 %v5640_v10, %v1881_v11 }
 0x67d   :  { %v4982_v45 = vpop.f32.mrf.mxu0 }
 0x67e   :  { %v6685_v36 = vadd.f32 %v5639_v4, %v1873_v30  ;;  %v1884_v49 = vadd.f32 %v4982_v45, %v4476_v29 }
 0x67f   :  { %v1875_v31 = vpop.f32.mrf.mxu0 }
 0x680   :  { %v1876_v18 = vadd.f32 %v4476_v29, %v1875_v31  ;;  %1913 = vadd.xlane.f32.xlu0 %v6685_v36  ;;  %v6694_v62 = vadd.f32 %v5642_v59, %v1884_v49 }
 0x682   :  { %v6690_v16 = vadd.f32 %v5641_v40, %v1876_v18 }
 0x684   :  { %1915 = vadd.xlane.f32.xlu1 %v6690_v16  ;;  %1917 = vadd.xlane.f32.xlu0 %v6688_v57 }
 0x688   :  { %1919 = vadd.xlane.f32.xlu0 %v6694_v62 }
 0x689   :  { %v4985_v3 = vpop.f32.mrf.mxu0 }
 0x68a   :  { %v1897_v52 = vadd.f32 %v4985_v3, %v4476_v29 }
 0x68b   :  { %v1888_v37 = vpop.f32.mrf.mxu0 }
 0x68c   :  { %v1889_v14 = vadd.f32 %v4476_v29, %v1888_v37  ;;  %v6700_v60 = vadd.f32 %v5644_v56, %v1897_v52  ;;  %v5280_v56 = vld [vmem:[#allocation11 + $0x30] sm:$0xff]  }
 0x68d   :  { %v4986_v51 = vpop.f32.mrf.mxu0 }
 0x68e   :  { %v6697_v61 = vadd.f32 %v5643_v42, %v1889_v14  ;;  %v1900_v1 = vadd.f32 %v4986_v51, %v4476_v29  ;;  %v5279_v14 = vld [vmem:[#allocation11 + $0x38] sm:$0xff]  }
 0x68f   :  { %v1891_v44 = vpop.f32.mrf.mxu0  ;;  %4987 = vmatprep.subr.bf16.mxu1 %v5279_v14 }
 0x690   :  { %v1892_v32 = vadd.f32 %v4476_v29, %v1891_v44  ;;  %1921 = vadd.xlane.f32.xlu1 %v6697_v61  ;;  %v6706_v9 = vadd.f32 %v5646_v38, %v1900_v1  ;;  %4988 = vmatpush3.bf16.msra.mxu1 %v5279_v14 }
 0x691   :  { %4989 = vmatprep.subr.bf16.mxu1 %v5280_v56 }
 0x692   :  { %v6702_v6 = vadd.f32 %v5645_v58, %v1892_v32 }
 0x694   :  { %1923 = vadd.xlane.f32.xlu0 %v6702_v6  ;;  %1925 = vadd.xlane.f32.xlu1 %v6700_v60 }
 0x695   :  { %4990 = vmatpush3.bf16.msra.mxu1 %v5280_v56 }
 0x696   :  { %4991 = vmatprep.subr.bf16.mxu1 %v5281_v19 }
 0x698   :  { %1927 = vadd.xlane.f32.xlu0 %v6706_v9 }
 0x699   :  { %4992 = vmatpush3.bf16.msra.mxu1 %v5281_v19  ;;  %v2320_v34 = vpop.f32.mrf.mxu0 }
 0x69b   :  { %v2322_v25 = vpop.f32.mrf.mxu0 }
 0x69c   :  { %v2323_v41 = vadd.f32 %v2322_v25, %v2203_v63 }
 0x69d   :  { %v2324_v15 = vpop.f32.mrf.mxu0 }
 0x69e   :  { %v2325_v25 = vadd.f32 %v2324_v15, %v2199_v21  ;;  %v4485_v15 = vld [vmem:[%s7586_s16] ss:$0 sm:$0xff] }
 0x69f   :  { %v2326_v26 = vpop.f32.mrf.mxu0 }
 0x6a0   :  { %v2327_v54 = vadd.f32 %v2326_v26, %v2203_v63 }
 0x6a1   :  { %v2330_v22 = vpop.f32.mrf.mxu0 }
 0x6a2   :  { %v6756_v2 = vpack.c.bf16 %v2327_v54, %v2323_v41 }
 0x6a3   :  { %v2332_v55 = vpop.f32.mrf.mxu0 }
 0x6a4   :  { %v2333_v27 = vadd.f32 %v2332_v55, %v2203_v63 }
 0x6a5   :  { %v2334_v28 = vpop.f32.mrf.mxu0 }
 0x6a7   :  { %v2336_v8 = vpop.f32.mrf.mxu0 }
 0x6a8   :  { %v2337_v43 = vadd.f32 %v2336_v8, %v2203_v63 }
 0x6a9   :  { %v2340_v13 = vpop.f32.mrf.mxu0 }
 0x6aa   :  { %v6759_v7 = vpack.c.bf16 %v2337_v43, %v2333_v27 }
 0x709   :  { %v1914_v24 = vpop.xlane.xlu0 %1913 }
 0x70a   :  { %v1930_v29 = vmul.f32 0.0078125, %v1914_v24  ;;  %v2342_v24 = vpop.f32.mrf.mxu0 }
 0x70c   :  { %v6713_v46 = vsub.f32 %v6685_v36, %v1930_v29 }
 0x70d   :  { %v1916_v30 = vpop.xlane.xlu1 %1915  ;;  %v1918_v45 = vpop.xlane.xlu0 %1917 }
 0x70e   :  { %v1931_v11 = vmul.f32 0.0078125, %v1916_v30  ;;  %v1932_v4 = vmul.f32 0.0078125, %v1918_v45  ;;  %v1946_v31 = vmul.f32 %v6713_v46, %v6713_v46  ;;  %v2341_v45 = vadd.f32 %v2340_v13, %v2199_v21 }
 0x710   :  { %v6718_v18 = vsub.f32 %v6690_v16, %v1931_v11  ;;  %v6721_v10 = vsub.f32 %v6688_v57, %v1932_v4  ;;  %1954 = vadd.xlane.f32.xlu1 %v1946_v31  ;;  %v2343_v11 = vadd.f32 %v2342_v24, %v2203_v63 }
 0x711   :  { %v1920_v49 = vpop.xlane.xlu0 %1919 }
 0x712   :  { %v1933_v40 = vmul.f32 0.0078125, %v1920_v49  ;;  %v1947_v36 = vmul.f32 %v6718_v18, %v6718_v18  ;;  %v1948_v59 = vmul.f32 %v6721_v10, %v6721_v10  ;;  %v2344_v49 = vpop.f32.mrf.mxu0 }
 0x714   :  { %v6728_v3 = vsub.f32 %v6694_v62, %v1933_v40  ;;  %1956 = vadd.xlane.f32.xlu0 %v1947_v36  ;;  %1958 = vadd.xlane.f32.xlu1 %v1948_v59  ;;  %v2345_v40 = vadd.f32 %v2344_v49, %v2199_v21 }
 0x716   :  { %v1949_v16 = vmul.f32 %v6728_v3, %v6728_v3 }
 0x718   :  { %1960 = vadd.xlane.f32.xlu0 %v1949_v16  ;;  %v2346_v16 = vpop.f32.mrf.mxu0 }
 0x719   :  { %v1922_v57 = vpop.xlane.xlu1 %1921  ;;  %v2347_v14 = vadd.f32 %v2346_v16, %v2203_v63 }
 0x71a   :  { %v1934_v37 = vmul.f32 0.0078125, %v1922_v57 }
 0x71c   :  { %v6733_v51 = vsub.f32 %v6697_v61, %v1934_v37  ;;  %v6761_v37 = vpack.c.bf16 %v2345_v40, %v2341_v45 }
 0x71d   :  { %v1926_v52 = vpop.xlane.xlu1 %1925  ;;  %v1924_v42 = vpop.xlane.xlu0 %1923 }
 0x71e   :  { %v1936_v44 = vmul.f32 0.0078125, %v1926_v52  ;;  %v1935_v32 = vmul.f32 0.0078125, %v1924_v42  ;;  %v1950_v62 = vmul.f32 %v6733_v51, %v6733_v51  ;;  %v2350_v42 = vpop.f32.mrf.mxu0 }
 0x71f   :  { %v2351_v56 = vadd.f32 %v2350_v42, %v2199_v21 }
 0x720   :  { %v6738_v1 = vsub.f32 %v6700_v60, %v1936_v44  ;;  %v6741_v58 = vsub.f32 %v6702_v6, %v1935_v32  ;;  %1962 = vadd.xlane.f32.xlu1 %v1950_v62  ;;  %v5282_v6 = vld [vmem:[#allocation11 + $0x20] sm:$0xff]   ;;  %v6763_v44 = vpack.c.bf16 %v2347_v14, %v2343_v11  ;;  %v2352_v62 = vpop.f32.mrf.mxu0 }
 0x721   :  { %v1928_v38 = vpop.xlane.xlu0 %1927  ;;  %4993 = vmatprep.subr.bf16.mxu1 %v5282_v6 }
 0x722   :  { %v1937_v61 = vmul.f32 0.0078125, %v1928_v38  ;;  %v1952_v23 = vmul.f32 %v6738_v1, %v6738_v1  ;;  %v1951_v53 = vmul.f32 %v6741_v58, %v6741_v58  ;;  %4994 = vmatpush3.bf16.msra.mxu1 %v5282_v6  ;;  %v2353_v38 = vadd.f32 %v2352_v62, %v2203_v63 }
 0x723   :  { %4995 = vmatprep.subr.bf16.mxu1 %v5283_v47 }
 0x724   :  { %v6748_v12 = vsub.f32 %v6706_v9, %v1937_v61  ;;  %1966 = vadd.xlane.f32.xlu1 %v1952_v23  ;;  %1964 = vadd.xlane.f32.xlu0 %v1951_v53  ;;  %v5286_v9 = vld [vmem:[#allocation11] sm:$0xff]   ;;  %v2354_v61 = vpop.f32.mrf.mxu0  ;;  %v2331_v23 = vadd.f32 %v2330_v22, %v2199_v21  ;;  %v2335_v53 = vadd.f32 %v2334_v28, %v2199_v21 }
 0x725   :  { %v2355_v19 = vadd.f32 %v2354_v61, %v2199_v21 }
 0x726   :  { %v1953_v60 = vmul.f32 %v6748_v12, %v6748_v12  ;;  %4996 = vmatpush3.bf16.msra.mxu1 %v5283_v47  ;;  %v6767_v41 = vpack.c.bf16 %v2335_v53, %v2331_v23 }
 0x727   :  { %4997 = vmatprep.subr.bf16.mxu1 %v5284_v20  ;;  %v2365_v47 = vpack.c.bf16 %v2355_v19, %v2351_v56 }
 0x728   :  { %1968 = vadd.xlane.f32.xlu0 %v1953_v60  ;;  %v2356_v60 = vpop.f32.mrf.mxu0 }
 0x729   :  { %v2493_v16 = vsel %vm648_vm0, %v2365_v47, 0 }
 0x72a   :  { %4998 = vmatpush3.bf16.msra.mxu1 %v5284_v20  ;;  %v2357_v20 = vadd.f32 %v2356_v60, %v2203_v63 }
 0x72b   :  { %4999 = vmatprep.subr.bf16.mxu1 %v5285_v35 }
 0x72c   :  { %v6771_v26 = vpack.c.bf16 %v2357_v20, %v2353_v38  ;;  %v2490_v38 = vsel %vm648_vm0, %v6761_v37, 0  ;;  %v2487_v20 = vsel %vm648_vm0, %v6767_v41, 0 }
 0x72e   :  { %5000 = vmatpush3.bf16.msra.mxu1 %v5285_v35 }
 0x72f   :  { %5001 = vmatprep.subr.bf16.mxu1 %v5286_v9 }
 0x732   :  { %5002 = vmatpush3.bf16.msra.mxu1 %v5286_v9  ;;  %v2321_v9 = vadd.f32 %v2320_v34, %v2199_v21 }
 0x733   :  { %5179 = vmatprep.subr.msk.bf16.mxu1 %vm648_vm0, %v2365_v47 }
 0x734   :  { %v6778_v8 = vpack.c.bf16 %v2325_v25, %v2321_v9 }
 0x735   :  { %2413 = vrot.lane.b32.xlu1 %v2365_v47, %s5898_s5 }
 0x739   :  { %2409 = vrot.lane.b32.xlu1 %v6767_v41, %s5898_s5 }
 0x73d   :  { %2407 = vrot.lane.b32.xlu1 %v6778_v8, %s5898_s5 }
 0x73e   :  { %2411 = vrot.lane.b32.xlu0 %v6761_v37, %s5898_s5 }
 0x742   :  { %2421 = vrot.lane.b32.xlu0 %v2365_v47, %s5886_s28 }
 0x746   :  { %2429 = vrot.lane.b32.xlu0 %v2365_v47, %s5899_s29 }
 0x74a   :  { %2419 = vrot.lane.b32.xlu0 %v6761_v37, %s5886_s28 }
 0x74e   :  { %2417 = vrot.lane.b32.xlu0 %v6767_v41, %s5886_s28 }
 0x799   :  { %v1955_v17 = vpop.xlane.xlu1 %1954 }
 0x79a   :  { %v1970_v5 = vmul.f32 0.0078125, %v1955_v17 }
 0x79c   :  { %v1978_v48 = vadd.f32 1e-05, %v1970_v5 }
 0x79d   :  { %v1959_v29 = vpop.xlane.xlu1 %1958  ;;  %v1957_v30 = vpop.xlane.xlu0 %1956 }
 0x79e   :  { %5463 = vrsqrt.f32 %v1978_v48  ;;  %v1972_v4 = vmul.f32 0.0078125, %v1959_v29  ;;  %v1971_v31 = vmul.f32 0.0078125, %v1957_v30  ;;  %v4486_v29 = vld [vmem:[%s7587_s17] ss:$0 sm:$0xff] }
 0x7a0   :  { %v1980_v36 = vadd.f32 1e-05, %v1972_v4  ;;  %v1979_v59 = vadd.f32 1e-05, %v1971_v31 }
 0x7a1   :  { %v1961_v57 = vpop.xlane.xlu0 %1960 }
 0x7a2   :  { %5465 = vrsqrt.f32 %v1980_v36  ;;  %v1973_v52 = vmul.f32 0.0078125, %v1961_v57 }
 0x7a3   :  { %5467 = vrsqrt.f32 %v1979_v59 }
 0x7a4   :  { %v1981_v32 = vadd.f32 1e-05, %v1973_v52 }
 0x7a6   :  { %5469 = vrsqrt.f32 %v1981_v32 }
 0x7a9   :  { %v1963_v6 = vpop.xlane.xlu1 %1962 }
 0x7aa   :  { %v1974_v35 = vmul.f32 0.0078125, %v1963_v6 }
 0x7ab   :  { %v5464_v33 = vpop.eup %5463 }
 0x7ac   :  { %v1982_v54 = vadd.f32 1e-05, %v1974_v35  ;;  %v1994_v27 = vmul.f32 %v5464_v33, %v6713_v46  ;;  %v2484_v35 = vsel %vm648_vm0, %v6778_v8, 0 }
 0x7ad   :  { %v1967_v22 = vpop.xlane.xlu1 %1966  ;;  %v1965_v55 = vpop.xlane.xlu0 %1964 }
 0x7ae   :  { %5471 = vrsqrt.f32 %v1982_v54  ;;  %v1976_v63 = vmul.f32 0.0078125, %v1967_v22  ;;  %v1975_v34 = vmul.f32 0.0078125, %v1965_v55  ;;  %v2008_v48 = vmul.f32 %v4485_v15, %v1994_v27 }
 0x7af   :  { %v5466_v28 = vpop.eup %5465 }
 0x7b0   :  { %v5468_v17 = vpop.eup %5467  ;;  %v1996_v43 = vmul.f32 %v5466_v28, %v6721_v10  ;;  %v1984_v5 = vadd.f32 1e-05, %v1976_v63  ;;  %v1983_v13 = vadd.f32 1e-05, %v1975_v34 }
 0x7b1   :  { %v1969_v46 = vpop.xlane.xlu0 %1968  ;;  %v1995_v21 = vmul.f32 %v5468_v17, %v6718_v18  ;;  %v6793_v18 = vadd.f32 %v4486_v29, %v2008_v48  ;;  %v2414_v9 = vpop.permute.xlu1 %2413 }
 0x7b2   :  { %5473 = vrsqrt.f32 %v1984_v5  ;;  %v1977_v24 = vmul.f32 0.0078125, %v1969_v46  ;;  %v2010_v4 = vmul.f32 %v4485_v15, %v1996_v43  ;;  %5183 = vmatprep.subr.msk.bf16.mxu0 %vm648_vm0, %v2414_v9  ;;  %v2582_v33 = vsel %vm648_vm0, %v2414_v9, 0  ;;  %v4487_v5 = vld [vmem:[%s7577_s7] ss:$0 sm:$0xff] }
 0x7b3   :  { %v5470_v30 = vpop.eup %5469  ;;  %5475 = vrsqrt.f32 %v1983_v13  ;;  %v2009_v45 = vmul.f32 %v4485_v15, %v1995_v21  ;;  %5028 = vmatpush3.bf16.xpose.msra.mxu0 %v2582_v33 }
 0x7b4   :  { %v1997_v10 = vmul.f32 %v5470_v30, %v6728_v3  ;;  %v1985_v11 = vadd.f32 1e-05, %v1977_v24  ;;  %v6799_v36 = vadd.f32 %v4486_v29, %v2010_v4 }
 0x7b5   :  { %v6795_v31 = vadd.f32 %v4486_v29, %v2009_v45  ;;  %v2412_v25 = vpop.permute.xlu0 %2411  ;;  %v2410_v22 = vpop.permute.xlu1 %2409 }
 0x7b6   :  { %5477 = vrsqrt.f32 %v1985_v11  ;;  %v2011_v49 = vmul.f32 %v4485_v15, %v1997_v10  ;;  %5184 = vmatprep.subr.msk.bf16.mxu0 %vm648_vm0, %v2412_v25  ;;  %v2579_v54 = vsel %vm648_vm0, %v2412_v25, 0  ;;  %v2576_v27 = vsel %vm648_vm0, %v2410_v22, 0 }
 0x7b7   :  { %v2030_v40 = vpack.c.bf16 %v6795_v31, %v6793_v18 }
 0x7b8   :  { %v6801_v59 = vadd.f32 %v4486_v29, %v2011_v49 }
 0x7b9   :  { %5003 = vmatprep.mubr.bf16.mxu1 %v2030_v40  ;;  %v2422_v55 = vpop.permute.xlu0 %2421  ;;  %v2408_v63 = vpop.permute.xlu1 %2407 }
 0x7ba   :  { %v2031_v3 = vpack.c.bf16 %v6801_v59, %v6799_v36  ;;  %v2573_v34 = vsel %vm648_vm0, %v2408_v63, 0  ;;  %v2671_v45 = vsel %vm648_vm0, %v2422_v55, 0 }
 0x7bb   :  { %v5472_v57 = vpop.eup %5471  ;;  %5030 = vmatpush3.bf16.xpose.msra.mxu0 %v2579_v54 }
 0x7bc   :  { %5004 = vmatmul.mubr.bf16.vlgmr.msra.gmra.mxu1 %v2031_v3  ;;  %v1998_v14 = vmul.f32 %v5472_v57, %v6733_v51  ;;  %5185 = vmatprep.subr.msk.bf16.mxu0 %vm648_vm0, %v2410_v22 }
 0x7bd   :  { %5012 = vmatpush3.bf16.xpose.msra.mxu1 %v2493_v16 }
 0x7be   :  { %5180 = vmatprep.subr.msk.bf16.mxu1 %vm648_vm0, %v6761_v37  ;;  %v2012_v56 = vmul.f32 %v4485_v15, %v1998_v14 }
 0x7bf   :  { %v5474_v52 = vpop.eup %5473 }
 0x7c0   :  { %v5476_v42 = vpop.eup %5475  ;;  %v2000_v32 = vmul.f32 %v5474_v52, %v6738_v1  ;;  %v6816_v51 = vadd.f32 %v4486_v29, %v2012_v56 }
 0x7c1   :  { %v1999_v62 = vmul.f32 %v5476_v42, %v6741_v58 }
 0x7c2   :  { %v2014_v19 = vmul.f32 %v4485_v15, %v2000_v32 }
 0x7c3   :  { %v5478_v61 = vpop.eup %5477  ;;  %v2013_v23 = vmul.f32 %v4485_v15, %v1999_v62  ;;  %5032 = vmatpush3.bf16.xpose.msra.mxu0 %v2576_v27 }
 0x7c4   :  { %v2001_v53 = vmul.f32 %v5478_v61, %v6748_v12  ;;  %v6824_v58 = vadd.f32 %v4486_v29, %v2014_v19  ;;  %5186 = vmatprep.subr.msk.bf16.mxu0 %vm648_vm0, %v2408_v63 }
 0x7c5   :  { %v6818_v60 = vadd.f32 %v4486_v29, %v2013_v23  ;;  %5014 = vmatpush3.bf16.xpose.msra.mxu1 %v2490_v38 }
 0x7c6   :  { %v2015_v6 = vmul.f32 %v4485_v15, %v2001_v53  ;;  %5181 = vmatprep.subr.msk.bf16.mxu1 %vm648_vm0, %v6767_v41  ;;  %v6845_v15 = vpop.permute.xlu0 %2429 }
 0x7c7   :  { %v2032_v1 = vpack.c.bf16 %v6818_v60, %v6816_v51 }
 0x7c8   :  { %v6826_v47 = vadd.f32 %v4486_v29, %v2015_v6 }
 0x7c9   :  { %5007 = vmatprep.mubr.bf16.mxu1 %v2032_v1 }
 0x7ca   :  { %v2033_v12 = vpack.c.bf16 %v6826_v47, %v6824_v58  ;;  %v2420_v10 = vpop.permute.xlu0 %2419 }
 0x7cb   :  { %5034 = vmatpush3.bf16.xpose.msra.mxu0 %v2573_v34  ;;  %v2668_v49 = vsel %vm648_vm0, %v2420_v10, 0 }
 0x7cc   :  { %5008 = vmatmul.mubr.bf16.gmra.mxu1 %v2033_v12  ;;  %5191 = vmatprep.subr.msk.bf16.mxu0 %vm648_vm0, %v6845_v15 }
 0x7cd   :  { %5016 = vmatpush3.bf16.xpose.msra.mxu1 %v2487_v20 }
 0x7ce   :  { %5182 = vmatprep.subr.msk.bf16.mxu1 %vm648_vm0, %v6778_v8  ;;  %v2418_v40 = vpop.permute.xlu0 %2417 }
 0x7cf   :  { %v2665_v56 = vsel %vm648_vm0, %v2418_v40, 0 }
 0x7d5   :  { %5018 = vmatpush3.bf16.xpose.msra.mxu1 %v2484_v35 }
 0x7d6   :  { %5187 = vmatprep.subr.msk.bf16.mxu1 %vm648_vm0, %v2422_v55 }
 0x87c   :  { %v5005_v28 = vpop.f32.mrf.mxu1 }
 0x87d   :  { %v2148_v24 = vadd.f32 %v5005_v28, %v4487_v5 }
 0x87e   :  { %v2139_v17 = vpop.f32.mrf.mxu1 }
 0x87f   :  { %v2140_v21 = vadd.f32 %v4487_v5, %v2139_v17 }
 0x880   :  { %v5006_v43 = vpop.f32.mrf.mxu1 }
 0x881   :  { %v2151_v13 = vadd.f32 %v5006_v43, %v4487_v5  ;;  %v6936_v43 = vld [vmem:[#allocation8 + $0x10] sm:$0xff] }
 0x882   :  { %v2142_v46 = vpop.f32.mrf.mxu1 }
 0x883   :  { %v2143_v48 = vadd.f32 %v4487_v5, %v2142_v46  ;;  %v2171_v30 = vpack.c.bf16 %v2151_v13, %v2148_v24  ;;  %v6938_v13 = vld [vmem:[#allocation8] sm:$0xff] }
 0x885   :  { %v2170_v29 = vpack.c.bf16 %v2143_v48, %v2140_v21 }
 0x887   :  { %2379 = vrot.lane.b32.xlu1 %v2170_v29, %s5898_s5  ;;  %5019 = vmatprep.mubr.msk.bf16.mxu1 %vm648_vm0, %v2170_v29 }
 0x888   :  { %5020 = vmatmul.mubr.msk.bf16.vlgmr.msra.gmra.mxu1 %vm648_vm0, %v2171_v30 }
 0x889   :  { %5044 = vmatpush3.bf16.xpose.msra.mxu1 %v2671_v45  ;;  %v6950_v45 = vld [vmem:[#allocation8 + $0x8] sm:$0xff] }
 0x88a   :  { %5188 = vmatprep.subr.msk.bf16.mxu1 %vm648_vm0, %v2420_v10 }
 0x88b   :  { %2381 = vrot.lane.b32.xlu1 %v2171_v30, %s5898_s5 }
 0x88c   :  { %v5009_v11 = vpop.f32.mrf.mxu1 }
 0x88d   :  { %v2164_v16 = vadd.f32 %v5009_v11, %v4487_v5 }
 0x88e   :  { %v2155_v4 = vpop.f32.mrf.mxu1 }
 0x88f   :  { %2427 = vrot.lane.b32.xlu1 %v6761_v37, %s5899_s29  ;;  %v2156_v52 = vadd.f32 %v4487_v5, %v2155_v4 }
 0x890   :  { %v5010_v3 = vpop.f32.mrf.mxu1 }
 0x891   :  { %v2167_v57 = vadd.f32 %v5010_v3, %v4487_v5  ;;  %5046 = vmatpush3.bf16.xpose.msra.mxu1 %v2668_v49 }
 0x892   :  { %v2158_v14 = vpop.f32.mrf.mxu1  ;;  %5189 = vmatprep.subr.msk.bf16.mxu1 %vm648_vm0, %v2418_v40 }
 0x893   :  { %v2173_v42 = vpack.c.bf16 %v2167_v57, %v2164_v16  ;;  %v2159_v32 = vadd.f32 %v4487_v5, %v2158_v14  ;;  %2425 = vrot.lane.b32.xlu1 %v6767_v41, %s5899_s29  ;;  %v6964_v16 = vld [vmem:[#allocation8 + $0x30] sm:$0xff]  ;;  %v6966_v14 = vld [vmem:[#allocation8 + $0x20] sm:$0xff] }
 0x895   :  { %v2172_v62 = vpack.c.bf16 %v2159_v32, %v2156_v52  ;;  %2385 = vrot.lane.b32.xlu0 %v2173_v42, %s5898_s5  ;;  %v6971_v32 = vld [vmem:[#allocation8 + $0x38] sm:$0xff] }
 0x897   :  { %2415 = vrot.lane.b32.xlu1 %v6778_v8, %s5886_s28  ;;  %5023 = vmatprep.mubr.msk.bf16.mxu1 %vm648_vm0, %v2172_v62 }
 0x898   :  { %5024 = vmatmul.mubr.msk.bf16.gmra.mxu1 %vm648_vm0, %v2173_v42 }
 0x899   :  { %2383 = vrot.lane.b32.xlu0 %v2172_v62, %s5898_s5  ;;  %5048 = vmatpush3.bf16.xpose.msra.mxu1 %v2665_v56 }
 0x89b   :  { %2423 = vrot.lane.b32.xlu1 %v6778_v8, %s5899_s29  ;;  %v2760_v8 = vsel %vm648_vm0, %v6845_v15, 0 }
 0x89d   :  { %2387 = vrot.lane.b32.xlu0 %v2170_v29, %s5886_s28 }
 0x89f   :  { %2389 = vrot.lane.b32.xlu1 %v2171_v30, %s5886_s28 }
 0x8a1   :  { %2395 = vrot.lane.b32.xlu0 %v2170_v29, %s5899_s29  ;;  %v6948_v29 = vld [vmem:[#allocation8 + $0x18] sm:$0xff] }
 0x8a3   :  { %2397 = vrot.lane.b32.xlu1 %v2171_v30, %s5899_s29 }
 0x8a5   :  { %2391 = vrot.lane.b32.xlu0 %v2172_v62, %s5886_s28 }
 0x8a7   :  { %2393 = vrot.lane.b32.xlu1 %v2173_v42, %s5886_s28 }
 0x8a9   :  { %2399 = vrot.lane.b32.xlu0 %v2172_v62, %s5899_s29 }
 0x8ab   :  { %2401 = vrot.lane.b32.xlu1 %v2173_v42, %s5899_s29 }
 0x8ad   :  { %2439 = vrot.lane.b32.xlu0 %v6763_v44, %s5898_s5 }
 0x8af   :  { %2441 = vrot.lane.b32.xlu1 %v6771_v26, %s5898_s5 }
 0x8b1   :  { %2437 = vrot.lane.b32.xlu0 %v6759_v7, %s5898_s5 }
 0x8b3   :  { %2435 = vrot.lane.b32.xlu1 %v6756_v2, %s5898_s5 }
 0x8b5   :  { %2453 = vrot.lane.b32.xlu0 %v6771_v26, %s5886_s28 }
 0x8b7   :  { %2463 = vrot.lane.b32.xlu1 %v6763_v44, %s5899_s29 }
 0x8b9   :  { %2465 = vrot.lane.b32.xlu0 %v6771_v26, %s5899_s29 }
 0x8bd   :  { %2451 = vrot.lane.b32.xlu0 %v6763_v44, %s5886_s28 }
 0x8f9   :  { %v2380_v37 = vpop.permute.xlu1 %2379 }
 0x8fa   :  { %5035 = vmatprep.mubr.msk.bf16.mxu0 %vm648_vm0, %v2380_v37 }
 0x8fd   :  { %v2382_v41 = vpop.permute.xlu1 %2381 }
 0x8fe   :  { %5036 = vmatmul.mubr.msk.bf16.vlgmr.msra.gmra.mxu0 %vm648_vm0, %v2382_v41  ;;  %v6978_v41 = vld [vmem:[#allocation8 + $0x28] sm:$0xff] }
 0x8ff   :  { %5060 = vmatpush3.bf16.xpose.msra.mxu0 %v2760_v8 }
 0x901   :  { %v2428_v38 = vpop.permute.xlu1 %2427 }
 0x902   :  { %5192 = vmatprep.subr.msk.bf16.mxu0 %vm648_vm0, %v2428_v38  ;;  %v2757_v23 = vsel %vm648_vm0, %v2428_v38, 0 }
 0x905   :  { %v2426_v61 = vpop.permute.xlu1 %2425 }
 0x906   :  { %v2754_v20 = vsel %vm648_vm0, %v2426_v61, 0 }
 0x907   :  { %5062 = vmatpush3.bf16.xpose.msra.mxu0 %v2757_v23  ;;  %v2386_v53 = vpop.permute.xlu0 %2385 }
 0x908   :  { %5193 = vmatprep.subr.msk.bf16.mxu0 %vm648_vm0, %v2426_v61 }
 0x909   :  { %v2416_v19 = vpop.permute.xlu1 %2415 }
 0x90a   :  { %5190 = vmatprep.subr.msk.bf16.mxu1 %vm648_vm0, %v2416_v19  ;;  %v2662_v6 = vsel %vm648_vm0, %v2416_v19, 0 }
 0x90b   :  { %5050 = vmatpush3.bf16.xpose.msra.mxu1 %v2662_v6  ;;  %v2384_v1 = vpop.permute.xlu0 %2383 }
 0x90c   :  { %5039 = vmatprep.mubr.msk.bf16.mxu0 %vm648_vm0, %v2384_v1  ;;  %5075 = vmatprep.subr.bf16.mxu1 %v6771_v26 }
 0x90d   :  { %v2424_v12 = vpop.permute.xlu1 %2423  ;;  %5040 = vmatmul.mubr.msk.bf16.gmra.mxu0 %vm648_vm0, %v2386_v53 }
 0x90e   :  { %v2751_v54 = vsel %vm648_vm0, %v2424_v12, 0 }
 0x90f   :  { %5064 = vmatpush3.bf16.xpose.msra.mxu0 %v2754_v20  ;;  %v2388_v35 = vpop.permute.xlu0 %2387 }
 0x910   :  { %5194 = vmatprep.subr.msk.bf16.mxu0 %vm648_vm0, %v2424_v12  ;;  %5051 = vmatprep.mubr.msk.bf16.mxu1 %vm648_vm0, %v2388_v35 }
 0x911   :  { %v2390_v9 = vpop.permute.xlu1 %2389 }
 0x912   :  { %5052 = vmatmul.mubr.msk.bf16.vlgmr.msra.gmra.mxu1 %vm648_vm0, %v2390_v9 }
 0x913   :  { %5076 = vmatpush3.bf16.msra.mxu1 %v6771_v26  ;;  %v2396_v33 = vpop.permute.xlu0 %2395 }
 0x914   :  { %5067 = vmatprep.mubr.msk.bf16.mxu0 %vm648_vm0, %v2396_v33  ;;  %5077 = vmatprep.subr.bf16.mxu1 %v6763_v44 }
 0x915   :  { %v2398_v25 = vpop.permute.xlu1 %2397 }
 0x917   :  { %5066 = vmatpush3.bf16.xpose.msra.mxu0 %v2751_v54  ;;  %5078 = vmatpush3.bf16.msra.mxu1 %v6763_v44  ;;  %v2392_v22 = vpop.permute.xlu0 %2391 }
 0x918   :  { %5055 = vmatprep.mubr.msk.bf16.mxu1 %vm648_vm0, %v2392_v22  ;;  %5079 = vmatprep.subr.bf16.mxu1 %v6759_v7 }
 0x919   :  { %v2394_v55 = vpop.permute.xlu1 %2393 }
 0x91a   :  { %5056 = vmatmul.mubr.msk.bf16.gmra.mxu1 %vm648_vm0, %v2394_v55 }
 0x91b   :  { %5080 = vmatpush3.bf16.msra.mxu1 %v6759_v7  ;;  %v2400_v26 = vpop.permute.xlu0 %2399 }
 0x91c   :  { %5081 = vmatprep.subr.bf16.mxu1 %v6756_v2 }
 0x91d   :  { %v2402_v27 = vpop.permute.xlu1 %2401 }
 0x91e   :  { %5068 = vmatmul.mubr.msk.bf16.vlgmr.msra.gmra.mxu0 %vm648_vm0, %v2398_v25 }
 0x91f   :  { %5071 = vmatprep.mubr.msk.bf16.mxu0 %vm648_vm0, %v2400_v26  ;;  %5082 = vmatpush3.bf16.msra.mxu1 %v6756_v2  ;;  %v6926_v44 = vpop.permute.xlu0 %2439 }
 0x921   :  { %v6928_v63 = vpop.permute.xlu1 %2441 }
 0x922   :  { %5091 = vmatprep.subr.bf16.mxu1 %v6928_v63 }
 0x923   :  { %v6931_v34 = vpop.permute.xlu0 %2437 }
 0x926   :  { %5072 = vmatmul.mubr.msk.bf16.gmra.mxu0 %vm648_vm0, %v2402_v27 }
 0x927   :  { %v2454_v15 = vpop.permute.xlu0 %2453 }
 0x928   :  { %5107 = vmatprep.subr.bf16.mxu0 %v2454_v15 }
 0x929   :  { %5108 = vmatpush3.bf16.msra.mxu0 %v2454_v15 }
 0x92b   :  { %v6934_v28 = vpop.permute.xlu0 %2465 }
 0x92f   :  { %v2452_v17 = vpop.permute.xlu0 %2451 }
 0x930   :  { %5109 = vmatprep.subr.bf16.mxu0 %v2452_v17 }
 0x931   :  { %5110 = vmatpush3.bf16.msra.mxu0 %v2452_v17 }
 0x948   :  { %v5021_v5 = vpop.f32.mrf.mxu1 }
 0x949   :  { %v6941_v46 = vadd.f32 %v5021_v5, %v6936_v43 }
 0x94a   :  { %v2529_v21 = vpop.f32.mrf.mxu1 }
 0x94b   :  { %v6944_v48 = vadd.f32 %v2529_v21, %v6938_v13  ;;  %v2833_v24 = vsel %vm1005_vm1, %v6941_v46, -inf }
 0x94c   :  { %v5022_v30 = vpop.f32.mrf.mxu1  ;;  %2834 = vmax.xlane.f32.xlu0 %v2833_v24 }
 0x94d   :  { %v6953_v11 = vadd.f32 %v5022_v30, %v6948_v29  ;;  %v2827_v49 = vsel %vm1005_vm1, %v6944_v48, -inf }
 0x94e   :  { %v2532_v10 = vpop.f32.mrf.mxu1 }
 0x94f   :  { %v6956_v4 = vadd.f32 %v2532_v10, %v6950_v45  ;;  %v2836_v3 = vsel %vm1005_vm1, %v6953_v11, -inf }
 0x950   :  { %2828 = vmax.xlane.f32.xlu0 %v2827_v49 }
 0x951   :  { %v2830_v40 = vsel %vm1005_vm1, %v6956_v4, -inf }
 0x952   :  { %2831 = vmax.xlane.f32.xlu1 %v2830_v40 }
 0x954   :  { %2837 = vmax.xlane.f32.xlu0 %v2836_v3 }
 0x958   :  { %v5025_v57 = vpop.f32.mrf.mxu1 }
 0x959   :  { %v6969_v52 = vadd.f32 %v5025_v57, %v6964_v16 }
 0x95a   :  { %v2545_v42 = vpop.f32.mrf.mxu1 }
 0x95b   :  { %v6974_v62 = vadd.f32 %v2545_v42, %v6966_v14  ;;  %v2845_v56 = vsel %vm1005_vm1, %v6969_v52, -inf }
 0x95c   :  { %2846 = vmax.xlane.f32.xlu1 %v2845_v56  ;;  %v5026_v37 = vpop.f32.mrf.mxu1 }
 0x95d   :  { %v6981_v8 = vadd.f32 %v5026_v37, %v6971_v32  ;;  %v2839_v53 = vsel %vm1005_vm1, %v6974_v62, -inf }
 0x95e   :  { %v2548_v38 = vpop.f32.mrf.mxu1 }
 0x95f   :  { %v6984_v61 = vadd.f32 %v2548_v38, %v6978_v41  ;;  %v2848_v23 = vsel %vm1005_vm1, %v6981_v8, -inf }
 0x960   :  { %2849 = vmax.xlane.f32.xlu0 %v2848_v23  ;;  %2840 = vmax.xlane.f32.xlu1 %v2839_v53 }
 0x961   :  { %v2842_v19 = vsel %vm1005_vm1, %v6984_v61, -inf }
 0x964   :  { %2843 = vmax.xlane.f32.xlu0 %v2842_v19 }
 0x9be   :  { %v5037_v6 = vpop.f32.mrf.mxu0 }
 0x9bf   :  { %v6993_v1 = vadd.f32 %v5037_v6, %v6936_v43 }
 0x9c0   :  { %v2618_v12 = vpop.f32.mrf.mxu0 }
 0x9c1   :  { %v2857_v20 = vsel %vm1005_vm1, %v6993_v1, -inf  ;;  %v7006_v27 = vadd.f32 %v2618_v12, %v6938_v13 }
 0x9c2   :  { %2858 = vmax.xlane.f32.xlu1 %v2857_v20  ;;  %v5038_v35 = vpop.f32.mrf.mxu0 }
 0x9c3   :  { %v6998_v9 = vadd.f32 %v5038_v35, %v6948_v29  ;;  %v2851_v49 = vsel %vm1005_vm1, %v7006_v27, -inf }
 0x9c4   :  { %v2621_v25 = vpop.f32.mrf.mxu0 }
 0x9c5   :  { %v2860_v33 = vsel %vm1005_vm1, %v6998_v9, -inf  ;;  %v7014_v30 = vadd.f32 %v2621_v25, %v6950_v45 }
 0x9c6   :  { %2861 = vmax.xlane.f32.xlu0 %v2860_v33 }
 0x9c7   :  { %v2854_v37 = vsel %vm1005_vm1, %v7014_v30, -inf }
 0x9cd   :  { %v5041_v55 = vpop.f32.mrf.mxu0 }
 0x9ce   :  { %v7024_v42 = vadd.f32 %v5041_v55, %v6964_v16 }
 0x9cf   :  { %v2634_v21 = vpop.f32.mrf.mxu0 }
 0x9d0   :  { %v2869_v20 = vsel %vm1005_vm1, %v7024_v42, -inf  ;;  %v7044_v25 = vadd.f32 %v2634_v21, %v6966_v14 }
 0x9d1   :  { %v5042_v57 = vpop.f32.mrf.mxu0 }
 0x9d2   :  { %v5053_v54 = vpop.f32.mrf.mxu1  ;;  %v7034_v19 = vadd.f32 %v5042_v57, %v6971_v32  ;;  %v2863_v21 = vsel %vm1005_vm1, %v7044_v25, -inf }
 0x9d3   :  { %v7003_v22 = vadd.f32 %v5053_v54, %v6936_v43  ;;  %v2637_v53 = vpop.f32.mrf.mxu0 }
 0x9d4   :  { %v2707_v26 = vpop.f32.mrf.mxu1  ;;  %v2872_v55 = vsel %vm1005_vm1, %v7034_v19, -inf }
 0x9d5   :  { %v2881_v15 = vsel %vm1005_vm1, %v7003_v22, -inf  ;;  %v7017_v10 = vadd.f32 %v2707_v26, %v6938_v13 }
 0x9d6   :  { %2882 = vmax.xlane.f32.xlu1 %v2881_v15  ;;  %v5054_v17 = vpop.f32.mrf.mxu1 }
 0x9d7   :  { %v7011_v5 = vadd.f32 %v5054_v17, %v6948_v29  ;;  %v2875_v38 = vsel %vm1005_vm1, %v7017_v10, -inf  ;;  %v7054_v17 = vadd.f32 %v2637_v53, %v6978_v41 }
 0x9d8   :  { %v2710_v24 = vpop.f32.mrf.mxu1 }
 0x9d9   :  { %v2884_v40 = vsel %vm1005_vm1, %v7011_v5, -inf  ;;  %v7027_v56 = vadd.f32 %v2710_v24, %v6950_v45 }
 0x9da   :  { %2852 = vmax.xlane.f32.xlu1 %v2851_v49  ;;  %2885 = vmax.xlane.f32.xlu0 %v2884_v40  ;;  %v5057_v3 = vpop.f32.mrf.mxu1 }
 0x9db   :  { %v7037_v6 = vadd.f32 %v5057_v3, %v6964_v16  ;;  %v2878_v12 = vsel %vm1005_vm1, %v7027_v56, -inf }
 0x9dc   :  { %v2723_v23 = vpop.f32.mrf.mxu1 }
 0x9dd   :  { %v2893_v26 = vsel %vm1005_vm1, %v7037_v6, -inf  ;;  %v7057_v24 = vadd.f32 %v2723_v23, %v6966_v14 }
 0x9de   :  { %2855 = vmax.xlane.f32.xlu0 %v2854_v37  ;;  %2876 = vmax.xlane.f32.xlu1 %v2875_v38  ;;  %v5069_v35 = vpop.f32.mrf.mxu0  ;;  %v5058_v33 = vpop.f32.mrf.mxu1  ;;  %v2866_v38 = vsel %vm1005_vm1, %v7054_v17, -inf }
 0x9df   :  { %v7047_v54 = vadd.f32 %v5058_v33, %v6971_v32  ;;  %v7064_v57 = vadd.f32 %v5069_v35, %v6936_v43  ;;  %v2887_v23 = vsel %vm1005_vm1, %v7057_v24, -inf }
 0x9e0   :  { %v2796_v15 = vpop.f32.mrf.mxu0  ;;  %v2726_v40 = vpop.f32.mrf.mxu1 }
 0x9e1   :  { %v2896_v49 = vsel %vm1005_vm1, %v7047_v54, -inf  ;;  %v7067_v37 = vadd.f32 %v2726_v40, %v6978_v41  ;;  %v2905_v35 = vsel %vm1005_vm1, %v7064_v57, -inf  ;;  %v7102_v40 = vpop.permute.xlu1 %2435 }
 0x9e2   :  { %2879 = vmax.xlane.f32.xlu0 %v2878_v12  ;;  %2870 = vmax.xlane.f32.xlu1 %v2869_v20  ;;  %v5070_v3 = vpop.f32.mrf.mxu0  ;;  %v7074_v12 = vadd.f32 %v2796_v15, %v6938_v13 }
 0x9e3   :  { %v7077_v20 = vadd.f32 %v5070_v3, %v6948_v29  ;;  %v2890_v43 = vsel %vm1005_vm1, %v7067_v37, -inf  ;;  %v2835_v3 = vpop.xlane.xlu0 %2834 }
 0x9e4   :  { %v2799_v53 = vpop.f32.mrf.mxu0  ;;  %v2899_v29 = vsel %vm1005_vm1, %v7074_v12, -inf }
 0x9e5   :  { %v2908_v13 = vsel %vm1005_vm1, %v7077_v20, -inf }
 0x9e6   :  { %2873 = vmax.xlane.f32.xlu0 %v2872_v55  ;;  %2894 = vmax.xlane.f32.xlu1 %v2893_v26  ;;  %v5073_v33 = vpop.f32.mrf.mxu0  ;;  %v7084_v55 = vadd.f32 %v2799_v53, %v6950_v45  ;;  %v2925_v53 = vsub.f32 %v6941_v46, %v2835_v3 }
 0x9e7   :  { %v7087_v26 = vadd.f32 %v5073_v33, %v6964_v16 }
 0x9e8   :  { %v2812_v15 = vpop.f32.mrf.mxu0 }
 0x9e9   :  { %v2917_v45 = vsel %vm1005_vm1, %v7087_v26, -inf }
 0x9ea   :  { %2864 = vmax.xlane.f32.xlu1 %v2863_v21  ;;  %2897 = vmax.xlane.f32.xlu0 %v2896_v49  ;;  %v7094_v21 = vadd.f32 %v2812_v15, %v6966_v14  ;;  %v2902_v49 = vsel %vm1005_vm1, %v7084_v55, -inf  ;;  %v7108_v14 = vpop.permute.xlu1 %2463 }
 0x9ec   :  { %v2911_v16 = vsel %vm1005_vm1, %v7094_v21, -inf }
 0x9ee   :  { %2867 = vmax.xlane.f32.xlu0 %v2866_v38  ;;  %2888 = vmax.xlane.f32.xlu1 %v2887_v23  ;;  %v2829_v38 = vpop.xlane.xlu0 %2828  ;;  %v2832_v23 = vpop.xlane.xlu1 %2831 }
 0x9ef   :  { %v2923_v33 = vsub.f32 %v6944_v48, %v2829_v38  ;;  %v5074_v38 = vpop.f32.mrf.mxu0 }
 0x9f1   :  { %v2955_v15 = vmul.f32 1.442695, %v2923_v33 }
 0x9f2   :  { %2891 = vmax.xlane.f32.xlu0 %v2890_v43  ;;  %2906 = vmax.xlane.f32.xlu1 %v2905_v35  ;;  %v2838_v43 = vpop.xlane.xlu0 %2837  ;;  %v2847_v35 = vpop.xlane.xlu1 %2846 }
 0x9f6   :  { %2909 = vmax.xlane.f32.xlu0 %v2908_v13  ;;  %2900 = vmax.xlane.f32.xlu1 %v2899_v29  ;;  %v2959_v13 = vmul.f32 1.442695, %v2925_v53  ;;  %v2926_v29 = vsub.f32 %v6953_v11, %v2838_v43  ;;  %v2841_v0 = vpop.xlane.xlu1 %2840  ;;  %v2815_v43 = vpop.f32.mrf.mxu0 }
 0x9f7   :  { %v2927_v46 = vsub.f32 %v6974_v62, %v2841_v0  ;;  %v7122_v0 = vadd.f32 %v2815_v43, %v6978_v41 }
 0x9f8   :  { %5479 = vpow2.f32 %v2959_v13 }
 0x9f9   :  { %5481 = vpow2.f32 %v2955_v15  ;;  %v2963_v11 = vmul.f32 1.442695, %v2927_v46 }
 0x9fa   :  { %2903 = vmax.xlane.f32.xlu0 %v2902_v49  ;;  %2918 = vmax.xlane.f32.xlu1 %v2917_v45  ;;  %v2924_v49 = vsub.f32 %v6956_v4, %v2832_v23  ;;  %v2850_v45 = vpop.xlane.xlu0 %2849  ;;  %v7118_v4 = vadd.f32 %v5074_v38, %v6971_v32  ;;  %v2914_v32 = vsel %vm1005_vm1, %v7122_v0, -inf }
 0x9fb   :  { %v2930_v48 = vsub.f32 %v6981_v8, %v2850_v45 }
 0x9fc   :  { %v2957_v39 = vmul.f32 1.442695, %v2924_v49  ;;  %v2920_v8 = vsel %vm1005_vm1, %v7118_v4, -inf }
 0x9fd   :  { %v2969_v23 = vmul.f32 1.442695, %v2930_v48 }
 0x9fe   :  { %2912 = vmax.xlane.f32.xlu1 %v2911_v16  ;;  %v2961_v16 = vmul.f32 1.442695, %v2926_v29  ;;  %v2844_v53 = vpop.xlane.xlu0 %2843 }
 0xa00   :  { %5483 = vpow2.f32 %v2961_v16 }
 0xa01   :  { %5485 = vpow2.f32 %v2957_v39 }
 0xa0f   :  { %2449 = vrot.lane.b32.xlu1 %v6759_v7, %s5886_s28 }
 0xa10   :  { %2461 = vrot.lane.b32.xlu0 %v6759_v7, %s5899_s29  ;;  %v2929_v7 = vsub.f32 %v6969_v52, %v2847_v35  ;;  %v2928_v52 = vsub.f32 %v6984_v61, %v2844_v53  ;;  %v7126_v35 = vpop.eup %5479 }
 0xa11   :  { %v7128_v39 = vpop.eup %5481  ;;  %v3025_v61 = vsel %vm1005_vm1, %v7126_v35, 0.0 }
 0xa12   :  { %v2967_v3 = vmul.f32 1.442695, %v2929_v7  ;;  %v2965_v62 = vmul.f32 1.442695, %v2928_v52  ;;  %v7134_v33 = vpop.eup %5483  ;;  %v3019_v13 = vsel %vm1005_vm1, %v7128_v39, 0.0 }
 0xa13   :  { %v7136_v41 = vpop.eup %5485  ;;  %v3028_v29 = vsel %vm1005_vm1, %v7134_v33, 0.0 }
 0xa14   :  { %5487 = vpow2.f32 %v2967_v3  ;;  %v3022_v16 = vsel %vm1005_vm1, %v7136_v41, 0.0 }
 0xa15   :  { %5489 = vpow2.f32 %v2963_v11 }
 0xa16   :  { %5491 = vpow2.f32 %v2969_v23 }
 0xa17   :  { %5493 = vpow2.f32 %v2965_v62 }
 0xa21   :  { %v7142_v15 = vpop.eup %5487 }
 0xa22   :  { %v7144_v49 = vpop.eup %5489  ;;  %v3037_v45 = vsel %vm1005_vm1, %v7142_v15, 0.0 }
 0xa23   :  { %v7150_v7 = vpop.eup %5491  ;;  %v3031_v46 = vsel %vm1005_vm1, %v7144_v49, 0.0 }
 0xa24   :  { %v3040_v3 = vsel %vm1005_vm1, %v7150_v7, 0.0  ;;  %v7156_v48 = vpop.eup %5493 }
 0xa25   :  { %v3034_v38 = vsel %vm1005_vm1, %v7156_v48, 0.0 }
 0xa2f   :  { %2921 = vmax.xlane.f32.xlu0 %v2920_v8 }
 0xa33   :  { %2915 = vmax.xlane.f32.xlu0 %v2914_v32  ;;  %3026 = vadd.xlane.f32.xlu1 %v3025_v61 }
 0xa37   :  { %3020 = vadd.xlane.f32.xlu1 %v3019_v13  ;;  %3029 = vadd.xlane.f32.xlu0 %v3028_v29 }
 0xa3b   :  { %3038 = vadd.xlane.f32.xlu1 %v3037_v45  ;;  %3023 = vadd.xlane.f32.xlu0 %v3022_v16 }
 0xa3f   :  { %3032 = vadd.xlane.f32.xlu1 %v3031_v46  ;;  %3041 = vadd.xlane.f32.xlu0 %v3040_v3 }
 0xa43   :  { %3035 = vadd.xlane.f32.xlu0 %v3034_v38 }
 0xa4b   :  { %v2859_v53 = vpop.xlane.xlu1 %2858 }
 0xa4c   :  { %v2933_v11 = vsub.f32 %v6993_v1, %v2859_v53 }
 0xa4e   :  { %v2975_v23 = vmul.f32 1.442695, %v2933_v11 }
 0xa4f   :  { %v2862_v62 = vpop.xlane.xlu0 %2861 }
 0xa50   :  { %5495 = vpow2.f32 %v2975_v23  ;;  %v2934_v1 = vsub.f32 %v6998_v9, %v2862_v62 }
 0xa52   :  { %v2977_v53 = vmul.f32 1.442695, %v2934_v1 }
 0xa5d   :  { %v7161_v52 = vpop.eup %5495 }
 0xa5e   :  { %v3049_v43 = vsel %vm1005_vm1, %v7161_v52, 0.0 }
 0xa5f   :  { %v2883_v8 = vpop.xlane.xlu1 %2882  ;;  %3050 = vadd.xlane.f32.xlu1 %v3049_v43 }
 0xa60   :  { %v2941_v32 = vsub.f32 %v7003_v22, %v2883_v8 }
 0xa62   :  { %v2991_v61 = vmul.f32 1.442695, %v2941_v32 }
 0xa63   :  { %v2853_v13 = vpop.xlane.xlu1 %2852  ;;  %v2886_v29 = vpop.xlane.xlu0 %2885 }
 0xa64   :  { %5497 = vpow2.f32 %v2991_v61  ;;  %v2931_v45 = vsub.f32 %v7006_v27, %v2853_v13  ;;  %v2942_v11 = vsub.f32 %v7011_v5, %v2886_v29 }
 0xa66   :  { %v2971_v16 = vmul.f32 1.442695, %v2931_v45  ;;  %v2993_v32 = vmul.f32 1.442695, %v2942_v11 }
 0xa67   :  { %v2877_v46 = vpop.xlane.xlu1 %2876  ;;  %v2856_v3 = vpop.xlane.xlu0 %2855 }
 0xa68   :  { %5499 = vpow2.f32 %v2971_v16  ;;  %v2939_v38 = vsub.f32 %v7017_v10, %v2877_v46  ;;  %v2932_v27 = vsub.f32 %v7014_v30, %v2856_v3 }
 0xa6a   :  { %v2987_v23 = vmul.f32 1.442695, %v2939_v38  ;;  %v2973_v10 = vmul.f32 1.442695, %v2932_v27 }
 0xa6b   :  { %v2871_v43 = vpop.xlane.xlu1 %2870  ;;  %v2880_v22 = vpop.xlane.xlu0 %2879 }
 0xa6c   :  { %5501 = vpow2.f32 %v2987_v23  ;;  %v2937_v8 = vsub.f32 %v7024_v42, %v2871_v43  ;;  %v2940_v5 = vsub.f32 %v7027_v56, %v2880_v22 }
 0xa6d   :  { %5503 = vpow2.f32 %v2977_v53 }
 0xa6e   :  { %v2983_v9 = vmul.f32 1.442695, %v2937_v8  ;;  %v2989_v16 = vmul.f32 1.442695, %v2940_v5 }
 0xa6f   :  { %v2895_v62 = vpop.xlane.xlu1 %2894  ;;  %v2874_v61 = vpop.xlane.xlu0 %2873 }
 0xa70   :  { %5505 = vpow2.f32 %v2983_v9  ;;  %v2945_v46 = vsub.f32 %v7037_v6, %v2895_v62  ;;  %v2938_v9 = vsub.f32 %v7034_v19, %v2874_v61 }
 0xa71   :  { %v7172_v13 = vpop.eup %5497  ;;  %5507 = vpow2.f32 %v2993_v32 }
 0xa72   :  { %v3073_v29 = vsel %vm1005_vm1, %v7172_v13, 0.0  ;;  %5509 = vpow2.f32 %v2973_v10 }
 0xa73   :  { %v2865_v45 = vpop.xlane.xlu1 %2864  ;;  %3074 = vadd.xlane.f32.xlu0 %v3073_v29  ;;  %v2898_v42 = vpop.xlane.xlu0 %2897 }
 0xa74   :  { %v2935_v1 = vsub.f32 %v7044_v25, %v2865_v45  ;;  %v2999_v25 = vmul.f32 1.442695, %v2945_v46  ;;  %v2946_v19 = vsub.f32 %v7047_v54, %v2898_v42 }
 0xa75   :  { %v7178_v30 = vpop.eup %5499 }
 0xa76   :  { %v2979_v3 = vmul.f32 1.442695, %v2935_v1  ;;  %v3043_v38 = vsel %vm1005_vm1, %v7178_v30, 0.0  ;;  %v2985_v1 = vmul.f32 1.442695, %v2938_v9 }
 0xa77   :  { %v2889_v53 = vpop.xlane.xlu1 %2888  ;;  %3044 = vadd.xlane.f32.xlu1 %v3043_v38  ;;  %v2868_v56 = vpop.xlane.xlu0 %2867 }
 0xa78   :  { %5511 = vpow2.f32 %v2979_v3  ;;  %v2943_v43 = vsub.f32 %v7057_v24, %v2889_v53  ;;  %v3001_v53 = vmul.f32 1.442695, %v2946_v19 }
 0xa79   :  { %v7183_v11 = vpop.eup %5501  ;;  %5513 = vpow2.f32 %v2989_v16 }
 0xa7a   :  { %v7185_v23 = vpop.eup %5503  ;;  %v3067_v22 = vsel %vm1005_vm1, %v7183_v11, 0.0  ;;  %5515 = vpow2.f32 %v2999_v25  ;;  %v2995_v10 = vmul.f32 1.442695, %v2943_v43 }
 0xa7b   :  { %v2907_v6 = vpop.xlane.xlu1 %2906  ;;  %3068 = vadd.xlane.f32.xlu0 %v3067_v22  ;;  %v2892_v8 = vpop.xlane.xlu0 %2891  ;;  %v3052_v62 = vsel %vm1005_vm1, %v7185_v23, 0.0 }
 0xa7c   :  { %v2944_v27 = vsub.f32 %v7067_v37, %v2892_v8  ;;  %v2949_v22 = vsub.f32 %v7064_v57, %v2907_v6 }
 0xa7d   :  { %v7191_v32 = vpop.eup %5505 }
 0xa7e   :  { %v2997_v5 = vmul.f32 1.442695, %v2944_v27  ;;  %v3061_v24 = vsel %vm1005_vm1, %v7191_v32, 0.0  ;;  %v7198_v29 = vpop.eup %5507 }
 0xa7f   :  { %v2901_v45 = vpop.xlane.xlu1 %2900  ;;  %3062 = vadd.xlane.f32.xlu1 %v3061_v24  ;;  %3053 = vadd.xlane.f32.xlu0 %v3052_v62  ;;  %v7201_v16 = vpop.eup %5509  ;;  %v3076_v46 = vsel %vm1005_vm1, %v7198_v29, 0.0  ;;  %v3007_v62 = vmul.f32 1.442695, %v2949_v22 }
 0xa80   :  { %v2947_v37 = vsub.f32 %v7074_v12, %v2901_v45  ;;  %5517 = vpow2.f32 %v2997_v5  ;;  %v2936_v12 = vsub.f32 %v7054_v17, %v2868_v56  ;;  %v3046_v54 = vsel %vm1005_vm1, %v7201_v16, 0.0  ;;  %v2910_v8 = vpop.xlane.xlu0 %2909 }
 0xa81   :  { %5519 = vpow2.f32 %v2995_v10  ;;  %v2950_v5 = vsub.f32 %v7077_v20, %v2910_v8 }
 0xa82   :  { %v3003_v61 = vmul.f32 1.442695, %v2947_v37  ;;  %v2981_v27 = vmul.f32 1.442695, %v2936_v12 }
 0xa83   :  { %v2919_v3 = vpop.xlane.xlu1 %2918  ;;  %3077 = vadd.xlane.f32.xlu0 %v3076_v46  ;;  %v3009_v19 = vmul.f32 1.442695, %v2950_v5 }
 0xa84   :  { %5521 = vpow2.f32 %v3003_v61  ;;  %v2904_v24 = vpop.xlane.xlu0 %2903 }
 0xa85   :  { %v7206_v38 = vpop.eup %5511  ;;  %5523 = vpow2.f32 %v2985_v1  ;;  %v2948_v61 = vsub.f32 %v7084_v55, %v2904_v24 }
 0xa86   :  { %v3055_v25 = vsel %vm1005_vm1, %v7206_v38, 0.0  ;;  %v7213_v42 = vpop.eup %5513  ;;  %5525 = vpow2.f32 %v3001_v53  ;;  %v2953_v53 = vsub.f32 %v7087_v26, %v2919_v3 }
 0xa87   :  { %v2913_v43 = vpop.xlane.xlu1 %2912  ;;  %3056 = vadd.xlane.f32.xlu1 %v3055_v25  ;;  %3047 = vadd.xlane.f32.xlu0 %v3046_v54  ;;  %v3070_v9 = vsel %vm1005_vm1, %v7213_v42, 0.0  ;;  %v7218_v17 = vpop.eup %5515  ;;  %5527 = vpow2.f32 %v2981_v27  ;;  %v3005_v12 = vmul.f32 1.442695, %v2948_v61 }
 0xa88   :  { %v3085_v57 = vsel %vm1005_vm1, %v7218_v17, 0.0  ;;  %5529 = vpow2.f32 %v3007_v62  ;;  %v3015_v22 = vmul.f32 1.442695, %v2953_v53  ;;  %v2951_v55 = vsub.f32 %v7094_v21, %v2913_v43  ;;  %v7270_v61 = vpop.permute.xlu0 %2461 }
 0xa89   :  { %5531 = vpow2.f32 %v3009_v19 }
 0xa8a   :  { %5533 = vpow2.f32 %v3005_v12  ;;  %v3011_v26 = vmul.f32 1.442695, %v2951_v55 }
 0xa8b   :  { %v2450_v56 = vpop.permute.xlu1 %2449  ;;  %3071 = vadd.xlane.f32.xlu0 %v3070_v9  ;;  %5535 = vpow2.f32 %v3015_v22 }
 0xa8c   :  { %5111 = vmatprep.subr.bf16.mxu0 %v2450_v56  ;;  %5537 = vpow2.f32 %v3011_v26 }
 0xa8d   :  { %5112 = vmatpush3.bf16.msra.mxu0 %v2450_v56  ;;  %v7220_v10 = vpop.eup %5517 }
 0xa8e   :  { %v7225_v6 = vpop.eup %5519  ;;  %v3082_v45 = vsel %vm1005_vm1, %v7220_v10, 0.0 }
 0xa8f   :  { %3086 = vadd.xlane.f32.xlu0 %v3085_v57  ;;  %3083 = vadd.xlane.f32.xlu1 %v3082_v45  ;;  %v3079_v20 = vsel %vm1005_vm1, %v7225_v6, 0.0 }
 0xa91   :  { %v7229_v37 = vpop.eup %5521 }
 0xa92   :  { %v7231_v1 = vpop.eup %5523  ;;  %v3091_v46 = vsel %vm1005_vm1, %v7229_v37, 0.0 }
 0xa93   :  { %3080 = vadd.xlane.f32.xlu0 %v3079_v20  ;;  %3092 = vadd.xlane.f32.xlu1 %v3091_v46  ;;  %v3064_v25 = vsel %vm1005_vm1, %v7231_v1, 0.0  ;;  %v7241_v54 = vpop.eup %5525 }
 0xa94   :  { %v3088_v8 = vsel %vm1005_vm1, %v7241_v54, 0.0  ;;  %v7246_v27 = vpop.eup %5527 }
 0xa95   :  { %v7248_v9 = vpop.eup %5529  ;;  %v3058_v3 = vsel %vm1005_vm1, %v7246_v27, 0.0 }
 0xa96   :  { %v3097_v56 = vsel %vm1005_vm1, %v7248_v9, 0.0  ;;  %v7254_v62 = vpop.eup %5531 }
 0xa97   :  { %3065 = vadd.xlane.f32.xlu0 %v3064_v25  ;;  %v3100_v21 = vsel %vm1005_vm1, %v7254_v62, 0.0  ;;  %v7258_v43 = vpop.eup %5533 }
 0xa98   :  { %v3094_v5 = vsel %vm1005_vm1, %v7258_v43, 0.0  ;;  %v7262_v57 = vpop.eup %5535 }
 0xa99   :  { %v3109_v24 = vsel %vm1005_vm1, %v7262_v57, 0.0  ;;  %v7266_v45 = vpop.eup %5537 }
 0xa9a   :  { %v3103_v19 = vsel %vm1005_vm1, %v7266_v45, 0.0 }
 0xa9b   :  { %3089 = vadd.xlane.f32.xlu0 %v3088_v8 }
 0xa9f   :  { %3059 = vadd.xlane.f32.xlu0 %v3058_v3 }
 0xaa3   :  { %3098 = vadd.xlane.f32.xlu0 %v3097_v56 }
 0xaa7   :  { %3101 = vadd.xlane.f32.xlu0 %v3100_v21 }
 0xaab   :  { %3095 = vadd.xlane.f32.xlu0 %v3094_v5 }
 0xaaf   :  { %3110 = vadd.xlane.f32.xlu0 %v3109_v24 }
 0xab3   :  { %3104 = vadd.xlane.f32.xlu0 %v3103_v19 }
 0xab8   :  { %v2922_v20 = vpop.xlane.xlu0 %2921 }
 0xab9   :  { %v2954_v46 = vsub.f32 %v7118_v4, %v2922_v20 }
 0xabb   :  { %v3017_v53 = vmul.f32 1.442695, %v2954_v46 }
 0xabc   :  { %v3027_v12 = vpop.xlane.xlu1 %3026  ;;  %v2916_v25 = vpop.xlane.xlu0 %2915 }
 0xabd   :  { %5539 = vpow2.f32 %v3017_v53  ;;  %v2952_v22 = vsub.f32 %v7122_v0, %v2916_v25 }
 0xabf   :  { %v3013_v55 = vmul.f32 1.442695, %v2952_v22 }
 0xac0   :  { %v3021_v8 = vpop.xlane.xlu1 %3020  ;;  %v3030_v26 = vpop.xlane.xlu0 %3029 }
 0xac1   :  { %5541 = vpow2.f32 %v3013_v55 }
 0xac2   :  { %5543 = vrcp.f32 %v3030_v26 }
 0xac3   :  { %5545 = vrcp.f32 %v3021_v8 }
 0xac4   :  { %v3039_v3 = vpop.xlane.xlu1 %3038  ;;  %v3024_v56 = vpop.xlane.xlu0 %3023  ;;  %5547 = vrcp.f32 %v3027_v12 }
 0xac5   :  { %5549 = vrcp.f32 %v3024_v56 }
 0xac8   :  { %v3033_v21 = vpop.xlane.xlu1 %3032  ;;  %v3042_v5 = vpop.xlane.xlu0 %3041 }
 0xac9   :  { %2459 = vrot.lane.b32.xlu0 %v6756_v2, %s5899_s29  ;;  %5551 = vrcp.f32 %v3033_v21 }
 0xaca   :  { %v7276_v4 = vpop.eup %5539  ;;  %5553 = vrcp.f32 %v3042_v5 }
 0xacb   :  { %v3112_v0 = vsel %vm1005_vm1, %v7276_v4, 0.0  ;;  %5555 = vrcp.f32 %v3039_v3 }
 0xacc   :  { %3113 = vadd.xlane.f32.xlu1 %v3112_v0  ;;  %v3036_v24 = vpop.xlane.xlu0 %3035 }
 0xacd   :  { %5557 = vrcp.f32 %v3036_v24 }
 0xace   :  { %v7280_v19 = vpop.eup %5541 }
 0xacf   :  { %v3106_v20 = vsel %vm1005_vm1, %v7280_v19, 0.0  ;;  %v5544_v46 = vpop.eup %5543 }
 0xad0   :  { %3107 = vadd.xlane.f32.xlu1 %v3106_v20  ;;  %v5546_v53 = vpop.eup %5545  ;;  %v3150_v22 = vmul.f32 %v5544_v46, %v7134_v33 }
 0xad1   :  { %v5548_v12 = vpop.eup %5547  ;;  %v3147_v55 = vmul.f32 %v5546_v53, %v7128_v39 }
 0xad2   :  { %v5550_v25 = vpop.eup %5549  ;;  %v3149_v26 = vmul.f32 %v5548_v12, %v7126_v35 }
 0xad3   :  { %v3148_v8 = vmul.f32 %v5550_v25, %v7136_v41 }
 0xad4   :  { %v3180_v21 = vpack.c.bf16 %v3150_v22, %v3149_v26 }
 0xad5   :  { %v3179_v3 = vpack.c.bf16 %v3148_v8, %v3147_v55 }
 0xad6   :  { %v5552_v56 = vpop.eup %5551 }
 0xad7   :  { %v5554_v5 = vpop.eup %5553  ;;  %5083 = vmatprep.mubr.msk.bf16.mxu1 %vm1005_vm1, %v3179_v3  ;;  %v3151_v39 = vmul.f32 %v5552_v56, %v7144_v49 }
 0xad8   :  { %v5556_v0 = vpop.eup %5555  ;;  %5084 = vmatmul.mubr.msk.bf16.vlgmr.msra.gmra.mxu1 %vm1005_vm1, %v3180_v21  ;;  %v3154_v35 = vmul.f32 %v5554_v5, %v7150_v7 }
 0xad9   :  { %5092 = vmatpush3.bf16.msra.mxu1 %v6928_v63  ;;  %v3153_v20 = vmul.f32 %v5556_v0, %v7142_v15 }
 0xada   :  { %v5558_v24 = vpop.eup %5557  ;;  %5093 = vmatprep.subr.bf16.mxu1 %v6926_v44 }
 0xadb   :  { %v3152_v33 = vmul.f32 %v5558_v24, %v7156_v48  ;;  %v3182_v46 = vpack.c.bf16 %v3154_v35, %v3153_v20 }
 0xadd   :  { %v3181_v41 = vpack.c.bf16 %v3152_v33, %v3151_v39  ;;  %5094 = vmatpush3.bf16.msra.mxu1 %v6926_v44 }
 0xade   :  { %5095 = vmatprep.subr.bf16.mxu1 %v6931_v34 }
 0xadf   :  { %5087 = vmatprep.mubr.msk.bf16.mxu1 %vm1005_vm1, %v3181_v41 }
 0xae0   :  { %5088 = vmatmul.mubr.msk.bf16.gmra.mxu1 %vm1005_vm1, %v3182_v46 }
 0xae1   :  { %2447 = vrot.lane.b32.xlu1 %v6756_v2, %s5886_s28  ;;  %5096 = vmatpush3.bf16.msra.mxu1 %v6931_v34 }
 0xae2   :  { %5097 = vmatprep.subr.bf16.mxu1 %v7102_v40 }
 0xae5   :  { %5098 = vmatpush3.bf16.msra.mxu1 %v7102_v40 }
 0xae6   :  { %5123 = vmatprep.subr.bf16.mxu1 %v6934_v28 }
 0xae8   :  { %v3051_v49 = vpop.xlane.xlu1 %3050 }
 0xafc   :  { %v3075_v63 = vpop.xlane.xlu0 %3074 }
 0xafd   :  { %5559 = vrcp.f32 %v3075_v63 }
 0xb00   :  { %v3045_v48 = vpop.xlane.xlu1 %3044 }
 0xb04   :  { %v3069_v44 = vpop.xlane.xlu0 %3068 }
 0xb08   :  { %v3054_v15 = vpop.xlane.xlu0 %3053  ;;  %v3063_v24 = vpop.xlane.xlu1 %3062 }
 0xb0a   :  { %v5560_v34 = vpop.eup %5559 }
 0xb0b   :  { %v7309_v25 = vmul.f32 %v5560_v34, %v7172_v13 }
 0xb0c   :  { %v3078_v7 = vpop.xlane.xlu0 %3077 }
 0xb0d   :  { %5561 = vrcp.f32 %v3078_v7 }
 0xb0e   :  { %5563 = vrcp.f32 %v3054_v15 }
 0xb0f   :  { %5565 = vrcp.f32 %v3045_v48 }
 0xb10   :  { %v3048_v53 = vpop.xlane.xlu0 %3047  ;;  %5567 = vrcp.f32 %v3051_v49 }
 0xb11   :  { %5569 = vrcp.f32 %v3048_v53 }
 0xb12   :  { %5571 = vrcp.f32 %v3069_v44  ;;  %v3057_v44 = vpop.xlane.xlu1 %3056 }
 0xb14   :  { %v3072_v2 = vpop.xlane.xlu0 %3071 }
 0xb15   :  { %5573 = vrcp.f32 %v3072_v2 }
 0xb18   :  { %v7306_v40 = vpop.xlane.xlu0 %3086 }
 0xb1a   :  { %v5562_v12 = vpop.eup %5561 }
 0xb1b   :  { %v7312_v22 = vmul.f32 %v5562_v12, %v7198_v29  ;;  %v5564_v55 = vpop.eup %5563 }
 0xb1c   :  { %v7314_v8 = vpop.xlane.xlu0 %3080  ;;  %v5566_v26 = vpop.eup %5565  ;;  %v3158_v5 = vmul.f32 %v5564_v55, %v7185_v23 }
 0xb1d   :  { %v3188_v3 = vpack.c.bf16 %v7312_v22, %v7309_v25  ;;  %v5568_v56 = vpop.eup %5567  ;;  %v3155_v13 = vmul.f32 %v5566_v26, %v7178_v30  ;;  %v3084_v30 = vpop.xlane.xlu1 %3083 }
 0xb1e   :  { %v5570_v21 = vpop.eup %5569  ;;  %v3157_v29 = vmul.f32 %v5568_v56, %v7161_v52 }
 0xb1f   :  { %v5572_v0 = vpop.eup %5571  ;;  %v3156_v33 = vmul.f32 %v5570_v21, %v7201_v16 }
 0xb20   :  { %v3066_v39 = vpop.xlane.xlu0 %3065  ;;  %v3184_v20 = vpack.c.bf16 %v3158_v5, %v3157_v29  ;;  %v3163_v46 = vmul.f32 %v5572_v0, %v7183_v11 }
 0xb21   :  { %v3183_v41 = vpack.c.bf16 %v3156_v33, %v3155_v13  ;;  %5575 = vrcp.f32 %v3066_v39  ;;  %v3093_v16 = vpop.xlane.xlu1 %3092 }
 0xb22   :  { %v5574_v35 = vpop.eup %5573  ;;  %5577 = vrcp.f32 %v3057_v44 }
 0xb23   :  { %v3164_v63 = vmul.f32 %v5574_v35, %v7213_v42  ;;  %5099 = vmatprep.mubr.msk.bf16.mxu1 %vm1005_vm1, %v3183_v41  ;;  %5579 = vrcp.f32 %v3063_v24 }
 0xb24   :  { %v3090_v23 = vpop.xlane.xlu0 %3089  ;;  %5100 = vmatmul.mubr.msk.bf16.vlgmr.msra.gmra.mxu1 %vm1005_vm1, %v3184_v20 }
 0xb25   :  { %v3187_v15 = vpack.c.bf16 %v3164_v63, %v3163_v46  ;;  %5124 = vmatpush3.bf16.msra.mxu1 %v6934_v28 }
 0xb26   :  { %5125 = vmatprep.subr.bf16.mxu1 %v7108_v14 }
 0xb27   :  { %5115 = vmatprep.mubr.msk.bf16.mxu0 %vm1005_vm1, %v3187_v15 }
 0xb28   :  { %v3060_v52 = vpop.xlane.xlu0 %3059 }
 0xb29   :  { %5581 = vrcp.f32 %v3060_v52  ;;  %5126 = vmatpush3.bf16.msra.mxu1 %v7108_v14 }
 0xb2a   :  { %5127 = vmatprep.subr.bf16.mxu1 %v7270_v61 }
 0xb2c   :  { %v3099_v11 = vpop.xlane.xlu0 %3098 }
 0xb2d   :  { %5128 = vmatpush3.bf16.msra.mxu1 %v7270_v61 }
 0xb2e   :  { %v5576_v28 = vpop.eup %5575 }
 0xb2f   :  { %v5578_v49 = vpop.eup %5577  ;;  %v3162_v2 = vmul.f32 %v5576_v28, %v7231_v1 }
 0xb30   :  { %v3102_v42 = vpop.xlane.xlu0 %3101  ;;  %v5580_v48 = vpop.eup %5579  ;;  %v3159_v14 = vmul.f32 %v5578_v49, %v7206_v38 }
 0xb31   :  { %5583 = vrcp.f32 %v3102_v42  ;;  %v3161_v61 = vmul.f32 %v5580_v48, %v7191_v32 }
 0xb32   :  { %5585 = vrcp.f32 %v3093_v16 }
 0xb33   :  { %5587 = vrcp.f32 %v3099_v11  ;;  %v3186_v26 = vpack.c.bf16 %v3162_v2, %v3161_v61  ;;  %v5287_v2 = vld [vmem:[#allocation14 + $0x78] sm:$0xff]  }
 0xb34   :  { %v3096_v7 = vpop.xlane.xlu0 %3095 }
 0xb35   :  { %5589 = vrcp.f32 %v3096_v7 }
 0xb36   :  { %v5582_v53 = vpop.eup %5581  ;;  %5591 = vrcp.f32 %v7314_v8 }
 0xb37   :  { %v3160_v34 = vmul.f32 %v5582_v53, %v7246_v27  ;;  %5593 = vrcp.f32 %v3084_v30 }
 0xb38   :  { %v3111_v12 = vpop.xlane.xlu0 %3110  ;;  %5595 = vrcp.f32 %v3090_v23 }
 0xb39   :  { %v3185_v55 = vpack.c.bf16 %v3160_v34, %v3159_v14  ;;  %5597 = vrcp.f32 %v7306_v40  ;;  %v5288_v14 = vld [vmem:[#allocation14 + $0x70] sm:$0xff]  }
 0xb3b   :  { %5103 = vmatprep.mubr.msk.bf16.mxu1 %vm1005_vm1, %v3185_v55 }
 0xb3c   :  { %5104 = vmatmul.mubr.msk.bf16.gmra.mxu1 %vm1005_vm1, %v3186_v26  ;;  %v3105_v56 = vpop.xlane.xlu0 %3104  ;;  %v5290_v26 = vld [vmem:[#allocation14 + $0x60] sm:$0xff]  }
 0xb3e   :  { %v5584_v21 = vpop.eup %5583 }
 0xb3f   :  { %v5586_v5 = vpop.eup %5585  ;;  %v3174_v38 = vmul.f32 %v5584_v21, %v7254_v62 }
 0xb40   :  { %v2460_v0 = vpop.permute.xlu0 %2459  ;;  %v5588_v24 = vpop.eup %5587  ;;  %v3171_v27 = vmul.f32 %v5586_v5, %v7229_v37 }
 0xb41   :  { %5129 = vmatprep.subr.bf16.mxu1 %v2460_v0  ;;  %v3173_v39 = vmul.f32 %v5588_v24, %v7248_v9  ;;  %v5292_v24 = vld [vmem:[#allocation14 + $0x50] sm:$0xff]  }
 0xb42   :  { %v5590_v1 = vpop.eup %5589  ;;  %5130 = vmatpush3.bf16.msra.mxu1 %v2460_v0  ;;  %v5291_v0 = vld [vmem:[#allocation14 + $0x58] sm:$0xff]  }
 0xb43   :  { %v3172_v32 = vmul.f32 %v5590_v1, %v7258_v43  ;;  %v3192_v33 = vpack.c.bf16 %v3174_v38, %v3173_v39  ;;  %v5592_v62 = vpop.eup %5591  ;;  %v5293_v39 = vld [vmem:[#allocation14 + $0x48] sm:$0xff]  }
 0xb44   :  { %v5594_v9 = vpop.eup %5593  ;;  %v3167_v35 = vmul.f32 %v5592_v62, %v7225_v6 }
 0xb45   :  { %v3191_v13 = vpack.c.bf16 %v3172_v32, %v3171_v27  ;;  %v3168_v41 = vmul.f32 %v5594_v9, %v7220_v10  ;;  %v5596_v8 = vpop.eup %5595 }
 0xb46   :  { %v5598_v40 = vpop.eup %5597  ;;  %v3170_v63 = vmul.f32 %v5596_v8, %v7241_v54  ;;  %v7599_v54 = vmov 0  }
 0xb47   :  { %5131 = vmatprep.mubr.msk.bf16.mxu1 %vm1005_vm1, %v3191_v13  ;;  %v3189_v20 = vpack.c.bf16 %v3168_v41, %v3167_v35  ;;  %v3169_v6 = vmul.f32 %v5598_v40, %v7218_v17 }
 0xb48   :  { %5132 = vmatmul.mubr.msk.bf16.vlgmr.msra.gmra.mxu1 %vm1005_vm1, %v3192_v33  ;;  %v5294_v33 = vld [vmem:[#allocation14 + $0x40] sm:$0xff]  }
 0xb49   :  { %v3190_v52 = vpack.c.bf16 %v3170_v63, %v3169_v6 }
 0xb55   :  { %v3114_v29 = vpop.xlane.xlu1 %3113 }
 0xb56   :  { %5599 = vrcp.f32 %v3114_v29 }
 0xb57   :  { %5601 = vrcp.f32 %v3105_v56 }
 0xb58   :  { %5603 = vrcp.f32 %v3111_v12  ;;  %v5289_v12 = vld [vmem:[#allocation14 + $0x68] sm:$0xff]  }
 0xb59   :  { %v3108_v37 = vpop.xlane.xlu1 %3107 }
 0xb5a   :  { %5605 = vrcp.f32 %v3108_v37 }
 0xb5d   :  { %v2448_v43 = vpop.permute.xlu1 %2447 }
 0xb5e   :  { %5113 = vmatprep.subr.bf16.mxu0 %v2448_v43 }
 0xb5f   :  { %5114 = vmatpush3.bf16.msra.mxu0 %v2448_v43 }
 0xb60   :  { %5139 = vmatprep.subr.bf16.mxu0 %v5287_v2 }
 0xb62   :  { %5116 = vmatmul.mubr.msk.bf16.vlgmr.msra.gmra.mxu0 %vm1005_vm1, %v3188_v3 }
 0xb63   :  { %5119 = vmatprep.mubr.msk.bf16.mxu0 %vm1005_vm1, %v3189_v20  ;;  %v5600_v46 = vpop.eup %5599  ;;  %5140 = vmatpush3.bf16.msra.mxu0 %v5287_v2 }
 0xb64   :  { %v5602_v44 = vpop.eup %5601  ;;  %v3178_v10 = vmul.f32 %v5600_v46, %v7276_v4  ;;  %5141 = vmatprep.subr.bf16.mxu0 %v5288_v14 }
 0xb65   :  { %v5604_v23 = vpop.eup %5603  ;;  %v3175_v30 = vmul.f32 %v5602_v44, %v7266_v45 }
 0xb66   :  { %v3177_v22 = vmul.f32 %v5604_v23, %v7262_v57 }
 0xb67   :  { %v5606_v15 = vpop.eup %5605  ;;  %5142 = vmatpush3.bf16.msra.mxu0 %v5288_v14 }
 0xb68   :  { %v3176_v25 = vmul.f32 %v5606_v15, %v7280_v19  ;;  %v3194_v11 = vpack.c.bf16 %v3178_v10, %v3177_v22  ;;  %5143 = vmatprep.subr.bf16.mxu0 %v5289_v12 }
 0xb6a   :  { %5120 = vmatmul.mubr.msk.bf16.gmra.mxu0 %vm1005_vm1, %v3190_v52  ;;  %v3193_v3 = vpack.c.bf16 %v3176_v25, %v3175_v30 }
 0xb6b   :  { %5144 = vmatpush3.bf16.msra.mxu0 %v5289_v12 }
 0xb6c   :  { %5135 = vmatprep.mubr.msk.bf16.mxu1 %vm1005_vm1, %v3193_v3  ;;  %5145 = vmatprep.subr.bf16.mxu0 %v5290_v26 }
 0xb6d   :  { %5136 = vmatmul.mubr.msk.bf16.gmra.mxu1 %vm1005_vm1, %v3194_v11 }
 0xb6e   :  { %3997 = vmatprep.mubr.bf16.mxu1 %v7599_v54 }
 0xb6f   :  { %5146 = vmatpush3.bf16.msra.mxu0 %v5290_v26 }
 0xb70   :  { %5147 = vmatprep.subr.bf16.mxu0 %v5291_v0 }
 0xb73   :  { %5148 = vmatpush3.bf16.msra.mxu0 %v5291_v0 }
 0xb74   :  { %5149 = vmatprep.subr.bf16.mxu0 %v5292_v24 }
 0xb77   :  { %5150 = vmatpush3.bf16.msra.mxu0 %v5292_v24 }
 0xb78   :  { %5151 = vmatprep.subr.bf16.mxu0 %v5293_v39 }
 0xb7b   :  { %5152 = vmatpush3.bf16.msra.mxu0 %v5293_v39 }
 0xb7c   :  { %5153 = vmatprep.subr.bf16.mxu0 %v5294_v33 }
 0xb7f   :  { %5154 = vmatpush3.bf16.msra.mxu0 %v5294_v33 }
 0xb98   :  { %v7363_v17 = vpop.f32.mrf.mxu1 }
 0xb9a   :  { %v7365_v4 = vpop.f32.mrf.mxu1 }
 0xb9c   :  { %v7367_v16 = vpop.f32.mrf.mxu1 }
 0xb9d   :  { %v3504_v45 = vpack.c.bf16 %v7367_v16, %v7363_v17 }
 0xb9e   :  { %v7371_v57 = vpop.f32.mrf.mxu1 }
 0xb9f   :  { %v3503_v19 = vpack.c.bf16 %v7371_v57, %v7365_v4 }
 0xba0   :  { %v7375_v42 = vpop.f32.mrf.mxu1 }
 0xba2   :  { %v7377_v28 = vpop.f32.mrf.mxu1 }
 0xba4   :  { %v7379_v49 = vpop.f32.mrf.mxu1 }
 0xba5   :  { %v3506_v7 = vpack.c.bf16 %v7379_v49, %v7375_v42 }
 0xba6   :  { %v7383_v48 = vpop.f32.mrf.mxu1 }
 0xba7   :  { %v3505_v53 = vpack.c.bf16 %v7383_v48, %v7377_v28  ;;  %v4545_v48 = vld [vmem:[%s7581_s11 + $0x1] ss:$0 sm:$0xff] }
 0xbe4   :  { %v5101_v34 = vpop.f32.mrf.mxu1 }
 0xbe6   :  { %v3318_v61 = vpop.f32.mrf.mxu1 }
 0xbe8   :  { %v5102_v55 = vpop.f32.mrf.mxu1 }
 0xbe9   :  { %v3508_v56 = vpack.c.bf16 %v5102_v55, %v5101_v34 }
 0xbea   :  { %v3321_v21 = vpop.f32.mrf.mxu1 }
 0xbeb   :  { %v3507_v5 = vpack.c.bf16 %v3321_v21, %v3318_v61  ;;  %3525 = vrot.lane.b32.xlu0 %v3508_v56, %s5899_s29 }
 0xbed   :  { %3523 = vrot.lane.b32.xlu1 %v3507_v5, %s5899_s29 }
 0xbfc   :  { %v5105_v1 = vpop.f32.mrf.mxu1 }
 0xbfe   :  { %v3334_v38 = vpop.f32.mrf.mxu1 }
 0xc00   :  { %v5106_v27 = vpop.f32.mrf.mxu1 }
 0xc01   :  { %v3510_v15 = vpack.c.bf16 %v5106_v27, %v5105_v1 }
 0xc02   :  { %v3337_v32 = vpop.f32.mrf.mxu1 }
 0xc03   :  { %v3509_v52 = vpack.c.bf16 %v3337_v32, %v3334_v38 }
 0xc08   :  { %v5133_v13 = vpop.f32.mrf.mxu1 }
 0xc0a   :  { %v3472_v29 = vpop.f32.mrf.mxu1 }
 0xc0c   :  { %v5134_v9 = vpop.f32.mrf.mxu1 }
 0xc0d   :  { %v3516_v46 = vpack.c.bf16 %v5134_v9, %v5133_v13 }
 0xc0e   :  { %v3475_v20 = vpop.f32.mrf.mxu1 }
 0xc0f   :  { %v3515_v44 = vpack.c.bf16 %v3475_v20, %v3472_v29 }
 0xc22   :  { %v5117_v37 = vpop.f32.mrf.mxu0 }
 0xc24   :  { %v3395_v62 = vpop.f32.mrf.mxu0 }
 0xc26   :  { %v5118_v43 = vpop.f32.mrf.mxu0 }
 0xc27   :  { %v3512_v35 = vpack.c.bf16 %v5118_v43, %v5117_v37 }
 0xc28   :  { %v3398_v41 = vpop.f32.mrf.mxu0 }
 0xc29   :  { %v3511_v8 = vpack.c.bf16 %v3398_v41, %v3395_v62  ;;  %3537 = vrot.lane.b32.xlu0 %v3512_v35, %s5886_s28 }
 0xc2a   :  { %v5121_v40 = vpop.f32.mrf.mxu0 }
 0xc2b   :  { %3535 = vrot.lane.b32.xlu1 %v3511_v8, %s5886_s28 }
 0xc2c   :  { %v3411_v63 = vpop.f32.mrf.mxu0 }
 0xc2d   :  { %3549 = vrot.lane.b32.xlu0 %v3516_v46, %s5898_s5  ;;  %v5137_v23 = vpop.f32.mrf.mxu1 }
 0xc2e   :  { %v5122_v6 = vpop.f32.mrf.mxu0 }
 0xc2f   :  { %3547 = vrot.lane.b32.xlu1 %v3515_v44, %s5898_s5  ;;  %v3488_v10 = vpop.f32.mrf.mxu1  ;;  %v3514_v22 = vpack.c.bf16 %v5122_v6, %v5121_v40 }
 0xc30   :  { %v3414_v30 = vpop.f32.mrf.mxu0 }
 0xc31   :  { %3529 = vrot.lane.b32.xlu0 %v3510_v15, %s5899_s29  ;;  %v5138_v25 = vpop.f32.mrf.mxu1  ;;  %v3513_v3 = vpack.c.bf16 %v3414_v30, %v3411_v63 }
 0xc32   :  { %v3518_v2 = vpack.c.bf16 %v5138_v25, %v5137_v23 }
 0xc33   :  { %3527 = vrot.lane.b32.xlu1 %v3509_v52, %s5899_s29  ;;  %v3491_v11 = vpop.f32.mrf.mxu1  ;;  %v5297_v52 = vld [vmem:[#allocation16 + $0x74] ss:$8 sps:$4 sm:$0xff]  }
 0xc34   :  { %v3517_v14 = vpack.c.bf16 %v3491_v11, %v3488_v10  ;;  %3965 = vmatprep.subr.bf16.mxu1 %v5297_v52 }
 0xc35   :  { %3541 = vrot.lane.b32.xlu0 %v3514_v22, %s5886_s28 }
 0xc37   :  { %3539 = vrot.lane.b32.xlu1 %v3513_v3, %s5886_s28 }
 0xc39   :  { %3553 = vrot.lane.b32.xlu0 %v3518_v2, %s5898_s5 }
 0xc3b   :  { %3551 = vrot.lane.b32.xlu1 %v3517_v14, %s5898_s5 }
 0xc5d   :  { %v3526_v34 = vpop.permute.xlu0 %3525 }
 0xc5e   :  { %v3560_v21 = vsel %vm648_vm0, %v3504_v45, %v3526_v34 }
 0xc5f   :  { %v3524_v12 = vpop.permute.xlu1 %3523 }
 0xc60   :  { %v3557_v56 = vsel %vm648_vm0, %v3503_v19, %v3524_v12 }
 0xc9b   :  { %v3538_v61 = vpop.permute.xlu0 %3537 }
 0xc9c   :  { %v3570_v24 = vsel %vm1005_vm1, %v3560_v21, %v3538_v61 }
 0xc9d   :  { %v3536_v55 = vpop.permute.xlu1 %3535 }
 0xc9e   :  { %v3568_v5 = vsel %vm1005_vm1, %v3557_v56, %v3536_v55 }
 0xc9f   :  { %v3550_v26 = vpop.permute.xlu0 %3549 }
 0xca0   :  { %v3579_v38 = vsel %vm1754_vm2, %v3570_v24, %v3550_v26 }
 0xca1   :  { %v3548_v0 = vpop.permute.xlu1 %3547 }
 0xca2   :  { %v3576_v1 = vsel %vm1754_vm2, %v3568_v5, %v3548_v0 }
 0xca3   :  { %5155 = vmatprep.mubr.bf16.mxu0 %v3576_v1  ;;  %v3530_v27 = vpop.permute.xlu0 %3529 }
 0xca4   :  { %5156 = vmatmul.mubr.bf16.vlgmr.msra.gmra.mxu0 %v3579_v38  ;;  %v3566_v45 = vsel %vm648_vm0, %v3506_v7, %v3530_v27 }
 0xca5   :  { %v3528_v4 = vpop.permute.xlu1 %3527 }
 0xca6   :  { %v3563_v17 = vsel %vm648_vm0, %v3505_v53, %v3528_v4 }
 0xca7   :  { %v3542_v57 = vpop.permute.xlu0 %3541 }
 0xca8   :  { %v3574_v13 = vsel %vm1005_vm1, %v3566_v45, %v3542_v57 }
 0xca9   :  { %v3540_v19 = vpop.permute.xlu1 %3539 }
 0xcaa   :  { %v3572_v32 = vsel %vm1005_vm1, %v3563_v17, %v3540_v19  ;;  %v5300_v19 = vld [vmem:[#allocation16 + $0x64] ss:$8 sps:$4 sm:$0xff]  }
 0xcab   :  { %v3554_v16 = vpop.permute.xlu0 %3553 }
 0xcac   :  { %v3585_v29 = vsel %vm1754_vm2, %v3574_v13, %v3554_v16  ;;  %v5298_v16 = vld [vmem:[#allocation16 + $0x60] ss:$8 sps:$4 sm:$0xff]  }
 0xcad   :  { %v3552_v39 = vpop.permute.xlu1 %3551 }
 0xcae   :  { %v3582_v33 = vsel %vm1754_vm2, %v3572_v32, %v3552_v39 }
 0xcaf   :  { %5159 = vmatprep.mubr.bf16.mxu0 %v3582_v33  ;;  %v5303_v33 = vld [vmem:[#allocation16 + $0x54] ss:$8 sps:$4 sm:$0xff]  }
 0xcb0   :  { %5160 = vmatmul.mubr.bf16.gmra.mxu0 %v3585_v29  ;;  %v5301_v29 = vld [vmem:[#allocation16 + $0x50] ss:$8 sps:$4 sm:$0xff]  }
 0xd64   :  { %v5157_v28 = vpop.f32.mrf.mxu0 }
 0xd65   :  { %v3703_v43 = vadd.f32 %v5157_v28, %v4545_v48 }
 0xd66   :  { %v3694_v53 = vpop.f32.mrf.mxu0 }
 0xd67   :  { %v3695_v42 = vadd.f32 %v4545_v48, %v3694_v53  ;;  %v3727_v20 = vadd.f32 %v3703_v43, %v6799_v36  ;;  %v5295_v36 = vld [vmem:[#allocation16 + $0x70] ss:$8 sps:$4 sm:$0xff]   ;;  %v5304_v53 = vld [vmem:[#allocation16 + $0x40] ss:$8 sps:$4 sm:$0xff]   ;;  %v5318_v43 = vld [vmem:[#allocation16 + $0x4] ss:$8 sps:$4 sm:$0xff]  }
 0xd68   :  { %v5158_v49 = vpop.f32.mrf.mxu0  ;;  %3966 = vmatpush1.bf16.msra.mxu1 %v5295_v36 }
 0xd69   :  { %v3725_v7 = vadd.f32 %v3695_v42, %v6793_v18  ;;  %v3706_v37 = vadd.f32 %v5158_v49, %v4545_v48  ;;  %3967 = vmatprep.subr.bf16.mxu1 %v5300_v19  ;;  %v5309_v42 = vld [vmem:[#allocation16 + $0x34] ss:$8 sps:$4 sm:$0xff]   ;;  %v5307_v49 = vld [vmem:[#allocation16 + $0x30] ss:$8 sps:$4 sm:$0xff]  }
 0xd6a   :  { %v3697_v62 = vpop.f32.mrf.mxu0 }
 0xd6b   :  { %v3698_v9 = vadd.f32 %v4545_v48, %v3697_v62  ;;  %3737 = vadd.xlane.f32.xlu1 %v3725_v7  ;;  %v3728_v35 = vadd.f32 %v3706_v37, %v6801_v59  ;;  %v5310_v37 = vld [vmem:[#allocation16 + $0x20] ss:$8 sps:$4 sm:$0xff]   ;;  %v5315_v62 = vld [vmem:[#allocation16 + $0x14] ss:$8 sps:$4 sm:$0xff]  }
 0xd6c   :  { %3968 = vmatpush1.bf16.msra.mxu1 %v5298_v16 }
 0xd6d   :  { %v3726_v41 = vadd.f32 %v3698_v9, %v6795_v31  ;;  %3969 = vmatprep.subr.bf16.mxu1 %v5303_v33  ;;  %v5313_v9 = vld [vmem:[#allocation16 + $0x10] ss:$8 sps:$4 sm:$0xff]  }
 0xd6f   :  { %3739 = vadd.xlane.f32.xlu0 %v3726_v41  ;;  %3743 = vadd.xlane.f32.xlu1 %v3728_v35 }
 0xd70   :  { %v5161_v8 = vpop.f32.mrf.mxu0  ;;  %3970 = vmatpush1.bf16.msra.mxu1 %v5301_v29 }
 0xd71   :  { %v3719_v44 = vadd.f32 %v5161_v8, %v4545_v48  ;;  %v5320_v8 = vld [vmem:[#allocation17 + $0x38] sm:$0xff]  }
 0xd72   :  { %v3710_v40 = vpop.f32.mrf.mxu0 }
 0xd73   :  { %v3711_v46 = vadd.f32 %v4545_v48, %v3710_v40  ;;  %3741 = vadd.xlane.f32.xlu0 %v3727_v20  ;;  %v3731_v15 = vadd.f32 %v3719_v44, %v6824_v58  ;;  %v5322_v40 = vld [vmem:[#allocation17 + $0x30] sm:$0xff]   ;;  %v5325_v44 = vld [vmem:[#allocation17 + $0x60] sm:$0xff]  }
 0xd74   :  { %v5162_v63 = vpop.f32.mrf.mxu0 }
 0xd75   :  { %v3729_v18 = vadd.f32 %v3711_v46, %v6816_v51  ;;  %v3722_v59 = vadd.f32 %v5162_v63, %v4545_v48  ;;  %v5323_v46 = vld [vmem:[#allocation17 + $0x68] sm:$0xff]  }
 0xd76   :  { %v3713_v23 = vpop.f32.mrf.mxu0  ;;  %v5324_v63 = vld [vmem:[#allocation17 + $0x28] sm:$0xff]  }
 0xd77   :  { %v3714_v6 = vadd.f32 %v4545_v48, %v3713_v23  ;;  %3745 = vadd.xlane.f32.xlu0 %v3729_v18  ;;  %v3732_v10 = vadd.f32 %v3722_v59, %v6826_v47  ;;  %v5306_v48 = vld [vmem:[#allocation16 + $0x44] ss:$8 sps:$4 sm:$0xff]   ;;  %v5327_v23 = vld [vmem:[#allocation17 + $0x58] sm:$0xff]  }
 0xd78   :  { %3971 = vmatprep.subr.bf16.mxu1 %v5306_v48 }
 0xd79   :  { %v3730_v31 = vadd.f32 %v3714_v6, %v6818_v60  ;;  %3972 = vmatpush1.bf16.msra.mxu1 %v5304_v53  ;;  %v5328_v6 = vld [vmem:[#allocation17 + $0x18] sm:$0xff]  }
 0xd7a   :  { %3973 = vmatprep.subr.bf16.mxu1 %v5309_v42 }
 0xd7b   :  { %3747 = vadd.xlane.f32.xlu1 %v3730_v31  ;;  %3749 = vadd.xlane.f32.xlu0 %v3731_v15 }
 0xd7d   :  { %3974 = vmatpush1.bf16.msra.mxu1 %v5307_v49 }
 0xd7f   :  { %3751 = vadd.xlane.f32.xlu1 %v3732_v10 }
 0xdf4   :  { %v3738_v30 = vpop.xlane.xlu1 %3737 }
 0xdf5   :  { %v3753_v25 = vmul.f32 0.0078125, %v3738_v30 }
 0xdf7   :  { %v7434_v51 = vsub.f32 %v3725_v7, %v3753_v25  ;;  %v5312_v7 = vld [vmem:[#allocation16 + $0x24] ss:$8 sps:$4 sm:$0xff]  }
 0xdf8   :  { %v3744_v22 = vpop.xlane.xlu1 %3743  ;;  %v3740_v3 = vpop.xlane.xlu0 %3739  ;;  %3975 = vmatprep.subr.bf16.mxu1 %v5312_v7 }
 0xdf9   :  { %v3756_v11 = vmul.f32 0.0078125, %v3744_v22  ;;  %v3754_v58 = vmul.f32 0.0078125, %v3740_v3  ;;  %v3769_v60 = vmul.f32 %v7434_v51, %v7434_v51  ;;  %3976 = vmatpush1.bf16.msra.mxu1 %v5310_v37 }
 0xdfa   :  { %3977 = vmatprep.subr.bf16.mxu1 %v5315_v62 }
 0xdfb   :  { %v7438_v2 = vsub.f32 %v3726_v41, %v3754_v58  ;;  %3777 = vadd.xlane.f32.xlu0 %v3769_v60  ;;  %v7440_v14 = vsub.f32 %v3728_v35, %v3756_v11  ;;  %v5316_v35 = vld [vmem:[#allocation16] ss:$8 sps:$4 sm:$0xff]   ;;  %v5319_v41 = vld [vmem:[#allocation17 + $0x78] sm:$0xff]  }
 0xdfc   :  { %v3742_v47 = vpop.xlane.xlu0 %3741  ;;  %4771 = vmatprep.subr.bf16.mxu0 %v5319_v41 }
 0xdfd   :  { %v3755_v34 = vmul.f32 0.0078125, %v3742_v47  ;;  %v3770_v12 = vmul.f32 %v7438_v2, %v7438_v2  ;;  %v3772_v56 = vmul.f32 %v7440_v14, %v7440_v14  ;;  %3978 = vmatpush1.bf16.msra.mxu1 %v5313_v9  ;;  %4772 = vmatpush3.bf16.msra.mxu0 %v5320_v8 }
 0xdfe   :  { %3979 = vmatprep.subr.bf16.mxu1 %v5318_v43 }
 0xdff   :  { %v7444_v61 = vsub.f32 %v3727_v20, %v3755_v34  ;;  %3779 = vadd.xlane.f32.xlu1 %v3770_v12  ;;  %v5321_v20 = vld [vmem:[#allocation17 + $0x70] sm:$0xff]  }
 0xe00   :  { %v3746_v55 = vpop.xlane.xlu0 %3745  ;;  %4773 = vmatprep.subr.bf16.mxu0 %v5321_v20 }
 0xe01   :  { %v3757_v26 = vmul.f32 0.0078125, %v3746_v55  ;;  %v3771_v21 = vmul.f32 %v7444_v61, %v7444_v61  ;;  %3980 = vmatpush1.bf16.msra.mxu1 %v5316_v35  ;;  %4774 = vmatpush3.bf16.msra.mxu0 %v5322_v40 }
 0xe02   :  { %4775 = vmatprep.subr.bf16.mxu0 %v5323_v46 }
 0xe03   :  { %v7450_v5 = vsub.f32 %v3729_v18, %v3757_v26  ;;  %3783 = vadd.xlane.f32.xlu1 %v3772_v56  ;;  %3781 = vadd.xlane.f32.xlu0 %v3771_v21  ;;  %v5326_v18 = vld [vmem:[#allocation17 + $0x20] sm:$0xff]  }
 0xe04   :  { %v3748_v0 = vpop.xlane.xlu1 %3747  ;;  %v3750_v24 = vpop.xlane.xlu0 %3749 }
 0xe05   :  { %v3758_v1 = vmul.f32 0.0078125, %v3748_v0  ;;  %v3759_v38 = vmul.f32 0.0078125, %v3750_v24  ;;  %v3773_v27 = vmul.f32 %v7450_v5, %v7450_v5  ;;  %4776 = vmatpush3.bf16.msra.mxu0 %v5324_v63 }
 0xe06   :  { %4777 = vmatprep.subr.bf16.mxu0 %v5325_v44 }
 0xe07   :  { %v7454_v4 = vsub.f32 %v3730_v31, %v3758_v1  ;;  %v7456_v57 = vsub.f32 %v3731_v15, %v3759_v38  ;;  %3785 = vadd.xlane.f32.xlu0 %v3773_v27  ;;  %v4556_v38 = vld [vmem:[%s7586_s16 + $0x1] ss:$0 sm:$0xff] }
 0xe08   :  { %v3752_v17 = vpop.xlane.xlu1 %3751 }
 0xe09   :  { %v3760_v45 = vmul.f32 0.0078125, %v3752_v17  ;;  %v3774_v32 = vmul.f32 %v7454_v4, %v7454_v4  ;;  %v3775_v39 = vmul.f32 %v7456_v57, %v7456_v57  ;;  %4778 = vmatpush3.bf16.msra.mxu0 %v5326_v18 }
 0xe0a   :  { %4779 = vmatprep.subr.bf16.mxu0 %v5327_v23 }
 0xe0b   :  { %v7462_v13 = vsub.f32 %v3732_v10, %v3760_v45  ;;  %3787 = vadd.xlane.f32.xlu1 %v3774_v32  ;;  %3789 = vadd.xlane.f32.xlu0 %v3775_v39 }
 0xe0d   :  { %v3776_v28 = vmul.f32 %v7462_v13, %v7462_v13  ;;  %4780 = vmatpush3.bf16.msra.mxu0 %v5328_v6 }
 0xe0f   :  { %3791 = vadd.xlane.f32.xlu1 %v3776_v28 }
 0xe84   :  { %v3778_v15 = vpop.xlane.xlu0 %3777 }
 0xe85   :  { %v3793_v59 = vmul.f32 0.0078125, %v3778_v15 }
 0xe87   :  { %v3801_v31 = vadd.f32 1e-05, %v3793_v59 }
 0xe88   :  { %v3780_v10 = vpop.xlane.xlu1 %3779 }
 0xe89   :  { %5607 = vrsqrt.f32 %v3801_v31  ;;  %v3794_v36 = vmul.f32 0.0078125, %v3780_v10  ;;  %v5330_v31 = vld [vmem:[#allocation17 + $0x10] sm:$0xff]   ;;  %v5332_v10 = vld [vmem:[#allocation17 + $0x8] sm:$0xff]  }
 0xe8b   :  { %v3802_v52 = vadd.f32 1e-05, %v3794_v36  ;;  %v5333_v36 = vld [vmem:[#allocation17 + $0x40] sm:$0xff]  }
 0xe8c   :  { %v3784_v30 = vpop.xlane.xlu1 %3783  ;;  %v3782_v25 = vpop.xlane.xlu0 %3781 }
 0xe8d   :  { %5609 = vrsqrt.f32 %v3802_v52  ;;  %v3796_v22 = vmul.f32 0.0078125, %v3784_v30  ;;  %v3795_v3 = vmul.f32 0.0078125, %v3782_v25  ;;  %v5334_v52 = vld [vmem:[#allocation17] sm:$0xff]  }
 0xe8f   :  { %v3804_v11 = vadd.f32 1e-05, %v3796_v22  ;;  %v3803_v58 = vadd.f32 1e-05, %v3795_v3  ;;  %v7600_v22 = vld [vmem:[#allocation27_spill] sm:$0xff] }
 0xe90   :  { %v3786_v60 = vpop.xlane.xlu0 %3785 }
 0xe91   :  { %5611 = vrsqrt.f32 %v3804_v11  ;;  %v3797_v47 = vmul.f32 0.0078125, %v3786_v60 }
 0xe92   :  { %5613 = vrsqrt.f32 %v3803_v58 }
 0xe93   :  { %v3805_v34 = vadd.f32 1e-05, %v3797_v47 }
 0xe94   :  { %v3788_v12 = vpop.xlane.xlu1 %3787  ;;  %v3790_v55 = vpop.xlane.xlu0 %3789 }
 0xe95   :  { %v3798_v26 = vmul.f32 0.0078125, %v3788_v12  ;;  %5615 = vrsqrt.f32 %v3805_v34  ;;  %v3799_v24 = vmul.f32 0.0078125, %v3790_v55 }
 0xe96   :  { %v5608_v56 = vpop.eup %5607 }
 0xe97   :  { %v3817_v21 = vmul.f32 %v5608_v56, %v7434_v51  ;;  %v3806_v0 = vadd.f32 1e-05, %v3798_v26  ;;  %v3807_v16 = vadd.f32 1e-05, %v3799_v24  ;;  %v4557_v51 = vld [vmem:[%s7587_s17 + $0x1] ss:$0 sm:$0xff] }
 0xe98   :  { %v3792_v1 = vpop.xlane.xlu1 %3791 }
 0xe99   :  { %5617 = vrsqrt.f32 %v3806_v0  ;;  %v3800_v27 = vmul.f32 0.0078125, %v3792_v1  ;;  %v3831_v32 = vmul.f32 %v4556_v38, %v3817_v21 }
 0xe9a   :  { %v5610_v19 = vpop.eup %5609 }
 0xe9b   :  { %v3818_v17 = vmul.f32 %v5610_v19, %v7438_v2  ;;  %v3808_v45 = vadd.f32 1e-05, %v3800_v27  ;;  %v7474_v28 = vadd.f32 %v4557_v51, %v3831_v32 }
 0xe9d   :  { %5619 = vrsqrt.f32 %v3808_v45  ;;  %v3832_v39 = vmul.f32 %v4556_v38, %v3818_v17 }
 0xe9e   :  { %v5612_v33 = vpop.eup %5611  ;;  %5621 = vrsqrt.f32 %v3807_v16 }
 0xe9f   :  { %v5614_v29 = vpop.eup %5613  ;;  %v7476_v48 = vadd.f32 %v4557_v51, %v3832_v39  ;;  %v3820_v53 = vmul.f32 %v5612_v33, %v7440_v14 }
 0xea0   :  { %v3819_v2 = vmul.f32 %v5614_v29, %v7444_v61 }
 0xea1   :  { %v3853_v42 = vpack.c.bf16 %v7476_v48, %v7474_v28  ;;  %v3834_v49 = vmul.f32 %v4556_v38, %v3820_v53 }
 0xea2   :  { %v3833_v7 = vmul.f32 %v4556_v38, %v3819_v2  ;;  %v5616_v37 = vpop.eup %5615 }
 0xea3   :  { %3998 = vmatmul.mubr.bf16.vlgmr.msra.gmra.mxu1 %v3853_v42  ;;  %v7485_v9 = vadd.f32 %v4557_v51, %v3834_v49  ;;  %v3821_v35 = vmul.f32 %v5616_v37, %v7450_v5 }
 0xea4   :  { %4007 = vmatprep.mubr.bf16.mxu1 %v7599_v54  ;;  %v7483_v62 = vadd.f32 %v4557_v51, %v3833_v7 }
 0xea5   :  { %v3835_v20 = vmul.f32 %v4556_v38, %v3821_v35 }
 0xea6   :  { %v5618_v43 = vpop.eup %5617  ;;  %v3854_v61 = vpack.c.bf16 %v7485_v9, %v7483_v62 }
 0xea7   :  { %v3822_v14 = vmul.f32 %v5618_v43, %v7454_v4  ;;  %v7495_v44 = vadd.f32 %v4557_v51, %v3835_v20 }
 0xea9   :  { %v3836_v41 = vmul.f32 %v4556_v38, %v3822_v14 }
 0xeaa   :  { %v5620_v8 = vpop.eup %5619 }
 0xeab   :  { %4008 = vmatmul.mubr.bf16.gmra.mxu1 %v3854_v61  ;;  %v5622_v40 = vpop.eup %5621  ;;  %v7492_v46 = vadd.f32 %v4557_v51, %v3836_v41  ;;  %v3824_v63 = vmul.f32 %v5620_v8, %v7462_v13  ;;  %v5329_v13 = vld [vmem:[#allocation17 + $0x50] sm:$0xff]  }
 0xeac   :  { %4017 = vmatprep.mubr.bf16.mxu1 %v7599_v54  ;;  %v3823_v5 = vmul.f32 %v5622_v40, %v7456_v57  ;;  %4781 = vmatprep.subr.bf16.mxu0 %v5329_v13  ;;  %v5331_v57 = vld [vmem:[#allocation17 + $0x48] sm:$0xff]  }
 0xead   :  { %v3855_v4 = vpack.c.bf16 %v7492_v46, %v7495_v44  ;;  %v3838_v18 = vmul.f32 %v4556_v38, %v3824_v63  ;;  %4782 = vmatpush3.bf16.msra.mxu0 %v5330_v31 }
 0xeae   :  { %v3837_v23 = vmul.f32 %v4556_v38, %v3823_v5  ;;  %4783 = vmatprep.subr.bf16.mxu0 %v5331_v57 }
 0xeaf   :  { %v7501_v6 = vadd.f32 %v4557_v51, %v3838_v18 }
 0xeb0   :  { %v7503_v15 = vadd.f32 %v4557_v51, %v3837_v23 }
 0xeb1   :  { %4784 = vmatpush3.bf16.msra.mxu0 %v5332_v10 }
 0xeb2   :  { %v3856_v59 = vpack.c.bf16 %v7501_v6, %v7503_v15  ;;  %4785 = vmatprep.subr.bf16.mxu0 %v5333_v36 }
 0xeb3   :  { %4018 = vmatmul.mubr.bf16.gmra.mxu1 %v3855_v4 }
 0xeb4   :  { %4027 = vmatprep.mubr.bf16.mxu1 %v7599_v54  ;;  %v3873_v54 = vld [vmem:[%s7583_s13] sm:$0x3] }
 0xeb5   :  { %4786 = vmatpush3.bf16.msra.mxu0 %v5334_v52  ;;  %v3882_v25 = vrot.slane %v3873_v54, %v6076_v50  ;;  %v3878_v3 = vrot.slane %v3873_v54, %v7600_v22 }
 0xebb   :  { %4028 = vmatmul.mubr.bf16.gmra.mxu1 %v3856_v59 }
 0xf63   :  { %v3999_v30 = vpop.f32.mrf.mxu1 }
 0xf64   :  { %v4000_v34 = vadd.f32 %v3999_v30, %v3878_v3 }
 0xf65   :  { %v4001_v11 = vpop.f32.mrf.mxu1 }
 0xf66   :  { %v4002_v60 = vadd.f32 %v4001_v11, %v3882_v25  ;;  %v4038_v24 = vmax.f32 %v4000_v34, 0.0 }
 0xf67   :  { %v4003_v58 = vpop.f32.mrf.mxu1 }
 0xf68   :  { %v4004_v47 = vadd.f32 %v4003_v58, %v3878_v3  ;;  %v4039_v21 = vmax.f32 %v4002_v60, 0.0  ;;  %v4574_v60 = vld [vmem:[%s7585_s15] ss:$0 sm:$0xff] }
 0xf69   :  { %v4005_v12 = vpop.f32.mrf.mxu1 }
 0xf6a   :  { %v4006_v55 = vadd.f32 %v4005_v12, %v3882_v25  ;;  %v4040_v26 = vmax.f32 %v4004_v47, 0.0 }
 0xf6b   :  { %v4009_v56 = vpop.f32.mrf.mxu1 }
 0xf6c   :  { %v4041_v0 = vmax.f32 %v4006_v55, 0.0  ;;  %v4054_v27 = vpack.c.bf16 %v4040_v26, %v4038_v24  ;;  %v4010_v16 = vadd.f32 %v4009_v56, %v3878_v3 }
 0xf6d   :  { %v4011_v1 = vpop.f32.mrf.mxu1 }
 0xf6e   :  { %v4055_v38 = vpack.c.bf16 %v4041_v0, %v4039_v21  ;;  %v4012_v17 = vadd.f32 %v4011_v1, %v3882_v25  ;;  %v4042_v53 = vmax.f32 %v4010_v16, 0.0 }
 0xf6f   :  { %v4013_v19 = vpop.f32.mrf.mxu1 }
 0xf70   :  { %v4014_v50 = vadd.f32 %v4013_v19, %v3878_v3  ;;  %4229 = vmatprep.mubr.bf16.mxu0 %v4055_v38  ;;  %v4043_v33 = vmax.f32 %v4012_v17, 0.0 }
 0xf71   :  { %v4015_v45 = vpop.f32.mrf.mxu1  ;;  %4230 = vmatmul.mubr.bf16.vlgmr.msra.gmra.mxu0 %v4054_v27 }
 0xf72   :  { %v4016_v32 = vadd.f32 %v4015_v45, %v3882_v25  ;;  %v4044_v51 = vmax.f32 %v4014_v50, 0.0 }
 0xf73   :  { %v4019_v39 = vpop.f32.mrf.mxu1 }
 0xf74   :  { %v4045_v29 = vmax.f32 %v4016_v32, 0.0  ;;  %v4056_v49 = vpack.c.bf16 %v4044_v51, %v4042_v53  ;;  %v4020_v35 = vadd.f32 %v4019_v39, %v3878_v3 }
 0xf75   :  { %v4021_v2 = vpop.f32.mrf.mxu1 }
 0xf76   :  { %v4057_v42 = vpack.c.bf16 %v4045_v29, %v4043_v33  ;;  %v4022_v37 = vadd.f32 %v4021_v2, %v3882_v25  ;;  %v4046_v63 = vmax.f32 %v4020_v35, 0.0 }
 0xf77   :  { %v4023_v7 = vpop.f32.mrf.mxu1 }
 0xf78   :  { %v4024_v43 = vadd.f32 %v4023_v7, %v3878_v3  ;;  %4237 = vmatprep.mubr.bf16.mxu0 %v4057_v42  ;;  %v4047_v20 = vmax.f32 %v4022_v37, 0.0 }
 0xf79   :  { %v4025_v14 = vpop.f32.mrf.mxu1  ;;  %4238 = vmatmul.mubr.bf16.gmra.mxu0 %v4056_v49 }
 0xf7a   :  { %v4026_v61 = vadd.f32 %v4025_v14, %v3882_v25  ;;  %v4048_v41 = vmax.f32 %v4024_v43, 0.0 }
 0xf7b   :  { %v4029_v8 = vpop.f32.mrf.mxu1 }
 0xf7c   :  { %v4049_v40 = vmax.f32 %v4026_v61, 0.0  ;;  %v4058_v18 = vpack.c.bf16 %v4048_v41, %v4046_v63  ;;  %v4030_v31 = vadd.f32 %v4029_v8, %v3878_v3 }
 0xf7d   :  { %v4031_v5 = vpop.f32.mrf.mxu1 }
 0xf7e   :  { %v4059_v4 = vpack.c.bf16 %v4049_v40, %v4047_v20  ;;  %v4032_v59 = vadd.f32 %v4031_v5, %v3882_v25  ;;  %v4050_v30 = vmax.f32 %v4030_v31, 0.0 }
 0xf7f   :  { %v4033_v23 = vpop.f32.mrf.mxu1 }
 0xf80   :  { %v4034_v13 = vadd.f32 %v4033_v23, %v3878_v3  ;;  %4245 = vmatprep.mubr.bf16.mxu0 %v4059_v4  ;;  %v4051_v52 = vmax.f32 %v4032_v59, 0.0 }
 0xf81   :  { %v4035_v57 = vpop.f32.mrf.mxu1  ;;  %4246 = vmatmul.mubr.bf16.gmra.mxu0 %v4058_v18 }
 0xf82   :  { %v4036_v10 = vadd.f32 %v4035_v57, %v3882_v25  ;;  %v4052_v36 = vmax.f32 %v4034_v13, 0.0 }
 0xf84   :  { %v4053_v54 = vmax.f32 %v4036_v10, 0.0  ;;  %v4060_v11 = vpack.c.bf16 %v4052_v36, %v4050_v30 }
 0xf86   :  { %v4061_v22 = vpack.c.bf16 %v4053_v54, %v4051_v52 }
 0xf88   :  { %4253 = vmatprep.mubr.bf16.mxu0 %v4061_v22 }
 0xf89   :  { %4254 = vmatmul.mubr.bf16.gmra.mxu0 %v4060_v11 }
0x1031   :  { %v4787_v58 = vpop.f32.mrf.mxu0 }
0x1033   :  { %v4788_v47 = vpop.f32.mrf.mxu0 }
0x1034   :  { %v4789_v34 = vadd.f32 %v4788_v47, %v4787_v58 }
0x1035   :  { %v4790_v12 = vpop.f32.mrf.mxu0 }
0x1036   :  { %v4232_v3 = vadd.f32 %v4789_v34, %v4574_v60 }
0x1037   :  { %v4791_v55 = vpop.f32.mrf.mxu0 }
0x1038   :  { %v4792_v26 = vadd.f32 %v4791_v55, %v4790_v12  ;;  %v4262_v25 = vadd.f32 %v4232_v3, %v7474_v28 }
0x1039   :  { %v4793_v56 = vpop.f32.mrf.mxu0 }
0x103a   :  { %v4235_v21 = vadd.f32 %v4792_v26, %v4574_v60  ;;  %4274 = vadd.xlane.f32.xlu0 %v4262_v25 }
0x103b   :  { %v4794_v0 = vpop.f32.mrf.mxu0 }
0x103c   :  { %v4795_v24 = vadd.f32 %v4794_v0, %v4793_v56  ;;  %v4263_v1 = vadd.f32 %v4235_v21, %v7476_v48 }
0x103d   :  { %v4796_v38 = vpop.f32.mrf.mxu0 }
0x103e   :  { %v4240_v27 = vadd.f32 %v4795_v24, %v4574_v60  ;;  %4276 = vadd.xlane.f32.xlu1 %v4263_v1 }
0x103f   :  { %v4797_v19 = vpop.f32.mrf.mxu0 }
0x1040   :  { %v4798_v17 = vadd.f32 %v4797_v19, %v4796_v38  ;;  %v4264_v50 = vadd.f32 %v4240_v27, %v7483_v62 }
0x1041   :  { %v4799_v16 = vpop.f32.mrf.mxu0 }
0x1042   :  { %v4243_v45 = vadd.f32 %v4798_v17, %v4574_v60  ;;  %4278 = vadd.xlane.f32.xlu0 %v4264_v50 }
0x1043   :  { %v4800_v32 = vpop.f32.mrf.mxu0 }
0x1044   :  { %v4801_v51 = vadd.f32 %v4800_v32, %v4799_v16  ;;  %v4265_v28 = vadd.f32 %v4243_v45, %v7485_v9 }
0x1045   :  { %v4802_v39 = vpop.f32.mrf.mxu0 }
0x1046   :  { %v4248_v33 = vadd.f32 %v4801_v51, %v4574_v60  ;;  %4280 = vadd.xlane.f32.xlu1 %v4265_v28 }
0x1047   :  { %v4803_v29 = vpop.f32.mrf.mxu0 }
0x1048   :  { %v4804_v53 = vadd.f32 %v4803_v29, %v4802_v39  ;;  %v4266_v48 = vadd.f32 %v4248_v33, %v7495_v44  ;;  %v4593_v39 = vld [vmem:[%s7586_s16 + $0x2] ss:$0 sm:$0xff]  ;;  %s5900_s16 = smov [#allocation19]  }
0x1049   :  { %v4805_v2 = vpop.f32.mrf.mxu0 }
0x104a   :  { %v4251_v42 = vadd.f32 %v4804_v53, %v4574_v60  ;;  %4282 = vadd.xlane.f32.xlu0 %v4266_v48  ;;  %v4594_v53 = vld [vmem:[%s7587_s17 + $0x2] ss:$0 sm:$0xff]  ;;  %s4403_s17 = sshll.u32 %s5900_s16, 4  ;;  %s4404_s17 = int_to_ptr.vmem [resolvable:$true] %s4403_s17 }
0x104b   :  { %v4806_v49 = vpop.f32.mrf.mxu0  ;;  %s5847_s5 = scalar_lea.vmem %s4404_s17, 1024  ;;  %p5852_p9 = scmp.lt.s32.totalorder %s4404_s17, %s4404_s17 }
0x104c   :  { %v4807_v7 = vadd.f32 %v4806_v49, %v4805_v2  ;;  %v4267_v62 = vadd.f32 %v4251_v42, %v7492_v46  ;;  %p5848_p8 = scmp.ne.s32.totalorder %s4404_s17, %s5847_s5  ;;  %p5853_p10 = scmp.lt.s32.totalorder %s5847_s5, %s5847_s5 }
0x104d   :  { %v4808_v37 = vpop.f32.mrf.mxu0 }
0x104e   :  { %v4256_v43 = vadd.f32 %v4807_v7, %v4574_v60  ;;  %4284 = vadd.xlane.f32.xlu1 %v4267_v62  ;;  %p5854_p11 = por %p5853_p10, %p5852_p9 }
0x104f   :  { %v4809_v35 = vpop.f32.mrf.mxu0 }
0x1050   :  { %v4810_v14 = vadd.f32 %v4809_v35, %v4808_v37  ;;  %v4268_v9 = vadd.f32 %v4256_v43, %v7503_v15  ;;  %p5855_p12 = pnand %p5854_p11, %p5848_p8 }
0x1052   :  { %v4259_v61 = vadd.f32 %v4810_v14, %v4574_v60  ;;  %4286 = vadd.xlane.f32.xlu0 %v4268_v9 }
0x1054   :  { %v4269_v41 = vadd.f32 %v4259_v61, %v7501_v6 }
0x1056   :  { %4288 = vadd.xlane.f32.xlu1 %v4269_v41 }
0x10c3   :  { %v4275_v44 = vpop.xlane.xlu0 %4274 }
0x10c4   :  { %v4290_v8 = vmul.f32 0.0078125, %v4275_v44 }
0x10c6   :  { %v4298_v20 = vsub.f32 %v4262_v25, %v4290_v8 }
0x10c7   :  { %v4277_v40 = vpop.xlane.xlu1 %4276 }
0x10c8   :  { %v4291_v63 = vmul.f32 0.0078125, %v4277_v40  ;;  %v4306_v5 = vmul.f32 %v4298_v20, %v4298_v20 }
0x10ca   :  { %v7523_v4 = vsub.f32 %v4263_v1, %v4291_v63  ;;  %4314 = vadd.xlane.f32.xlu0 %v4306_v5 }
0x10cb   :  { %v4279_v46 = vpop.xlane.xlu0 %4278 }
0x10cc   :  { %v4292_v18 = vmul.f32 0.0078125, %v4279_v46  ;;  %v4307_v23 = vmul.f32 %v7523_v4, %v7523_v4 }
0x10ce   :  { %v7527_v15 = vsub.f32 %v4264_v50, %v4292_v18  ;;  %4316 = vadd.xlane.f32.xlu1 %v4307_v23 }
0x10cf   :  { %v4281_v59 = vpop.xlane.xlu1 %4280 }
0x10d0   :  { %v4293_v6 = vmul.f32 0.0078125, %v4281_v59  ;;  %v4308_v13 = vmul.f32 %v7527_v15, %v7527_v15 }
0x10d2   :  { %v7531_v31 = vsub.f32 %v4265_v28, %v4293_v6  ;;  %4318 = vadd.xlane.f32.xlu0 %v4308_v13 }
0x10d3   :  { %v4283_v57 = vpop.xlane.xlu0 %4282 }
0x10d4   :  { %v4294_v10 = vmul.f32 0.0078125, %v4283_v57  ;;  %v4309_v36 = vmul.f32 %v7531_v31, %v7531_v31 }
0x10d6   :  { %v7535_v52 = vsub.f32 %v4266_v48, %v4294_v10  ;;  %4320 = vadd.xlane.f32.xlu1 %v4309_v36 }
0x10d7   :  { %v4285_v54 = vpop.xlane.xlu1 %4284 }
0x10d8   :  { %v4295_v30 = vmul.f32 0.0078125, %v4285_v54  ;;  %v4310_v22 = vmul.f32 %v7535_v52, %v7535_v52 }
0x10da   :  { %v7539_v11 = vsub.f32 %v4267_v62, %v4295_v30  ;;  %4322 = vadd.xlane.f32.xlu0 %v4310_v22 }
0x10db   :  { %v4287_v58 = vpop.xlane.xlu0 %4286 }
0x10dc   :  { %v4296_v60 = vmul.f32 0.0078125, %v4287_v58  ;;  %v4311_v47 = vmul.f32 %v7539_v11, %v7539_v11 }
0x10de   :  { %v7543_v34 = vsub.f32 %v4268_v9, %v4296_v60  ;;  %4324 = vadd.xlane.f32.xlu1 %v4311_v47 }
0x10df   :  { %v4289_v12 = vpop.xlane.xlu1 %4288 }
0x10e0   :  { %v4297_v3 = vmul.f32 0.0078125, %v4289_v12  ;;  %v4312_v55 = vmul.f32 %v7543_v34, %v7543_v34 }
0x10e2   :  { %v7547_v26 = vsub.f32 %v4269_v41, %v4297_v3  ;;  %4326 = vadd.xlane.f32.xlu0 %v4312_v55 }
0x10e4   :  { %v4313_v25 = vmul.f32 %v7547_v26, %v7547_v26 }
0x10e6   :  { %4328 = vadd.xlane.f32.xlu1 %v4313_v25 }
0x1153   :  { %v4315_v56 = vpop.xlane.xlu0 %4314 }
0x1154   :  { %v4330_v21 = vmul.f32 0.0078125, %v4315_v56 }
0x1156   :  { %v4338_v0 = vadd.f32 1e-05, %v4330_v21 }
0x1157   :  { %v4317_v24 = vpop.xlane.xlu1 %4316 }
0x1158   :  { %5623 = vrsqrt.f32 %v4338_v0  ;;  %v4331_v1 = vmul.f32 0.0078125, %v4317_v24 }
0x115a   :  { %v4339_v38 = vadd.f32 1e-05, %v4331_v1 }
0x115b   :  { %v4319_v27 = vpop.xlane.xlu0 %4318 }
0x115c   :  { %5625 = vrsqrt.f32 %v4339_v38  ;;  %v4332_v19 = vmul.f32 0.0078125, %v4319_v27 }
0x115e   :  { %v4340_v17 = vadd.f32 1e-05, %v4332_v19 }
0x115f   :  { %v4321_v50 = vpop.xlane.xlu1 %4320 }
0x1160   :  { %5627 = vrsqrt.f32 %v4340_v17  ;;  %v4333_v16 = vmul.f32 0.0078125, %v4321_v50 }
0x1162   :  { %v4341_v45 = vadd.f32 1e-05, %v4333_v16 }
0x1163   :  { %v4323_v32 = vpop.xlane.xlu0 %4322 }
0x1164   :  { %5629 = vrsqrt.f32 %v4341_v45  ;;  %v4334_v51 = vmul.f32 0.0078125, %v4323_v32 }
0x1165   :  { %v5624_v28 = vpop.eup %5623 }
0x1166   :  { %v4354_v33 = vmul.f32 %v5624_v28, %v4298_v20  ;;  %v4342_v29 = vadd.f32 1e-05, %v4334_v51 }
0x1167   :  { %v4325_v48 = vpop.xlane.xlu1 %4324 }
0x1168   :  { %v4368_v2 = vmul.f32 %v4593_v39, %v4354_v33  ;;  %5631 = vrsqrt.f32 %v4342_v29  ;;  %v4335_v42 = vmul.f32 0.0078125, %v4325_v48 }
0x1169   :  { %v5626_v49 = vpop.eup %5625 }
0x116a   :  { %v4382_v7 = vadd.f32 %v4594_v53, %v4368_v2  ;;  %v4355_v62 = vmul.f32 %v5626_v49, %v7523_v4  ;;  %v4343_v37 = vadd.f32 1e-05, %v4335_v42 }
0x116b   :  { %v4327_v43 = vpop.xlane.xlu0 %4326 }
0x116c   :  { %4390 = vst [vmem:[#allocation19] sm:$0xff] %v4382_v7  ;;  %v4369_v35 = vmul.f32 %v4593_v39, %v4355_v62  ;;  %5633 = vrsqrt.f32 %v4343_v37  ;;  %v4336_v14 = vmul.f32 0.0078125, %v4327_v43 }
0x116d   :  { %v5628_v9 = vpop.eup %5627 }
0x116e   :  { %v4383_v61 = vadd.f32 %v4594_v53, %v4369_v35  ;;  %v4356_v41 = vmul.f32 %v5628_v9, %v7527_v15  ;;  %v4344_v44 = vadd.f32 1e-05, %v4336_v14 }
0x116f   :  { %v4329_v8 = vpop.xlane.xlu1 %4328 }
0x1170   :  { %4391 = vst [vmem:[#allocation19 + $0x8] sm:$0xff] %v4383_v61  ;;  %v4370_v20 = vmul.f32 %v4593_v39, %v4356_v41  ;;  %5635 = vrsqrt.f32 %v4344_v44  ;;  %v4337_v40 = vmul.f32 0.0078125, %v4329_v8 }
0x1171   :  { %v5630_v63 = vpop.eup %5629 }
0x1172   :  { %v4384_v5 = vadd.f32 %v4594_v53, %v4370_v20  ;;  %v4357_v4 = vmul.f32 %v5630_v63, %v7531_v31  ;;  %v4345_v46 = vadd.f32 1e-05, %v4337_v40 }
0x1174   :  { %4392 = vst [vmem:[#allocation19 + $0x10] sm:$0xff] %v4384_v5  ;;  %v4371_v18 = vmul.f32 %v4593_v39, %v4357_v4  ;;  %5637 = vrsqrt.f32 %v4345_v46 }
0x1175   :  { %v5632_v23 = vpop.eup %5631 }
0x1176   :  { %v4385_v59 = vadd.f32 %v4594_v53, %v4371_v18  ;;  %v4358_v6 = vmul.f32 %v5632_v23, %v7535_v52 }
0x1178   :  { %4393 = vst [vmem:[#allocation19 + $0x18] sm:$0xff] %v4385_v59  ;;  %v4372_v15 = vmul.f32 %v4593_v39, %v4358_v6 }
0x1179   :  { %v5634_v13 = vpop.eup %5633 }
0x117a   :  { %v4386_v57 = vadd.f32 %v4594_v53, %v4372_v15  ;;  %v4359_v10 = vmul.f32 %v5634_v13, %v7539_v11 }
0x117c   :  { %4394 = vst [vmem:[#allocation19 + $0x20] sm:$0xff] %v4386_v57  ;;  %v4373_v36 = vmul.f32 %v4593_v39, %v4359_v10 }
0x117d   :  { %v5636_v54 = vpop.eup %5635 }
0x117e   :  { %v4387_v30 = vadd.f32 %v4594_v53, %v4373_v36  ;;  %v4360_v31 = vmul.f32 %v5636_v54, %v7543_v34 }
0x1180   :  { %4395 = vst [vmem:[#allocation19 + $0x28] sm:$0xff] %v4387_v30  ;;  %v4374_v22 = vmul.f32 %v4593_v39, %v4360_v31 }
0x1181   :  { %v5638_v58 = vpop.eup %5637 }
0x1182   :  { %v4388_v60 = vadd.f32 %v4594_v53, %v4374_v22  ;;  %v4361_v47 = vmul.f32 %v5638_v58, %v7547_v26 }
0x1184   :  { %4396 = vst [vmem:[#allocation19 + $0x30] sm:$0xff] %v4388_v60  ;;  %v4375_v52 = vmul.f32 %v4593_v39, %v4361_v47 }
0x1186   :  { %v4389_v12 = vadd.f32 %v4594_v53, %v4375_v52 }
0x1188   :  { %4397 = vst [vmem:[#allocation19 + $0x38] sm:$0xff] %v4389_v12 }
0x1189   :  { %5858 = shalt.err (!%p5855_p12)
}
0x118a   :  { %4409 = dma.vmem_to_hbm [thread:$0]  %s4404_s17, 1024, %s7588_s18, [#allocation4], %s5883_s19, %s5883_s19, %s5884_s1  }
0x118b   :  { %5879 = dma.done.wait [#allocation4], 1024  }
0x118c   :  { %5880 = vsyncadd [#allocation4], 4294966272 }
0x118d   :  { %4413 = vsyncpa [#allocation3], 1 }
0x118e   :  { %4414 = vsyncpa [#allocation6], 1 }
0x118f   :  { %4415 = vsyncpa [#allocation9], 1 }
0x1190   :  { %4416 = vsyncpa [#allocation12], 1 }
0x1191   :  { %4417 = vsyncpa [#allocation15], 1 }
0x1192   :  { %4418 = vsyncpa [#allocation18], 1 }
0x1193   :  { %4419 = vsyncpa [#allocation4], 1 }

</bundles_post_ra>
